<compile_context>
chip_gen: v5e
topology: v5e:2x2
jax: 0.10.0
libtpu: 0.0.40
codegen_flags: <defaults>
</compile_context>

<pallas_src>
import math

import jax
import jax.numpy as jnp
from jax.experimental import pallas as pl
from jax.experimental.pallas import tpu as pltpu


# ----------------------------------------------------------------------------
# Fused conv kernel
# ----------------------------------------------------------------------------
def _make_conv_kernel(*, TH, W, Cin, Cout, in_bn, emit_stats, out_relu,
                      compute_dtype):
    """3x3 'same' conv (+bias) with optional fused input BN+ReLU, output ReLU
    and per-channel (sum, centered-M2) stats emission.

    Ref order: [scale, shift]?, x_main, x_top, x_bot, w, b,
               o, [sum, m2]?, xpk_scratch
    """
    R = TH + 2  # rows including the 1-row halos

    def kernel(*refs):
        i = 0
        if in_bn:
            scale_ref, shift_ref = refs[i], refs[i + 1]
            i += 2
        x_ref, top_ref, bot_ref = refs[i], refs[i + 1], refs[i + 2]
        i += 3
        w_ref, b_ref = refs[i], refs[i + 1]
        i += 2
        o_ref = refs[i]
        i += 1
        if emit_stats:
            sum_ref, m2_ref = refs[i], refs[i + 1]
            i += 2
        xpk_ref = refs[i]

        h = pl.program_id(1)
        nh = pl.num_programs(1)

        # Previous layer's BN affine, hoisted (broadcast_in_dim is not CSE'd).
        if in_bn:
            sc = scale_ref[...].reshape(1, 1, Cin)
            sh = shift_ref[...].reshape(1, 1, Cin)

        def load_act(v):  # fused previous-layer BatchNorm + ReLU on load
            v = v.astype(jnp.float32)
            if in_bn:
                v = jnp.maximum(v * sc + sh, 0.0)
            return v

        # --- rows incl. halos; out-of-image halos are zeroed ------------------
        body = load_act(x_ref[0])                                # (TH, W, Cin)
        top = jnp.where(h > 0, load_act(top_ref[0]), 0.0)        # (1, W, Cin)
        bot = jnp.where(h < nh - 1, load_act(bot_ref[0]), 0.0)   # (1, W, Cin)
        rows = jnp.concatenate([top, body, bot], axis=0)         # (R, W, Cin) f32

        # --- dx = -1 / 0 / +1 shifts: XLU roll along W + edge masking ---------
        # (no W+2 padded buffer, no sublane-misaligned slices; packed ONCE)
        col = jax.lax.broadcasted_iota(jnp.int32, (R, W, Cin), 1)
        left = jnp.where(col == 0, 0.0,
                         pltpu.roll(rows, shift=1, axis=1))       # in[x-1]
        right = jnp.where(col == W - 1, 0.0,
                          pltpu.roll(rows, shift=W - 1, axis=1))  # in[x+1]
        xpk_ref[...] = jnp.concatenate(
            [left.astype(compute_dtype), rows.astype(compute_dtype),
             right.astype(compute_dtype)], axis=-1)               # (R, W, 3*Cin)

        # --- 3x3 conv: 3 bf16 MXU matmuls (K = 3*Cin), f32 accumulation,
        #     chained as one traced expression (no f32 RMW scratch) -----------
        z = None
        for dy in range(3):
            patch = xpk_ref[dy:dy + TH].reshape(TH * W, 3 * Cin)
            part = jnp.dot(patch, w_ref[dy],
                           preferred_element_type=jnp.float32)
            z = part if z is None else z + part
        z = z + b_ref[...].astype(jnp.float32)                    # (TH*W, Cout)

        if emit_stats:
            # per-block partial sum and per-block-CENTERED sum of squares;
            # combined Chan/Welford-style in XLA (avoids E[x^2]-E[x]^2
            # cancellation across the whole batch).
            s = jnp.sum(z, axis=0, keepdims=True)                 # (1, Cout)
            zc = z - s * (1.0 / float(TH * W))
            sum_ref[...] = s.reshape(1, 1, 1, Cout)
            m2_ref[...] = jnp.sum(zc * zc, axis=0,
                                  keepdims=True).reshape(1, 1, 1, Cout)

        if out_relu:
            z = jnp.maximum(z, 0.0)

        o_ref[...] = z.reshape(1, TH, W, Cout).astype(o_ref.dtype)

    return kernel


# ----------------------------------------------------------------------------
# Wrapper
# ----------------------------------------------------------------------------
def _pick_tile_rows(H, W, Cin, Cout, in_itemsize, out_itemsize,
                    budget_bytes=20 * 1024 * 1024):
    """Largest divisor of H whose FULL per-block VMEM footprint (double-
    buffered in/out, halo rows, bf16 packed-patch scratch, f32 temporaries,
    weights) fits `budget_bytes` (~0.4x the scoped-VMEM limit set below)."""
    # TODO(synk): replace the divisibility requirement with a cdiv grid +
    # masked tail block so the tile size is driven purely by the VMEM budget.
    def footprint(th):
        r = th + 2
        act_in = 2 * th * W * Cin * in_itemsize            # double-buffered in
        act_out = 2 * th * W * Cout * out_itemsize         # double-buffered out
        halo = 2 * 2 * 2 * W * Cin * in_itemsize           # 2 halo streams
        xpk = r * W * 3 * Cin * 2                          # bf16 packed patch
        temps = 4 * r * W * Cin * 4 + 2 * th * W * Cout * 4  # f32 live values
        wts = 2 * 3 * 3 * Cin * Cout * 2
        return act_in + act_out + halo + xpk + temps + wts

    best = 1
    for th in range(1, H + 1):
        if H % th == 0 and footprint(th) <= budget_bytes:
            best = th
    return best


def fused_conv3x3(y, w_packed, b, *, scale=None, shift=None, emit_stats=False,
                  out_relu=False, out_dtype=None, tile_rows=None,
                  compute_dtype=jnp.bfloat16,
                  vmem_limit_bytes=48 * 1024 * 1024):
    """Fused 3x3 'same' conv layer (NHWC, C on lanes).

    y:        (N, H, W, Cin) activation
    w_packed: (3, 3*Cin, Cout), taps packed as [dy][dx*Cin + ci, co]
    b:        (1, Cout)
    scale/shift: (Cin,) previous-layer BN affine, fused on the input (+ReLU)
    emit_stats:  also return per-block (sum, centered-M2) partials

    W being a multiple of 8 keeps all in-kernel reshapes layout-free.
    """
    N, H, W, Cin = y.shape
    Cout = w_packed.shape[-1]
    in_bn = scale is not None
    if out_dtype is None:
        out_dtype = y.dtype

    if tile_rows is None:
        tile_rows = _pick_tile_rows(H, W, Cin, Cout,
                                    jnp.dtype(y.dtype).itemsize,
                                    jnp.dtype(out_dtype).itemsize)
    assert H % tile_rows == 0, "tile_rows must divide H"
    TH = tile_rows
    NH = H // TH

    kernel = _make_conv_kernel(TH=TH, W=W, Cin=Cin, Cout=Cout, in_bn=in_bn,
                               emit_stats=emit_stats, out_relu=out_relu,
                               compute_dtype=compute_dtype)

    # Main block + two 1-row halo views of the same (unpadded) activation:
    # no jnp.pad through HBM; out-of-image halos are zeroed in-kernel.
    act_spec = pl.BlockSpec((1, TH, W, Cin), lambda n, h: (n, h, 0, 0))
    top_spec = pl.BlockSpec((1, 1, W, Cin),
                            lambda n, h: (n, jnp.maximum(h * TH - 1, 0), 0, 0))
    bot_spec = pl.BlockSpec((1, 1, W, Cin),
                            lambda n, h: (n, jnp.minimum(h * TH + TH, H - 1), 0, 0))

    in_specs, inputs = [], []
    if in_bn:
        in_specs += [pl.BlockSpec((1, Cin), lambda n, h: (0, 0))] * 2
        inputs += [scale.reshape(1, Cin).astype(jnp.float32),
                   shift.reshape(1, Cin).astype(jnp.float32)]
    in_specs += [act_spec, top_spec, bot_spec]
    inputs += [y, y, y]
    in_specs += [pl.BlockSpec((3, 3 * Cin, Cout), lambda n, h: (0, 0, 0)),
                 pl.BlockSpec((1, Cout), lambda n, h: (0, 0))]
    inputs += [w_packed.astype(compute_dtype),        # bf16 MXU operand
               b.astype(jnp.float32)]                 # bias stays f32

    out_shapes = [jax.ShapeDtypeStruct((N, H, W, Cout), out_dtype)]
    out_specs = [pl.BlockSpec((1, TH, W, Cout), lambda n, h: (n, h, 0, 0))]
    if emit_stats:
        out_shapes += [jax.ShapeDtypeStruct((N, NH, 1, Cout), jnp.float32)] * 2
        out_specs += [pl.BlockSpec((1, 1, 1, Cout), lambda n, h: (n, h, 0, 0))] * 2

    scratch = [pltpu.VMEM((TH + 2, W, 3 * Cin), compute_dtype)]  # packed patch

    outs = pl.pallas_call(
        kernel,
        out_shape=tuple(out_shapes),
        grid_spec=pltpu.PrefetchScalarGridSpec(
            num_scalar_prefetch=0,
            grid=(N, NH),
            in_specs=in_specs,
            out_specs=out_specs,
            scratch_shapes=scratch,
        ),
        compiler_params=pltpu.CompilerParams(
            dimension_semantics=("parallel", "parallel"),
            vmem_limit_bytes=vmem_limit_bytes),
    )(*inputs)

    if emit_stats:
        return outs[0], outs[1], outs[2]
    return outs[0]


def _bn_affine(s, m2, gamma, beta, block_count, eps):
    """Chan-style combine of per-block (sum, centered M2) -> BN (scale, shift)."""
    nblocks = s.shape[0] * s.shape[1]
    total = float(nblocks) * block_count
    mean = jnp.sum(s, axis=(0, 1, 2)) / total                      # (C,)
    d = s / block_count - mean.reshape(1, 1, 1, -1)                # block mean - global mean
    var = (jnp.sum(m2, axis=(0, 1, 2))
           + block_count * jnp.sum(d * d, axis=(0, 1, 2))) / total
    var = jnp.maximum(var, 0.0)                                    # clamp
    scale = gamma.reshape(-1) * jax.lax.rsqrt(var + eps)
    shift = beta.reshape(-1) - mean * scale
    return scale, shift


# ----------------------------------------------------------------------------
# Parameter init (matches the module's _initialize_weights + PyTorch defaults)
# ----------------------------------------------------------------------------
def init_params(key, num_layers=17, num_features=64):
    specs = ([(3, num_features)]
             + [(num_features, num_features)] * (num_layers - 2)
             + [(num_features, 3)])
    params = []
    for i, (cin, cout) in enumerate(specs):
        key, kw, kb = jax.random.split(key, 3)
        fan_in = cin * 9
        std = math.sqrt(2.0 / fan_in)                 # kaiming_normal_
        w = std * jax.random.normal(kw, (3, 3 * cin, cout), jnp.float32)
        bound = 1.0 / math.sqrt(fan_in)               # default Conv2d bias init
        b = jax.random.uniform(kb, (1, cout), jnp.float32, -bound, bound)
        layer = {"w": w, "b": b}
        if 0 < i < num_layers - 1:                    # middle layers: BatchNorm
            layer["gamma"] = jnp.ones((cout,), jnp.float32)
            layer["beta"] = jnp.zeros((cout,), jnp.float32)
        params.append(layer)
    return params


# ----------------------------------------------------------------------------
# Forward pass:  out = x - DnCNN_layers(x)
# ----------------------------------------------------------------------------
def dncnn_forward(x_nchw, params, eps=1e-5, tile_rows=None,
                  act_dtype=jnp.bfloat16):
    x = jnp.transpose(x_nchw, (0, 2, 3, 1))           # NCHW -> NHWC (C on lanes)
    N, H, W, _ = x.shape
    L = len(params)

    y = x
    scale = shift = None
    residual = None
    for i, p in enumerate(params):
        if i == 0:                                    # Conv + ReLU
            y = fused_conv3x3(y, p["w"], p["b"], out_relu=True,
                              out_dtype=act_dtype, tile_rows=tile_rows)
        elif i < L - 1:                               # Conv (+ fused prev BN+ReLU), emit stats
            y, s, m2 = fused_conv3x3(y, p["w"], p["b"], scale=scale,
                                     shift=shift, emit_stats=True,
                                     out_dtype=act_dtype, tile_rows=tile_rows)
            block_count = float((H // s.shape[1]) * W)
            scale, shift = _bn_affine(s, m2, p["gamma"], p["beta"],
                                      block_count, eps)
            # TODO(synk): BatchNorm running_mean/running_var momentum updates
            # (stateful buffers) are not reproduced; training-mode forward
            # output is unaffected (batch statistics are used).
        else:                                         # final Conv (fused prev BN+ReLU)
            residual = fused_conv3x3(y, p["w"], p["b"], scale=scale,
                                     shift=shift, out_dtype=x.dtype,
                                     tile_rows=tile_rows)

    out = x - residual                                # tiny 3-channel op -> XLA
    return jnp.transpose(out, (0, 3, 1, 2))           # back to NCHW


forward = jax.jit(dncnn_forward, static_argnames=("tile_rows", "act_dtype"))


# ----------------------------------------------------------------------------
# Pure-JAX reference (XLA conv + batch-stats BN) for a correctness self-check
# ----------------------------------------------------------------------------
def reference_forward(x_nchw, params, eps=1e-5):
    x = jnp.transpose(x_nchw, (0, 2, 3, 1))
    L = len(params)
    y = x
    for i, p in enumerate(params):
        three_cin, cout = p["w"].shape[1], p["w"].shape[2]
        cin = three_cin // 3
        w_hwio = p["w"].reshape(3, 3, cin, cout)      # [dy][dx*cin+ci,co] -> (dy,dx,ci,co)
        z = jax.lax.conv_general_dilated(
            y, w_hwio, window_strides=(1, 1), padding="SAME",
            dimension_numbers=("NHWC", "HWIO", "NHWC"),
            precision=jax.lax.Precision.HIGHEST) + p["b"].reshape(1, 1, 1, cout)
        if i == 0:
            y = jax.nn.relu(z)
        elif i < L - 1:
            mean = jnp.mean(z, axis=(0, 1, 2))
            var = jnp.var(z, axis=(0, 1, 2))
            zhat = (z - mean) * jax.lax.rsqrt(var + eps)
            y = jax.nn.relu(zhat * p["gamma"] + p["beta"])
        else:
            y = z
    return jnp.transpose(x - y, (0, 3, 1, 2))


if __name__ == "__main__":
    key = jax.random.PRNGKey(0)
    kx, kp = jax.random.split(key)

    # Small config consistent with the module; DnCNN(17, 64) uses the same path.
    num_layers, num_features = 5, 32
    params = init_params(kp, num_layers=num_layers, num_features=num_features)

    # RGB image batch, NCHW like the PyTorch module expects.
    x = jax.random.normal(kx, (2, 3, 16, 16), jnp.float32)

    # tile_rows=8 -> two H-blocks per image: exercises the halo-row path.
    out = forward(x, params, tile_rows=8)
    out = jax.block_until_ready(out)
    assert out.shape == x.shape and out.dtype == x.dtype
    assert bool(jnp.all(jnp.isfinite(out)))

    # Correctness self-check vs. the f32 pure-JAX reference.  Tolerance covers
    # bf16 MXU operands + bf16 inter-layer activations (f32 accumulation/stats).
    ref = reference_forward(x, params)
    err = float(jnp.max(jnp.abs(out - ref)) / (jnp.max(jnp.abs(ref)) + 1e-6))
    assert err < 4e-2, f"mismatch vs reference: rel-max-err={err}"

    print("KERNEL_OK")
</pallas_src>

<mosaic_0001>
module attributes {stable_mosaic.version = 11 : i64} {
  func.func @kernel(%arg0: i32, %arg1: i32, %arg2: memref<1x8x16x3xf32, #tpu.memory_space<vmem>>, %arg3: memref<1x1x16x3xf32, #tpu.memory_space<vmem>>, %arg4: memref<1x1x16x3xf32, #tpu.memory_space<vmem>>, %arg5: memref<3x9x32xbf16, #tpu.memory_space<vmem>>, %arg6: memref<1x32xf32, #tpu.memory_space<vmem>>, %arg7: memref<1x8x16x32xbf16, #tpu.memory_space<vmem>>, %arg8: memref<10x16x9xbf16, #tpu.memory_space<vmem>>) attributes {dimension_semantics = [#tpu.dimension_semantics<parallel>, #tpu.dimension_semantics<parallel>], iteration_bounds = array<i64: 2, 2>, scalar_prefetch = 0 : i64, scratch_operands = 1 : i64, tpu.core_type = #tpu.core_type<tc>, window_params = [{transform_indices = @transform_0, window_bounds = array<i64: 1, 8, 16, 3>}, {transform_indices = @transform_1, window_bounds = array<i64: 1, 1, 16, 3>}, {transform_indices = @transform_2, window_bounds = array<i64: 1, 1, 16, 3>}, {pipeline_mode = #tpu.pipeline_mode<synchronous>, transform_indices = @transform_3, window_bounds = array<i64: 3, 9, 32>}, {pipeline_mode = #tpu.pipeline_mode<synchronous>, transform_indices = @transform_4, window_bounds = array<i64: 1, 32>}, {transform_indices = @transform_5, window_bounds = array<i64: 1, 8, 16, 32>}]} {
    %c0 = arith.constant 0 : index
    %c0_0 = arith.constant 0 : index
    %c0_1 = arith.constant 0 : index
    %c0_2 = arith.constant 0 : index
    %0 = vector.load %arg2[%c0, %c0_0, %c0_1, %c0_2] : memref<1x8x16x3xf32, #tpu.memory_space<vmem>>, vector<1x8x16x3xf32>
    %1 = vector.shape_cast %0 : vector<1x8x16x3xf32> to vector<8x16x3xf32>
    %c0_i32 = arith.constant 0 : i32
    %2 = arith.cmpi sgt, %arg1, %c0_i32 : i32
    %c0_3 = arith.constant 0 : index
    %c0_4 = arith.constant 0 : index
    %c0_5 = arith.constant 0 : index
    %c0_6 = arith.constant 0 : index
    %3 = vector.load %arg3[%c0_3, %c0_4, %c0_5, %c0_6] : memref<1x1x16x3xf32, #tpu.memory_space<vmem>>, vector<1x1x16x3xf32>
    %4 = vector.shape_cast %3 : vector<1x1x16x3xf32> to vector<1x16x3xf32>
    %cst = arith.constant 0.000000e+00 : f32
    %5 = vector.broadcast %cst : f32 to vector<1x16x3xf32>
    %6 = arith.select %2, %4, %5 : vector<1x16x3xf32>
    %c1_i32 = arith.constant 1 : i32
    %7 = arith.cmpi slt, %arg1, %c1_i32 : i32
    %c0_7 = arith.constant 0 : index
    %c0_8 = arith.constant 0 : index
    %c0_9 = arith.constant 0 : index
    %c0_10 = arith.constant 0 : index
    %8 = vector.load %arg4[%c0_7, %c0_8, %c0_9, %c0_10] : memref<1x1x16x3xf32, #tpu.memory_space<vmem>>, vector<1x1x16x3xf32>
    %9 = vector.shape_cast %8 : vector<1x1x16x3xf32> to vector<1x16x3xf32>
    %cst_11 = arith.constant 0.000000e+00 : f32
    %10 = vector.broadcast %cst_11 : f32 to vector<1x16x3xf32>
    %11 = arith.select %7, %9, %10 : vector<1x16x3xf32>
    %12 = tpu.concatenate %6, %1, %11 in 0 : vector<1x16x3xf32>, vector<8x16x3xf32>, vector<1x16x3xf32> -> vector<10x16x3xf32>
    %13 = tpu.iota {dimensions = array<i32: 1>} : vector<10x16x3xi32>
    %c0_i32_12 = arith.constant 0 : i32
    %14 = vector.broadcast %c0_i32_12 : i32 to vector<10x16x3xi32>
    %15 = arith.cmpi eq, %13, %14 : vector<10x16x3xi32>
    %c1_i32_13 = arith.constant 1 : i32
    %16 = tpu.dynamic_rotate %12 by %c1_i32_13 dim 1 : vector<10x16x3xf32>, i32 -> vector<10x16x3xf32>
    %cst_14 = arith.constant 0.000000e+00 : f32
    %17 = vector.broadcast %cst_14 : f32 to vector<10x16x3xf32>
    %18 = arith.select %15, %17, %16 : vector<10x16x3xi1>, vector<10x16x3xf32>
    %c15_i32 = arith.constant 15 : i32
    %19 = vector.broadcast %c15_i32 : i32 to vector<10x16x3xi32>
    %20 = arith.cmpi eq, %13, %19 : vector<10x16x3xi32>
    %c15_i32_15 = arith.constant 15 : i32
    %21 = tpu.dynamic_rotate %12 by %c15_i32_15 dim 1 : vector<10x16x3xf32>, i32 -> vector<10x16x3xf32>
    %cst_16 = arith.constant 0.000000e+00 : f32
    %22 = vector.broadcast %cst_16 : f32 to vector<10x16x3xf32>
    %23 = arith.select %20, %22, %21 : vector<10x16x3xi1>, vector<10x16x3xf32>
    %24 = arith.truncf %18 : vector<10x16x3xf32> to vector<10x16x3xbf16>
    %25 = arith.truncf %12 : vector<10x16x3xf32> to vector<10x16x3xbf16>
    %26 = arith.truncf %23 : vector<10x16x3xf32> to vector<10x16x3xbf16>
    %27 = tpu.concatenate %24, %25, %26 in 2 : vector<10x16x3xbf16>, vector<10x16x3xbf16>, vector<10x16x3xbf16> -> vector<10x16x9xbf16>
    %c0_17 = arith.constant 0 : index
    %c0_18 = arith.constant 0 : index
    %c0_19 = arith.constant 0 : index
    %28 = vector.load %arg8[%c0_17, %c0_18, %c0_19] : memref<10x16x9xbf16, #tpu.memory_space<vmem>>, vector<10x16x9xbf16>
    tpu.vector_store %arg8[%c0_17, %c0_18, %c0_19], %27 {strides = array<i32>} : memref<10x16x9xbf16, #tpu.memory_space<vmem>>, vector<10x16x9xbf16>,
    %c0_20 = arith.constant 0 : index
    %c0_21 = arith.constant 0 : index
    %c0_22 = arith.constant 0 : index
    %29 = vector.load %arg8[%c0_20, %c0_21, %c0_22] : memref<10x16x9xbf16, #tpu.memory_space<vmem>>, vector<8x16x9xbf16>
    %30 = vector.shape_cast %29 : vector<8x16x9xbf16> to vector<128x9xbf16>
    %c0_23 = arith.constant 0 : index
    %c0_24 = arith.constant 0 : index
    %c0_25 = arith.constant 0 : index
    %31 = vector.load %arg5[%c0_23, %c0_24, %c0_25] : memref<3x9x32xbf16, #tpu.memory_space<vmem>>, vector<1x9x32xbf16>
    %32 = vector.shape_cast %31 : vector<1x9x32xbf16> to vector<9x32xbf16>
    %cst_26 = arith.constant dense<0.000000e+00> : vector<128x32xf32>
    %33 = tpu.matmul %30, %32, %cst_26 {dimension_numbers = #tpu.dot_dimension_numbers<[1], [0], [0], [1], [0, 0, 1, 1], [], []>} : vector<128x9xbf16>, vector<9x32xbf16>, vector<128x32xf32> -> vector<128x32xf32>
    %c1 = arith.constant 1 : index
    %c0_27 = arith.constant 0 : index
    %c0_28 = arith.constant 0 : index
    %34 = vector.load %arg8[%c1, %c0_27, %c0_28] : memref<10x16x9xbf16, #tpu.memory_space<vmem>>, vector<8x16x9xbf16>
    %35 = vector.shape_cast %34 : vector<8x16x9xbf16> to vector<128x9xbf16>
    %c1_29 = arith.constant 1 : index
    %c0_30 = arith.constant 0 : index
    %c0_31 = arith.constant 0 : index
    %36 = vector.load %arg5[%c1_29, %c0_30, %c0_31] : memref<3x9x32xbf16, #tpu.memory_space<vmem>>, vector<1x9x32xbf16>
    %37 = vector.shape_cast %36 : vector<1x9x32xbf16> to vector<9x32xbf16>
    %cst_32 = arith.constant dense<0.000000e+00> : vector<128x32xf32>
    %38 = tpu.matmul %35, %37, %cst_32 {dimension_numbers = #tpu.dot_dimension_numbers<[1], [0], [0], [1], [0, 0, 1, 1], [], []>} : vector<128x9xbf16>, vector<9x32xbf16>, vector<128x32xf32> -> vector<128x32xf32>
    %39 = arith.addf %33, %38 : vector<128x32xf32>
    %c2 = arith.constant 2 : index
    %c0_33 = arith.constant 0 : index
    %c0_34 = arith.constant 0 : index
    %40 = vector.load %arg8[%c2, %c0_33, %c0_34] : memref<10x16x9xbf16, #tpu.memory_space<vmem>>, vector<8x16x9xbf16>
    %41 = vector.shape_cast %40 : vector<8x16x9xbf16> to vector<128x9xbf16>
    %c2_35 = arith.constant 2 : index
    %c0_36 = arith.constant 0 : index
    %c0_37 = arith.constant 0 : index
    %42 = vector.load %arg5[%c2_35, %c0_36, %c0_37] : memref<3x9x32xbf16, #tpu.memory_space<vmem>>, vector<1x9x32xbf16>
    %43 = vector.shape_cast %42 : vector<1x9x32xbf16> to vector<9x32xbf16>
    %cst_38 = arith.constant dense<0.000000e+00> : vector<128x32xf32>
    %44 = tpu.matmul %41, %43, %cst_38 {dimension_numbers = #tpu.dot_dimension_numbers<[1], [0], [0], [1], [0, 0, 1, 1], [], []>} : vector<128x9xbf16>, vector<9x32xbf16>, vector<128x32xf32> -> vector<128x32xf32>
    %45 = arith.addf %39, %44 : vector<128x32xf32>
    %c0_39 = arith.constant 0 : index
    %c0_40 = arith.constant 0 : index
    %46 = vector.load %arg6[%c0_39, %c0_40] : memref<1x32xf32, #tpu.memory_space<vmem>>, vector<1x32xf32>
    %47 = vector.broadcast %46 : vector<1x32xf32> to vector<128x32xf32>
    %48 = arith.addf %45, %47 : vector<128x32xf32>
    %cst_41 = arith.constant 0.000000e+00 : f32
    %49 = vector.broadcast %cst_41 : f32 to vector<128x32xf32>
    %50 = arith.maximumf %48, %49 : vector<128x32xf32>
    %51 = vector.shape_cast %50 : vector<128x32xf32> to vector<1x8x16x32xf32>
    %52 = arith.truncf %51 : vector<1x8x16x32xf32> to vector<1x8x16x32xbf16>
    %c0_42 = arith.constant 0 : index
    %c0_43 = arith.constant 0 : index
    %c0_44 = arith.constant 0 : index
    %c0_45 = arith.constant 0 : index
    %53 = vector.load %arg7[%c0_42, %c0_43, %c0_44, %c0_45] : memref<1x8x16x32xbf16, #tpu.memory_space<vmem>>, vector<1x8x16x32xbf16>
    tpu.vector_store %arg7[%c0_42, %c0_43, %c0_44, %c0_45], %52 {strides = array<i32>} : memref<1x8x16x32xbf16, #tpu.memory_space<vmem>>, vector<1x8x16x32xbf16>,
    return
  }
  func.func @transform_0(%arg0: i32, %arg1: i32) -> (i32, i32, i32, i32) {
    %c0_i32 = arith.constant 0 : i32
    %c0_i32_0 = arith.constant 0 : i32
    %c0_i32_1 = arith.constant 0 : i32
    return %arg0, %arg1, %c0_i32, %c0_i32_0 : i32, i32, i32, i32
  }
  func.func @transform_1(%arg0: i32, %arg1: i32) -> (i32, i32, i32, i32) {
    %c8_i32 = arith.constant 8 : i32
    %0 = arith.muli %arg1, %c8_i32 : i32
    %c1_i32 = arith.constant 1 : i32
    %1 = arith.subi %0, %c1_i32 : i32
    %c0_i32 = arith.constant 0 : i32
    %2 = arith.maxsi %1, %c0_i32 : i32
    %c0_i32_0 = arith.constant 0 : i32
    %c0_i32_1 = arith.constant 0 : i32
    %c0_i32_2 = arith.constant 0 : i32
    return %arg0, %2, %c0_i32_0, %c0_i32_1 : i32, i32, i32, i32
  }
  func.func @transform_2(%arg0: i32, %arg1: i32) -> (i32, i32, i32, i32) {
    %c8_i32 = arith.constant 8 : i32
    %0 = arith.muli %arg1, %c8_i32 : i32
    %c8_i32_0 = arith.constant 8 : i32
    %1 = arith.addi %0, %c8_i32_0 : i32
    %c15_i32 = arith.constant 15 : i32
    %2 = arith.minsi %1, %c15_i32 : i32
    %c0_i32 = arith.constant 0 : i32
    %c0_i32_1 = arith.constant 0 : i32
    %c0_i32_2 = arith.constant 0 : i32
    return %arg0, %2, %c0_i32, %c0_i32_1 : i32, i32, i32, i32
  }
  func.func @transform_3(%arg0: i32, %arg1: i32) -> (i32, i32, i32) {
    %c0_i32 = arith.constant 0 : i32
    %c0_i32_0 = arith.constant 0 : i32
    %c0_i32_1 = arith.constant 0 : i32
    %c0_i32_2 = arith.constant 0 : i32
    return %c0_i32, %c0_i32_0, %c0_i32_1 : i32, i32, i32
  }
  func.func @transform_4(%arg0: i32, %arg1: i32) -> (i32, i32) {
    %c0_i32 = arith.constant 0 : i32
    %c0_i32_0 = arith.constant 0 : i32
    %c0_i32_1 = arith.constant 0 : i32
    return %c0_i32, %c0_i32_0 : i32, i32
  }
  func.func @transform_5(%arg0: i32, %arg1: i32) -> (i32, i32, i32, i32) {
    %c0_i32 = arith.constant 0 : i32
    %c0_i32_0 = arith.constant 0 : i32
    %c0_i32_1 = arith.constant 0 : i32
    return %arg0, %arg1, %c0_i32, %c0_i32_0 : i32, i32, i32, i32
  }
}

module attributes {stable_mosaic.version = 11 : i64} {
  func.func @kernel(%arg0: i32, %arg1: i32, %arg2: memref<1x8x16x32xbf16, #tpu.memory_space<vmem>>, %arg3: memref<1x1x16x32xbf16, #tpu.memory_space<vmem>>, %arg4: memref<1x1x16x32xbf16, #tpu.memory_space<vmem>>, %arg5: memref<3x96x32xbf16, #tpu.memory_space<vmem>>, %arg6: memref<1x32xf32, #tpu.memory_space<vmem>>, %arg7: memref<1x8x16x32xbf16, #tpu.memory_space<vmem>>, %arg8: memref<1x1x1x32xf32, #tpu.memory_space<vmem>>, %arg9: memref<1x1x1x32xf32, #tpu.memory_space<vmem>>, %arg10: memref<10x16x96xbf16, #tpu.memory_space<vmem>>) attributes {dimension_semantics = [#tpu.dimension_semantics<parallel>, #tpu.dimension_semantics<parallel>], iteration_bounds = array<i64: 2, 2>, scalar_prefetch = 0 : i64, scratch_operands = 1 : i64, tpu.core_type = #tpu.core_type<tc>, window_params = [{transform_indices = @transform_0, window_bounds = array<i64: 1, 8, 16, 32>}, {transform_indices = @transform_1, window_bounds = array<i64: 1, 1, 16, 32>}, {transform_indices = @transform_2, window_bounds = array<i64: 1, 1, 16, 32>}, {pipeline_mode = #tpu.pipeline_mode<synchronous>, transform_indices = @transform_3, window_bounds = array<i64: 3, 96, 32>}, {pipeline_mode = #tpu.pipeline_mode<synchronous>, transform_indices = @transform_4, window_bounds = array<i64: 1, 32>}, {transform_indices = @transform_5, window_bounds = array<i64: 1, 8, 16, 32>}, {transform_indices = @transform_6, window_bounds = array<i64: 1, 1, 1, 32>}, {transform_indices = @transform_7, window_bounds = array<i64: 1, 1, 1, 32>}]} {
    %c0 = arith.constant 0 : index
    %c0_0 = arith.constant 0 : index
    %c0_1 = arith.constant 0 : index
    %c0_2 = arith.constant 0 : index
    %0 = vector.load %arg2[%c0, %c0_0, %c0_1, %c0_2] : memref<1x8x16x32xbf16, #tpu.memory_space<vmem>>, vector<1x8x16x32xbf16>
    %1 = vector.shape_cast %0 : vector<1x8x16x32xbf16> to vector<8x16x32xbf16>
    %2 = arith.extf %1 : vector<8x16x32xbf16> to vector<8x16x32xf32>
    %c0_i32 = arith.constant 0 : i32
    %3 = arith.cmpi sgt, %arg1, %c0_i32 : i32
    %c0_3 = arith.constant 0 : index
    %c0_4 = arith.constant 0 : index
    %c0_5 = arith.constant 0 : index
    %c0_6 = arith.constant 0 : index
    %4 = vector.load %arg3[%c0_3, %c0_4, %c0_5, %c0_6] : memref<1x1x16x32xbf16, #tpu.memory_space<vmem>>, vector<1x1x16x32xbf16>
    %5 = vector.shape_cast %4 : vector<1x1x16x32xbf16> to vector<1x16x32xbf16>
    %6 = arith.extf %5 : vector<1x16x32xbf16> to vector<1x16x32xf32>
    %cst = arith.constant 0.000000e+00 : f32
    %7 = vector.broadcast %cst : f32 to vector<1x16x32xf32>
    %8 = arith.select %3, %6, %7 : vector<1x16x32xf32>
    %c1_i32 = arith.constant 1 : i32
    %9 = arith.cmpi slt, %arg1, %c1_i32 : i32
    %c0_7 = arith.constant 0 : index
    %c0_8 = arith.constant 0 : index
    %c0_9 = arith.constant 0 : index
    %c0_10 = arith.constant 0 : index
    %10 = vector.load %arg4[%c0_7, %c0_8, %c0_9, %c0_10] : memref<1x1x16x32xbf16, #tpu.memory_space<vmem>>, vector<1x1x16x32xbf16>
    %11 = vector.shape_cast %10 : vector<1x1x16x32xbf16> to vector<1x16x32xbf16>
    %12 = arith.extf %11 : vector<1x16x32xbf16> to vector<1x16x32xf32>
    %cst_11 = arith.constant 0.000000e+00 : f32
    %13 = vector.broadcast %cst_11 : f32 to vector<1x16x32xf32>
    %14 = arith.select %9, %12, %13 : vector<1x16x32xf32>
    %15 = tpu.concatenate %8, %2, %14 in 0 : vector<1x16x32xf32>, vector<8x16x32xf32>, vector<1x16x32xf32> -> vector<10x16x32xf32>
    %16 = tpu.iota {dimensions = array<i32: 1>} : vector<10x16x32xi32>
    %c0_i32_12 = arith.constant 0 : i32
    %17 = vector.broadcast %c0_i32_12 : i32 to vector<10x16x32xi32>
    %18 = arith.cmpi eq, %16, %17 : vector<10x16x32xi32>
    %c1_i32_13 = arith.constant 1 : i32
    %19 = tpu.dynamic_rotate %15 by %c1_i32_13 dim 1 : vector<10x16x32xf32>, i32 -> vector<10x16x32xf32>
    %cst_14 = arith.constant 0.000000e+00 : f32
    %20 = vector.broadcast %cst_14 : f32 to vector<10x16x32xf32>
    %21 = arith.select %18, %20, %19 : vector<10x16x32xi1>, vector<10x16x32xf32>
    %c15_i32 = arith.constant 15 : i32
    %22 = vector.broadcast %c15_i32 : i32 to vector<10x16x32xi32>
    %23 = arith.cmpi eq, %16, %22 : vector<10x16x32xi32>
    %c15_i32_15 = arith.constant 15 : i32
    %24 = tpu.dynamic_rotate %15 by %c15_i32_15 dim 1 : vector<10x16x32xf32>, i32 -> vector<10x16x32xf32>
    %cst_16 = arith.constant 0.000000e+00 : f32
    %25 = vector.broadcast %cst_16 : f32 to vector<10x16x32xf32>
    %26 = arith.select %23, %25, %24 : vector<10x16x32xi1>, vector<10x16x32xf32>
    %27 = arith.truncf %21 : vector<10x16x32xf32> to vector<10x16x32xbf16>
    %28 = arith.truncf %15 : vector<10x16x32xf32> to vector<10x16x32xbf16>
    %29 = arith.truncf %26 : vector<10x16x32xf32> to vector<10x16x32xbf16>
    %30 = tpu.concatenate %27, %28, %29 in 2 : vector<10x16x32xbf16>, vector<10x16x32xbf16>, vector<10x16x32xbf16> -> vector<10x16x96xbf16>
    %c0_17 = arith.constant 0 : index
    %c0_18 = arith.constant 0 : index
    %c0_19 = arith.constant 0 : index
    %31 = vector.load %arg10[%c0_17, %c0_18, %c0_19] : memref<10x16x96xbf16, #tpu.memory_space<vmem>>, vector<10x16x96xbf16>
    tpu.vector_store %arg10[%c0_17, %c0_18, %c0_19], %30 {strides = array<i32>} : memref<10x16x96xbf16, #tpu.memory_space<vmem>>, vector<10x16x96xbf16>,
    %c0_20 = arith.constant 0 : index
    %c0_21 = arith.constant 0 : index
    %c0_22 = arith.constant 0 : index
    %32 = vector.load %arg10[%c0_20, %c0_21, %c0_22] : memref<10x16x96xbf16, #tpu.memory_space<vmem>>, vector<8x16x96xbf16>
    %33 = vector.shape_cast %32 : vector<8x16x96xbf16> to vector<128x96xbf16>
    %c0_23 = arith.constant 0 : index
    %c0_24 = arith.constant 0 : index
    %c0_25 = arith.constant 0 : index
    %34 = vector.load %arg5[%c0_23, %c0_24, %c0_25] : memref<3x96x32xbf16, #tpu.memory_space<vmem>>, vector<1x96x32xbf16>
    %35 = vector.shape_cast %34 : vector<1x96x32xbf16> to vector<96x32xbf16>
    %cst_26 = arith.constant dense<0.000000e+00> : vector<128x32xf32>
    %36 = tpu.matmul %33, %35, %cst_26 {dimension_numbers = #tpu.dot_dimension_numbers<[1], [0], [0], [1], [0, 0, 1, 1], [], []>} : vector<128x96xbf16>, vector<96x32xbf16>, vector<128x32xf32> -> vector<128x32xf32>
    %c1 = arith.constant 1 : index
    %c0_27 = arith.constant 0 : index
    %c0_28 = arith.constant 0 : index
    %37 = vector.load %arg10[%c1, %c0_27, %c0_28] : memref<10x16x96xbf16, #tpu.memory_space<vmem>>, vector<8x16x96xbf16>
    %38 = vector.shape_cast %37 : vector<8x16x96xbf16> to vector<128x96xbf16>
    %c1_29 = arith.constant 1 : index
    %c0_30 = arith.constant 0 : index
    %c0_31 = arith.constant 0 : index
    %39 = vector.load %arg5[%c1_29, %c0_30, %c0_31] : memref<3x96x32xbf16, #tpu.memory_space<vmem>>, vector<1x96x32xbf16>
    %40 = vector.shape_cast %39 : vector<1x96x32xbf16> to vector<96x32xbf16>
    %cst_32 = arith.constant dense<0.000000e+00> : vector<128x32xf32>
    %41 = tpu.matmul %38, %40, %cst_32 {dimension_numbers = #tpu.dot_dimension_numbers<[1], [0], [0], [1], [0, 0, 1, 1], [], []>} : vector<128x96xbf16>, vector<96x32xbf16>, vector<128x32xf32> -> vector<128x32xf32>
    %42 = arith.addf %36, %41 : vector<128x32xf32>
    %c2 = arith.constant 2 : index
    %c0_33 = arith.constant 0 : index
    %c0_34 = arith.constant 0 : index
    %43 = vector.load %arg10[%c2, %c0_33, %c0_34] : memref<10x16x96xbf16, #tpu.memory_space<vmem>>, vector<8x16x96xbf16>
    %44 = vector.shape_cast %43 : vector<8x16x96xbf16> to vector<128x96xbf16>
    %c2_35 = arith.constant 2 : index
    %c0_36 = arith.constant 0 : index
    %c0_37 = arith.constant 0 : index
    %45 = vector.load %arg5[%c2_35, %c0_36, %c0_37] : memref<3x96x32xbf16, #tpu.memory_space<vmem>>, vector<1x96x32xbf16>
    %46 = vector.shape_cast %45 : vector<1x96x32xbf16> to vector<96x32xbf16>
    %cst_38 = arith.constant dense<0.000000e+00> : vector<128x32xf32>
    %47 = tpu.matmul %44, %46, %cst_38 {dimension_numbers = #tpu.dot_dimension_numbers<[1], [0], [0], [1], [0, 0, 1, 1], [], []>} : vector<128x96xbf16>, vector<96x32xbf16>, vector<128x32xf32> -> vector<128x32xf32>
    %48 = arith.addf %42, %47 : vector<128x32xf32>
    %c0_39 = arith.constant 0 : index
    %c0_40 = arith.constant 0 : index
    %49 = vector.load %arg6[%c0_39, %c0_40] : memref<1x32xf32, #tpu.memory_space<vmem>>, vector<1x32xf32>
    %50 = vector.broadcast %49 : vector<1x32xf32> to vector<128x32xf32>
    %51 = arith.addf %48, %50 : vector<128x32xf32>
    %cst_41 = arith.constant dense<0.000000e+00> : vector<32xf32>
    %52 = vector.multi_reduction <add>, %51, %cst_41 [0] : vector<128x32xf32> to vector<32xf32>
    %53 = vector.shape_cast %52 : vector<32xf32> to vector<1x32xf32>
    %cst_42 = arith.constant 7.812500e-03 : f32
    %54 = vector.broadcast %cst_42 : f32 to vector<1x32xf32>
    %55 = arith.mulf %53, %54 : vector<1x32xf32>
    %56 = vector.broadcast %55 : vector<1x32xf32> to vector<128x32xf32>
    %57 = arith.subf %51, %56 : vector<128x32xf32>
    %58 = vector.shape_cast %53 : vector<1x32xf32> to vector<1x1x1x32xf32>
    %c0_43 = arith.constant 0 : index
    %c0_44 = arith.constant 0 : index
    %c0_45 = arith.constant 0 : index
    %c0_46 = arith.constant 0 : index
    %59 = vector.load %arg8[%c0_43, %c0_44, %c0_45, %c0_46] : memref<1x1x1x32xf32, #tpu.memory_space<vmem>>, vector<1x1x1x32xf32>
    tpu.vector_store %arg8[%c0_43, %c0_44, %c0_45, %c0_46], %58 {strides = array<i32>} : memref<1x1x1x32xf32, #tpu.memory_space<vmem>>, vector<1x1x1x32xf32>,
    %60 = arith.mulf %57, %57 : vector<128x32xf32>
    %cst_47 = arith.constant dense<0.000000e+00> : vector<32xf32>
    %61 = vector.multi_reduction <add>, %60, %cst_47 [0] : vector<128x32xf32> to vector<32xf32>
    %62 = vector.shape_cast %61 : vector<32xf32> to vector<1x32xf32>
    %63 = vector.shape_cast %62 : vector<1x32xf32> to vector<1x1x1x32xf32>
    %c0_48 = arith.constant 0 : index
    %c0_49 = arith.constant 0 : index
    %c0_50 = arith.constant 0 : index
    %c0_51 = arith.constant 0 : index
    %64 = vector.load %arg9[%c0_48, %c0_49, %c0_50, %c0_51] : memref<1x1x1x32xf32, #tpu.memory_space<vmem>>, vector<1x1x1x32xf32>
    tpu.vector_store %arg9[%c0_48, %c0_49, %c0_50, %c0_51], %63 {strides = array<i32>} : memref<1x1x1x32xf32, #tpu.memory_space<vmem>>, vector<1x1x1x32xf32>,
    %65 = vector.shape_cast %51 : vector<128x32xf32> to vector<1x8x16x32xf32>
    %66 = arith.truncf %65 : vector<1x8x16x32xf32> to vector<1x8x16x32xbf16>
    %c0_52 = arith.constant 0 : index
    %c0_53 = arith.constant 0 : index
    %c0_54 = arith.constant 0 : index
    %c0_55 = arith.constant 0 : index
    %67 = vector.load %arg7[%c0_52, %c0_53, %c0_54, %c0_55] : memref<1x8x16x32xbf16, #tpu.memory_space<vmem>>, vector<1x8x16x32xbf16>
    tpu.vector_store %arg7[%c0_52, %c0_53, %c0_54, %c0_55], %66 {strides = array<i32>} : memref<1x8x16x32xbf16, #tpu.memory_space<vmem>>, vector<1x8x16x32xbf16>,
    return
  }
  func.func @transform_0(%arg0: i32, %arg1: i32) -> (i32, i32, i32, i32) {
    %c0_i32 = arith.constant 0 : i32
    %c0_i32_0 = arith.constant 0 : i32
    %c0_i32_1 = arith.constant 0 : i32
    return %arg0, %arg1, %c0_i32, %c0_i32_0 : i32, i32, i32, i32
  }
  func.func @transform_1(%arg0: i32, %arg1: i32) -> (i32, i32, i32, i32) {
    %c8_i32 = arith.constant 8 : i32
    %0 = arith.muli %arg1, %c8_i32 : i32
    %c1_i32 = arith.constant 1 : i32
    %1 = arith.subi %0, %c1_i32 : i32
    %c0_i32 = arith.constant 0 : i32
    %2 = arith.maxsi %1, %c0_i32 : i32
    %c0_i32_0 = arith.constant 0 : i32
    %c0_i32_1 = arith.constant 0 : i32
    %c0_i32_2 = arith.constant 0 : i32
    return %arg0, %2, %c0_i32_0, %c0_i32_1 : i32, i32, i32, i32
  }
  func.func @transform_2(%arg0: i32, %arg1: i32) -> (i32, i32, i32, i32) {
    %c8_i32 = arith.constant 8 : i32
    %0 = arith.muli %arg1, %c8_i32 : i32
    %c8_i32_0 = arith.constant 8 : i32
    %1 = arith.addi %0, %c8_i32_0 : i32
    %c15_i32 = arith.constant 15 : i32
    %2 = arith.minsi %1, %c15_i32 : i32
    %c0_i32 = arith.constant 0 : i32
    %c0_i32_1 = arith.constant 0 : i32
    %c0_i32_2 = arith.constant 0 : i32
    return %arg0, %2, %c0_i32, %c0_i32_1 : i32, i32, i32, i32
  }
  func.func @transform_3(%arg0: i32, %arg1: i32) -> (i32, i32, i32) {
    %c0_i32 = arith.constant 0 : i32
    %c0_i32_0 = arith.constant 0 : i32
    %c0_i32_1 = arith.constant 0 : i32
    %c0_i32_2 = arith.constant 0 : i32
    return %c0_i32, %c0_i32_0, %c0_i32_1 : i32, i32, i32
  }
  func.func @transform_4(%arg0: i32, %arg1: i32) -> (i32, i32) {
    %c0_i32 = arith.constant 0 : i32
    %c0_i32_0 = arith.constant 0 : i32
    %c0_i32_1 = arith.constant 0 : i32
    return %c0_i32, %c0_i32_0 : i32, i32
  }
  func.func @transform_5(%arg0: i32, %arg1: i32) -> (i32, i32, i32, i32) {
    %c0_i32 = arith.constant 0 : i32
    %c0_i32_0 = arith.constant 0 : i32
    %c0_i32_1 = arith.constant 0 : i32
    return %arg0, %arg1, %c0_i32, %c0_i32_0 : i32, i32, i32, i32
  }
  func.func @transform_6(%arg0: i32, %arg1: i32) -> (i32, i32, i32, i32) {
    %c0_i32 = arith.constant 0 : i32
    %c0_i32_0 = arith.constant 0 : i32
    %c0_i32_1 = arith.constant 0 : i32
    return %arg0, %arg1, %c0_i32, %c0_i32_0 : i32, i32, i32, i32
  }
  func.func @transform_7(%arg0: i32, %arg1: i32) -> (i32, i32, i32, i32) {
    %c0_i32 = arith.constant 0 : i32
    %c0_i32_0 = arith.constant 0 : i32
    %c0_i32_1 = arith.constant 0 : i32
    return %arg0, %arg1, %c0_i32, %c0_i32_0 : i32, i32, i32, i32
  }
}

module attributes {stable_mosaic.version = 11 : i64} {
  func.func @kernel(%arg0: i32, %arg1: i32, %arg2: memref<1x32xf32, #tpu.memory_space<vmem>>, %arg3: memref<1x32xf32, #tpu.memory_space<vmem>>, %arg4: memref<1x8x16x32xbf16, #tpu.memory_space<vmem>>, %arg5: memref<1x1x16x32xbf16, #tpu.memory_space<vmem>>, %arg6: memref<1x1x16x32xbf16, #tpu.memory_space<vmem>>, %arg7: memref<3x96x32xbf16, #tpu.memory_space<vmem>>, %arg8: memref<1x32xf32, #tpu.memory_space<vmem>>, %arg9: memref<1x8x16x32xbf16, #tpu.memory_space<vmem>>, %arg10: memref<1x1x1x32xf32, #tpu.memory_space<vmem>>, %arg11: memref<1x1x1x32xf32, #tpu.memory_space<vmem>>, %arg12: memref<10x16x96xbf16, #tpu.memory_space<vmem>>) attributes {dimension_semantics = [#tpu.dimension_semantics<parallel>, #tpu.dimension_semantics<parallel>], iteration_bounds = array<i64: 2, 2>, scalar_prefetch = 0 : i64, scratch_operands = 1 : i64, tpu.core_type = #tpu.core_type<tc>, window_params = [{pipeline_mode = #tpu.pipeline_mode<synchronous>, transform_indices = @transform_0, window_bounds = array<i64: 1, 32>}, {pipeline_mode = #tpu.pipeline_mode<synchronous>, transform_indices = @transform_1, window_bounds = array<i64: 1, 32>}, {transform_indices = @transform_2, window_bounds = array<i64: 1, 8, 16, 32>}, {transform_indices = @transform_3, window_bounds = array<i64: 1, 1, 16, 32>}, {transform_indices = @transform_4, window_bounds = array<i64: 1, 1, 16, 32>}, {pipeline_mode = #tpu.pipeline_mode<synchronous>, transform_indices = @transform_5, window_bounds = array<i64: 3, 96, 32>}, {pipeline_mode = #tpu.pipeline_mode<synchronous>, transform_indices = @transform_6, window_bounds = array<i64: 1, 32>}, {transform_indices = @transform_7, window_bounds = array<i64: 1, 8, 16, 32>}, {transform_indices = @transform_8, window_bounds = array<i64: 1, 1, 1, 32>}, {transform_indices = @transform_9, window_bounds = array<i64: 1, 1, 1, 32>}]} {
    %c0 = arith.constant 0 : index
    %c0_0 = arith.constant 0 : index
    %0 = vector.load %arg2[%c0, %c0_0] : memref<1x32xf32, #tpu.memory_space<vmem>>, vector<1x32xf32>
    %1 = vector.shape_cast %0 : vector<1x32xf32> to vector<1x1x32xf32>
    %c0_1 = arith.constant 0 : index
    %c0_2 = arith.constant 0 : index
    %2 = vector.load %arg3[%c0_1, %c0_2] : memref<1x32xf32, #tpu.memory_space<vmem>>, vector<1x32xf32>
    %3 = vector.shape_cast %2 : vector<1x32xf32> to vector<1x1x32xf32>
    %c0_3 = arith.constant 0 : index
    %c0_4 = arith.constant 0 : index
    %c0_5 = arith.constant 0 : index
    %c0_6 = arith.constant 0 : index
    %4 = vector.load %arg4[%c0_3, %c0_4, %c0_5, %c0_6] : memref<1x8x16x32xbf16, #tpu.memory_space<vmem>>, vector<1x8x16x32xbf16>
    %5 = vector.shape_cast %4 : vector<1x8x16x32xbf16> to vector<8x16x32xbf16>
    %6 = arith.extf %5 : vector<8x16x32xbf16> to vector<8x16x32xf32>
    %7 = vector.broadcast %1 : vector<1x1x32xf32> to vector<8x16x32xf32>
    %8 = arith.mulf %6, %7 : vector<8x16x32xf32>
    %9 = vector.broadcast %3 : vector<1x1x32xf32> to vector<8x16x32xf32>
    %10 = arith.addf %8, %9 : vector<8x16x32xf32>
    %cst = arith.constant 0.000000e+00 : f32
    %11 = vector.broadcast %cst : f32 to vector<8x16x32xf32>
    %12 = arith.maximumf %10, %11 : vector<8x16x32xf32>
    %c0_i32 = arith.constant 0 : i32
    %13 = arith.cmpi sgt, %arg1, %c0_i32 : i32
    %c0_7 = arith.constant 0 : index
    %c0_8 = arith.constant 0 : index
    %c0_9 = arith.constant 0 : index
    %c0_10 = arith.constant 0 : index
    %14 = vector.load %arg5[%c0_7, %c0_8, %c0_9, %c0_10] : memref<1x1x16x32xbf16, #tpu.memory_space<vmem>>, vector<1x1x16x32xbf16>
    %15 = vector.shape_cast %14 : vector<1x1x16x32xbf16> to vector<1x16x32xbf16>
    %16 = arith.extf %15 : vector<1x16x32xbf16> to vector<1x16x32xf32>
    %17 = vector.broadcast %1 : vector<1x1x32xf32> to vector<1x16x32xf32>
    %18 = arith.mulf %16, %17 : vector<1x16x32xf32>
    %19 = vector.broadcast %3 : vector<1x1x32xf32> to vector<1x16x32xf32>
    %20 = arith.addf %18, %19 : vector<1x16x32xf32>
    %cst_11 = arith.constant 0.000000e+00 : f32
    %21 = vector.broadcast %cst_11 : f32 to vector<1x16x32xf32>
    %22 = arith.maximumf %20, %21 : vector<1x16x32xf32>
    %cst_12 = arith.constant 0.000000e+00 : f32
    %23 = vector.broadcast %cst_12 : f32 to vector<1x16x32xf32>
    %24 = arith.select %13, %22, %23 : vector<1x16x32xf32>
    %c1_i32 = arith.constant 1 : i32
    %25 = arith.cmpi slt, %arg1, %c1_i32 : i32
    %c0_13 = arith.constant 0 : index
    %c0_14 = arith.constant 0 : index
    %c0_15 = arith.constant 0 : index
    %c0_16 = arith.constant 0 : index
    %26 = vector.load %arg6[%c0_13, %c0_14, %c0_15, %c0_16] : memref<1x1x16x32xbf16, #tpu.memory_space<vmem>>, vector<1x1x16x32xbf16>
    %27 = vector.shape_cast %26 : vector<1x1x16x32xbf16> to vector<1x16x32xbf16>
    %28 = arith.extf %27 : vector<1x16x32xbf16> to vector<1x16x32xf32>
    %29 = vector.broadcast %1 : vector<1x1x32xf32> to vector<1x16x32xf32>
    %30 = arith.mulf %28, %29 : vector<1x16x32xf32>
    %31 = vector.broadcast %3 : vector<1x1x32xf32> to vector<1x16x32xf32>
    %32 = arith.addf %30, %31 : vector<1x16x32xf32>
    %cst_17 = arith.constant 0.000000e+00 : f32
    %33 = vector.broadcast %cst_17 : f32 to vector<1x16x32xf32>
    %34 = arith.maximumf %32, %33 : vector<1x16x32xf32>
    %cst_18 = arith.constant 0.000000e+00 : f32
    %35 = vector.broadcast %cst_18 : f32 to vector<1x16x32xf32>
    %36 = arith.select %25, %34, %35 : vector<1x16x32xf32>
    %37 = tpu.concatenate %24, %12, %36 in 0 : vector<1x16x32xf32>, vector<8x16x32xf32>, vector<1x16x32xf32> -> vector<10x16x32xf32>
    %38 = tpu.iota {dimensions = array<i32: 1>} : vector<10x16x32xi32>
    %c0_i32_19 = arith.constant 0 : i32
    %39 = vector.broadcast %c0_i32_19 : i32 to vector<10x16x32xi32>
    %40 = arith.cmpi eq, %38, %39 : vector<10x16x32xi32>
    %c1_i32_20 = arith.constant 1 : i32
    %41 = tpu.dynamic_rotate %37 by %c1_i32_20 dim 1 : vector<10x16x32xf32>, i32 -> vector<10x16x32xf32>
    %cst_21 = arith.constant 0.000000e+00 : f32
    %42 = vector.broadcast %cst_21 : f32 to vector<10x16x32xf32>
    %43 = arith.select %40, %42, %41 : vector<10x16x32xi1>, vector<10x16x32xf32>
    %c15_i32 = arith.constant 15 : i32
    %44 = vector.broadcast %c15_i32 : i32 to vector<10x16x32xi32>
    %45 = arith.cmpi eq, %38, %44 : vector<10x16x32xi32>
    %c15_i32_22 = arith.constant 15 : i32
    %46 = tpu.dynamic_rotate %37 by %c15_i32_22 dim 1 : vector<10x16x32xf32>, i32 -> vector<10x16x32xf32>
    %cst_23 = arith.constant 0.000000e+00 : f32
    %47 = vector.broadcast %cst_23 : f32 to vector<10x16x32xf32>
    %48 = arith.select %45, %47, %46 : vector<10x16x32xi1>, vector<10x16x32xf32>
    %49 = arith.truncf %43 : vector<10x16x32xf32> to vector<10x16x32xbf16>
    %50 = arith.truncf %37 : vector<10x16x32xf32> to vector<10x16x32xbf16>
    %51 = arith.truncf %48 : vector<10x16x32xf32> to vector<10x16x32xbf16>
    %52 = tpu.concatenate %49, %50, %51 in 2 : vector<10x16x32xbf16>, vector<10x16x32xbf16>, vector<10x16x32xbf16> -> vector<10x16x96xbf16>
    %c0_24 = arith.constant 0 : index
    %c0_25 = arith.constant 0 : index
    %c0_26 = arith.constant 0 : index
    %53 = vector.load %arg12[%c0_24, %c0_25, %c0_26] : memref<10x16x96xbf16, #tpu.memory_space<vmem>>, vector<10x16x96xbf16>
    tpu.vector_store %arg12[%c0_24, %c0_25, %c0_26], %52 {strides = array<i32>} : memref<10x16x96xbf16, #tpu.memory_space<vmem>>, vector<10x16x96xbf16>,
    %c0_27 = arith.constant 0 : index
    %c0_28 = arith.constant 0 : index
    %c0_29 = arith.constant 0 : index
    %54 = vector.load %arg12[%c0_27, %c0_28, %c0_29] : memref<10x16x96xbf16, #tpu.memory_space<vmem>>, vector<8x16x96xbf16>
    %55 = vector.shape_cast %54 : vector<8x16x96xbf16> to vector<128x96xbf16>
    %c0_30 = arith.constant 0 : index
    %c0_31 = arith.constant 0 : index
    %c0_32 = arith.constant 0 : index
    %56 = vector.load %arg7[%c0_30, %c0_31, %c0_32] : memref<3x96x32xbf16, #tpu.memory_space<vmem>>, vector<1x96x32xbf16>
    %57 = vector.shape_cast %56 : vector<1x96x32xbf16> to vector<96x32xbf16>
    %cst_33 = arith.constant dense<0.000000e+00> : vector<128x32xf32>
    %58 = tpu.matmul %55, %57, %cst_33 {dimension_numbers = #tpu.dot_dimension_numbers<[1], [0], [0], [1], [0, 0, 1, 1], [], []>} : vector<128x96xbf16>, vector<96x32xbf16>, vector<128x32xf32> -> vector<128x32xf32>
    %c1 = arith.constant 1 : index
    %c0_34 = arith.constant 0 : index
    %c0_35 = arith.constant 0 : index
    %59 = vector.load %arg12[%c1, %c0_34, %c0_35] : memref<10x16x96xbf16, #tpu.memory_space<vmem>>, vector<8x16x96xbf16>
    %60 = vector.shape_cast %59 : vector<8x16x96xbf16> to vector<128x96xbf16>
    %c1_36 = arith.constant 1 : index
    %c0_37 = arith.constant 0 : index
    %c0_38 = arith.constant 0 : index
    %61 = vector.load %arg7[%c1_36, %c0_37, %c0_38] : memref<3x96x32xbf16, #tpu.memory_space<vmem>>, vector<1x96x32xbf16>
    %62 = vector.shape_cast %61 : vector<1x96x32xbf16> to vector<96x32xbf16>
    %cst_39 = arith.constant dense<0.000000e+00> : vector<128x32xf32>
    %63 = tpu.matmul %60, %62, %cst_39 {dimension_numbers = #tpu.dot_dimension_numbers<[1], [0], [0], [1], [0, 0, 1, 1], [], []>} : vector<128x96xbf16>, vector<96x32xbf16>, vector<128x32xf32> -> vector<128x32xf32>
    %64 = arith.addf %58, %63 : vector<128x32xf32>
    %c2 = arith.constant 2 : index
    %c0_40 = arith.constant 0 : index
    %c0_41 = arith.constant 0 : index
    %65 = vector.load %arg12[%c2, %c0_40, %c0_41] : memref<10x16x96xbf16, #tpu.memory_space<vmem>>, vector<8x16x96xbf16>
    %66 = vector.shape_cast %65 : vector<8x16x96xbf16> to vector<128x96xbf16>
    %c2_42 = arith.constant 2 : index
    %c0_43 = arith.constant 0 : index
    %c0_44 = arith.constant 0 : index
    %67 = vector.load %arg7[%c2_42, %c0_43, %c0_44] : memref<3x96x32xbf16, #tpu.memory_space<vmem>>, vector<1x96x32xbf16>
    %68 = vector.shape_cast %67 : vector<1x96x32xbf16> to vector<96x32xbf16>
    %cst_45 = arith.constant dense<0.000000e+00> : vector<128x32xf32>
    %69 = tpu.matmul %66, %68, %cst_45 {dimension_numbers = #tpu.dot_dimension_numbers<[1], [0], [0], [1], [0, 0, 1, 1], [], []>} : vector<128x96xbf16>, vector<96x32xbf16>, vector<128x32xf32> -> vector<128x32xf32>
    %70 = arith.addf %64, %69 : vector<128x32xf32>
    %c0_46 = arith.constant 0 : index
    %c0_47 = arith.constant 0 : index
    %71 = vector.load %arg8[%c0_46, %c0_47] : memref<1x32xf32, #tpu.memory_space<vmem>>, vector<1x32xf32>
    %72 = vector.broadcast %71 : vector<1x32xf32> to vector<128x32xf32>
    %73 = arith.addf %70, %72 : vector<128x32xf32>
    %cst_48 = arith.constant dense<0.000000e+00> : vector<32xf32>
    %74 = vector.multi_reduction <add>, %73, %cst_48 [0] : vector<128x32xf32> to vector<32xf32>
    %75 = vector.shape_cast %74 : vector<32xf32> to vector<1x32xf32>
    %cst_49 = arith.constant 7.812500e-03 : f32
    %76 = vector.broadcast %cst_49 : f32 to vector<1x32xf32>
    %77 = arith.mulf %75, %76 : vector<1x32xf32>
    %78 = vector.broadcast %77 : vector<1x32xf32> to vector<128x32xf32>
    %79 = arith.subf %73, %78 : vector<128x32xf32>
    %80 = vector.shape_cast %75 : vector<1x32xf32> to vector<1x1x1x32xf32>
    %c0_50 = arith.constant 0 : index
    %c0_51 = arith.constant 0 : index
    %c0_52 = arith.constant 0 : index
    %c0_53 = arith.constant 0 : index
    %81 = vector.load %arg10[%c0_50, %c0_51, %c0_52, %c0_53] : memref<1x1x1x32xf32, #tpu.memory_space<vmem>>, vector<1x1x1x32xf32>
    tpu.vector_store %arg10[%c0_50, %c0_51, %c0_52, %c0_53], %80 {strides = array<i32>} : memref<1x1x1x32xf32, #tpu.memory_space<vmem>>, vector<1x1x1x32xf32>,
    %82 = arith.mulf %79, %79 : vector<128x32xf32>
    %cst_54 = arith.constant dense<0.000000e+00> : vector<32xf32>
    %83 = vector.multi_reduction <add>, %82, %cst_54 [0] : vector<128x32xf32> to vector<32xf32>
    %84 = vector.shape_cast %83 : vector<32xf32> to vector<1x32xf32>
    %85 = vector.shape_cast %84 : vector<1x32xf32> to vector<1x1x1x32xf32>
    %c0_55 = arith.constant 0 : index
    %c0_56 = arith.constant 0 : index
    %c0_57 = arith.constant 0 : index
    %c0_58 = arith.constant 0 : index
    %86 = vector.load %arg11[%c0_55, %c0_56, %c0_57, %c0_58] : memref<1x1x1x32xf32, #tpu.memory_space<vmem>>, vector<1x1x1x32xf32>
    tpu.vector_store %arg11[%c0_55, %c0_56, %c0_57, %c0_58], %85 {strides = array<i32>} : memref<1x1x1x32xf32, #tpu.memory_space<vmem>>, vector<1x1x1x32xf32>,
    %87 = vector.shape_cast %73 : vector<128x32xf32> to vector<1x8x16x32xf32>
    %88 = arith.truncf %87 : vector<1x8x16x32xf32> to vector<1x8x16x32xbf16>
    %c0_59 = arith.constant 0 : index
    %c0_60 = arith.constant 0 : index
    %c0_61 = arith.constant 0 : index
    %c0_62 = arith.constant 0 : index
    %89 = vector.load %arg9[%c0_59, %c0_60, %c0_61, %c0_62] : memref<1x8x16x32xbf16, #tpu.memory_space<vmem>>, vector<1x8x16x32xbf16>
    tpu.vector_store %arg9[%c0_59, %c0_60, %c0_61, %c0_62], %88 {strides = array<i32>} : memref<1x8x16x32xbf16, #tpu.memory_space<vmem>>, vector<1x8x16x32xbf16>,
    return
  }
  func.func @transform_0(%arg0: i32, %arg1: i32) -> (i32, i32) {
    %c0_i32 = arith.constant 0 : i32
    %c0_i32_0 = arith.constant 0 : i32
    %c0_i32_1 = arith.constant 0 : i32
    return %c0_i32, %c0_i32_0 : i32, i32
  }
  func.func @transform_1(%arg0: i32, %arg1: i32) -> (i32, i32) {
    %c0_i32 = arith.constant 0 : i32
    %c0_i32_0 = arith.constant 0 : i32
    %c0_i32_1 = arith.constant 0 : i32
    return %c0_i32, %c0_i32_0 : i32, i32
  }
  func.func @transform_2(%arg0: i32, %arg1: i32) -> (i32, i32, i32, i32) {
    %c0_i32 = arith.constant 0 : i32
    %c0_i32_0 = arith.constant 0 : i32
    %c0_i32_1 = arith.constant 0 : i32
    return %arg0, %arg1, %c0_i32, %c0_i32_0 : i32, i32, i32, i32
  }
  func.func @transform_3(%arg0: i32, %arg1: i32) -> (i32, i32, i32, i32) {
    %c8_i32 = arith.constant 8 : i32
    %0 = arith.muli %arg1, %c8_i32 : i32
    %c1_i32 = arith.constant 1 : i32
    %1 = arith.subi %0, %c1_i32 : i32
    %c0_i32 = arith.constant 0 : i32
    %2 = arith.maxsi %1, %c0_i32 : i32
    %c0_i32_0 = arith.constant 0 : i32
    %c0_i32_1 = arith.constant 0 : i32
    %c0_i32_2 = arith.constant 0 : i32
    return %arg0, %2, %c0_i32_0, %c0_i32_1 : i32, i32, i32, i32
  }
  func.func @transform_4(%arg0: i32, %arg1: i32) -> (i32, i32, i32, i32) {
    %c8_i32 = arith.constant 8 : i32
    %0 = arith.muli %arg1, %c8_i32 : i32
    %c8_i32_0 = arith.constant 8 : i32
    %1 = arith.addi %0, %c8_i32_0 : i32
    %c15_i32 = arith.constant 15 : i32
    %2 = arith.minsi %1, %c15_i32 : i32
    %c0_i32 = arith.constant 0 : i32
    %c0_i32_1 = arith.constant 0 : i32
    %c0_i32_2 = arith.constant 0 : i32
    return %arg0, %2, %c0_i32, %c0_i32_1 : i32, i32, i32, i32
  }
  func.func @transform_5(%arg0: i32, %arg1: i32) -> (i32, i32, i32) {
    %c0_i32 = arith.constant 0 : i32
    %c0_i32_0 = arith.constant 0 : i32
    %c0_i32_1 = arith.constant 0 : i32
    %c0_i32_2 = arith.constant 0 : i32
    return %c0_i32, %c0_i32_0, %c0_i32_1 : i32, i32, i32
  }
  func.func @transform_6(%arg0: i32, %arg1: i32) -> (i32, i32) {
    %c0_i32 = arith.constant 0 : i32
    %c0_i32_0 = arith.constant 0 : i32
    %c0_i32_1 = arith.constant 0 : i32
    return %c0_i32, %c0_i32_0 : i32, i32
  }
  func.func @transform_7(%arg0: i32, %arg1: i32) -> (i32, i32, i32, i32) {
    %c0_i32 = arith.constant 0 : i32
    %c0_i32_0 = arith.constant 0 : i32
    %c0_i32_1 = arith.constant 0 : i32
    return %arg0, %arg1, %c0_i32, %c0_i32_0 : i32, i32, i32, i32
  }
  func.func @transform_8(%arg0: i32, %arg1: i32) -> (i32, i32, i32, i32) {
    %c0_i32 = arith.constant 0 : i32
    %c0_i32_0 = arith.constant 0 : i32
    %c0_i32_1 = arith.constant 0 : i32
    return %arg0, %arg1, %c0_i32, %c0_i32_0 : i32, i32, i32, i32
  }
  func.func @transform_9(%arg0: i32, %arg1: i32) -> (i32, i32, i32, i32) {
    %c0_i32 = arith.constant 0 : i32
    %c0_i32_0 = arith.constant 0 : i32
    %c0_i32_1 = arith.constant 0 : i32
    return %arg0, %arg1, %c0_i32, %c0_i32_0 : i32, i32, i32, i32
  }
}

module attributes {stable_mosaic.version = 11 : i64} {
  func.func @kernel(%arg0: i32, %arg1: i32, %arg2: memref<1x32xf32, #tpu.memory_space<vmem>>, %arg3: memref<1x32xf32, #tpu.memory_space<vmem>>, %arg4: memref<1x8x16x32xbf16, #tpu.memory_space<vmem>>, %arg5: memref<1x1x16x32xbf16, #tpu.memory_space<vmem>>, %arg6: memref<1x1x16x32xbf16, #tpu.memory_space<vmem>>, %arg7: memref<3x96x3xbf16, #tpu.memory_space<vmem>>, %arg8: memref<1x3xf32, #tpu.memory_space<vmem>>, %arg9: memref<1x8x16x3xf32, #tpu.memory_space<vmem>>, %arg10: memref<10x16x96xbf16, #tpu.memory_space<vmem>>) attributes {dimension_semantics = [#tpu.dimension_semantics<parallel>, #tpu.dimension_semantics<parallel>], iteration_bounds = array<i64: 2, 2>, scalar_prefetch = 0 : i64, scratch_operands = 1 : i64, tpu.core_type = #tpu.core_type<tc>, window_params = [{pipeline_mode = #tpu.pipeline_mode<synchronous>, transform_indices = @transform_0, window_bounds = array<i64: 1, 32>}, {pipeline_mode = #tpu.pipeline_mode<synchronous>, transform_indices = @transform_1, window_bounds = array<i64: 1, 32>}, {transform_indices = @transform_2, window_bounds = array<i64: 1, 8, 16, 32>}, {transform_indices = @transform_3, window_bounds = array<i64: 1, 1, 16, 32>}, {transform_indices = @transform_4, window_bounds = array<i64: 1, 1, 16, 32>}, {pipeline_mode = #tpu.pipeline_mode<synchronous>, transform_indices = @transform_5, window_bounds = array<i64: 3, 96, 3>}, {pipeline_mode = #tpu.pipeline_mode<synchronous>, transform_indices = @transform_6, window_bounds = array<i64: 1, 3>}, {transform_indices = @transform_7, window_bounds = array<i64: 1, 8, 16, 3>}]} {
    %c0 = arith.constant 0 : index
    %c0_0 = arith.constant 0 : index
    %0 = vector.load %arg2[%c0, %c0_0] : memref<1x32xf32, #tpu.memory_space<vmem>>, vector<1x32xf32>
    %1 = vector.shape_cast %0 : vector<1x32xf32> to vector<1x1x32xf32>
    %c0_1 = arith.constant 0 : index
    %c0_2 = arith.constant 0 : index
    %2 = vector.load %arg3[%c0_1, %c0_2] : memref<1x32xf32, #tpu.memory_space<vmem>>, vector<1x32xf32>
    %3 = vector.shape_cast %2 : vector<1x32xf32> to vector<1x1x32xf32>
    %c0_3 = arith.constant 0 : index
    %c0_4 = arith.constant 0 : index
    %c0_5 = arith.constant 0 : index
    %c0_6 = arith.constant 0 : index
    %4 = vector.load %arg4[%c0_3, %c0_4, %c0_5, %c0_6] : memref<1x8x16x32xbf16, #tpu.memory_space<vmem>>, vector<1x8x16x32xbf16>
    %5 = vector.shape_cast %4 : vector<1x8x16x32xbf16> to vector<8x16x32xbf16>
    %6 = arith.extf %5 : vector<8x16x32xbf16> to vector<8x16x32xf32>
    %7 = vector.broadcast %1 : vector<1x1x32xf32> to vector<8x16x32xf32>
    %8 = arith.mulf %6, %7 : vector<8x16x32xf32>
    %9 = vector.broadcast %3 : vector<1x1x32xf32> to vector<8x16x32xf32>
    %10 = arith.addf %8, %9 : vector<8x16x32xf32>
    %cst = arith.constant 0.000000e+00 : f32
    %11 = vector.broadcast %cst : f32 to vector<8x16x32xf32>
    %12 = arith.maximumf %10, %11 : vector<8x16x32xf32>
    %c0_i32 = arith.constant 0 : i32
    %13 = arith.cmpi sgt, %arg1, %c0_i32 : i32
    %c0_7 = arith.constant 0 : index
    %c0_8 = arith.constant 0 : index
    %c0_9 = arith.constant 0 : index
    %c0_10 = arith.constant 0 : index
    %14 = vector.load %arg5[%c0_7, %c0_8, %c0_9, %c0_10] : memref<1x1x16x32xbf16, #tpu.memory_space<vmem>>, vector<1x1x16x32xbf16>
    %15 = vector.shape_cast %14 : vector<1x1x16x32xbf16> to vector<1x16x32xbf16>
    %16 = arith.extf %15 : vector<1x16x32xbf16> to vector<1x16x32xf32>
    %17 = vector.broadcast %1 : vector<1x1x32xf32> to vector<1x16x32xf32>
    %18 = arith.mulf %16, %17 : vector<1x16x32xf32>
    %19 = vector.broadcast %3 : vector<1x1x32xf32> to vector<1x16x32xf32>
    %20 = arith.addf %18, %19 : vector<1x16x32xf32>
    %cst_11 = arith.constant 0.000000e+00 : f32
    %21 = vector.broadcast %cst_11 : f32 to vector<1x16x32xf32>
    %22 = arith.maximumf %20, %21 : vector<1x16x32xf32>
    %cst_12 = arith.constant 0.000000e+00 : f32
    %23 = vector.broadcast %cst_12 : f32 to vector<1x16x32xf32>
    %24 = arith.select %13, %22, %23 : vector<1x16x32xf32>
    %c1_i32 = arith.constant 1 : i32
    %25 = arith.cmpi slt, %arg1, %c1_i32 : i32
    %c0_13 = arith.constant 0 : index
    %c0_14 = arith.constant 0 : index
    %c0_15 = arith.constant 0 : index
    %c0_16 = arith.constant 0 : index
    %26 = vector.load %arg6[%c0_13, %c0_14, %c0_15, %c0_16] : memref<1x1x16x32xbf16, #tpu.memory_space<vmem>>, vector<1x1x16x32xbf16>
    %27 = vector.shape_cast %26 : vector<1x1x16x32xbf16> to vector<1x16x32xbf16>
    %28 = arith.extf %27 : vector<1x16x32xbf16> to vector<1x16x32xf32>
    %29 = vector.broadcast %1 : vector<1x1x32xf32> to vector<1x16x32xf32>
    %30 = arith.mulf %28, %29 : vector<1x16x32xf32>
    %31 = vector.broadcast %3 : vector<1x1x32xf32> to vector<1x16x32xf32>
    %32 = arith.addf %30, %31 : vector<1x16x32xf32>
    %cst_17 = arith.constant 0.000000e+00 : f32
    %33 = vector.broadcast %cst_17 : f32 to vector<1x16x32xf32>
    %34 = arith.maximumf %32, %33 : vector<1x16x32xf32>
    %cst_18 = arith.constant 0.000000e+00 : f32
    %35 = vector.broadcast %cst_18 : f32 to vector<1x16x32xf32>
    %36 = arith.select %25, %34, %35 : vector<1x16x32xf32>
    %37 = tpu.concatenate %24, %12, %36 in 0 : vector<1x16x32xf32>, vector<8x16x32xf32>, vector<1x16x32xf32> -> vector<10x16x32xf32>
    %38 = tpu.iota {dimensions = array<i32: 1>} : vector<10x16x32xi32>
    %c0_i32_19 = arith.constant 0 : i32
    %39 = vector.broadcast %c0_i32_19 : i32 to vector<10x16x32xi32>
    %40 = arith.cmpi eq, %38, %39 : vector<10x16x32xi32>
    %c1_i32_20 = arith.constant 1 : i32
    %41 = tpu.dynamic_rotate %37 by %c1_i32_20 dim 1 : vector<10x16x32xf32>, i32 -> vector<10x16x32xf32>
    %cst_21 = arith.constant 0.000000e+00 : f32
    %42 = vector.broadcast %cst_21 : f32 to vector<10x16x32xf32>
    %43 = arith.select %40, %42, %41 : vector<10x16x32xi1>, vector<10x16x32xf32>
    %c15_i32 = arith.constant 15 : i32
    %44 = vector.broadcast %c15_i32 : i32 to vector<10x16x32xi32>
    %45 = arith.cmpi eq, %38, %44 : vector<10x16x32xi32>
    %c15_i32_22 = arith.constant 15 : i32
    %46 = tpu.dynamic_rotate %37 by %c15_i32_22 dim 1 : vector<10x16x32xf32>, i32 -> vector<10x16x32xf32>
    %cst_23 = arith.constant 0.000000e+00 : f32
    %47 = vector.broadcast %cst_23 : f32 to vector<10x16x32xf32>
    %48 = arith.select %45, %47, %46 : vector<10x16x32xi1>, vector<10x16x32xf32>
    %49 = arith.truncf %43 : vector<10x16x32xf32> to vector<10x16x32xbf16>
    %50 = arith.truncf %37 : vector<10x16x32xf32> to vector<10x16x32xbf16>
    %51 = arith.truncf %48 : vector<10x16x32xf32> to vector<10x16x32xbf16>
    %52 = tpu.concatenate %49, %50, %51 in 2 : vector<10x16x32xbf16>, vector<10x16x32xbf16>, vector<10x16x32xbf16> -> vector<10x16x96xbf16>
    %c0_24 = arith.constant 0 : index
    %c0_25 = arith.constant 0 : index
    %c0_26 = arith.constant 0 : index
    %53 = vector.load %arg10[%c0_24, %c0_25, %c0_26] : memref<10x16x96xbf16, #tpu.memory_space<vmem>>, vector<10x16x96xbf16>
    tpu.vector_store %arg10[%c0_24, %c0_25, %c0_26], %52 {strides = array<i32>} : memref<10x16x96xbf16, #tpu.memory_space<vmem>>, vector<10x16x96xbf16>,
    %c0_27 = arith.constant 0 : index
    %c0_28 = arith.constant 0 : index
    %c0_29 = arith.constant 0 : index
    %54 = vector.load %arg10[%c0_27, %c0_28, %c0_29] : memref<10x16x96xbf16, #tpu.memory_space<vmem>>, vector<8x16x96xbf16>
    %55 = vector.shape_cast %54 : vector<8x16x96xbf16> to vector<128x96xbf16>
    %c0_30 = arith.constant 0 : index
    %c0_31 = arith.constant 0 : index
    %c0_32 = arith.constant 0 : index
    %56 = vector.load %arg7[%c0_30, %c0_31, %c0_32] : memref<3x96x3xbf16, #tpu.memory_space<vmem>>, vector<1x96x3xbf16>
    %57 = vector.shape_cast %56 : vector<1x96x3xbf16> to vector<96x3xbf16>
    %cst_33 = arith.constant dense<0.000000e+00> : vector<128x3xf32>
    %58 = tpu.matmul %55, %57, %cst_33 {dimension_numbers = #tpu.dot_dimension_numbers<[1], [0], [0], [1], [0, 0, 1, 1], [], []>} : vector<128x96xbf16>, vector<96x3xbf16>, vector<128x3xf32> -> vector<128x3xf32>
    %c1 = arith.constant 1 : index
    %c0_34 = arith.constant 0 : index
    %c0_35 = arith.constant 0 : index
    %59 = vector.load %arg10[%c1, %c0_34, %c0_35] : memref<10x16x96xbf16, #tpu.memory_space<vmem>>, vector<8x16x96xbf16>
    %60 = vector.shape_cast %59 : vector<8x16x96xbf16> to vector<128x96xbf16>
    %c1_36 = arith.constant 1 : index
    %c0_37 = arith.constant 0 : index
    %c0_38 = arith.constant 0 : index
    %61 = vector.load %arg7[%c1_36, %c0_37, %c0_38] : memref<3x96x3xbf16, #tpu.memory_space<vmem>>, vector<1x96x3xbf16>
    %62 = vector.shape_cast %61 : vector<1x96x3xbf16> to vector<96x3xbf16>
    %cst_39 = arith.constant dense<0.000000e+00> : vector<128x3xf32>
    %63 = tpu.matmul %60, %62, %cst_39 {dimension_numbers = #tpu.dot_dimension_numbers<[1], [0], [0], [1], [0, 0, 1, 1], [], []>} : vector<128x96xbf16>, vector<96x3xbf16>, vector<128x3xf32> -> vector<128x3xf32>
    %64 = arith.addf %58, %63 : vector<128x3xf32>
    %c2 = arith.constant 2 : index
    %c0_40 = arith.constant 0 : index
    %c0_41 = arith.constant 0 : index
    %65 = vector.load %arg10[%c2, %c0_40, %c0_41] : memref<10x16x96xbf16, #tpu.memory_space<vmem>>, vector<8x16x96xbf16>
    %66 = vector.shape_cast %65 : vector<8x16x96xbf16> to vector<128x96xbf16>
    %c2_42 = arith.constant 2 : index
    %c0_43 = arith.constant 0 : index
    %c0_44 = arith.constant 0 : index
    %67 = vector.load %arg7[%c2_42, %c0_43, %c0_44] : memref<3x96x3xbf16, #tpu.memory_space<vmem>>, vector<1x96x3xbf16>
    %68 = vector.shape_cast %67 : vector<1x96x3xbf16> to vector<96x3xbf16>
    %cst_45 = arith.constant dense<0.000000e+00> : vector<128x3xf32>
    %69 = tpu.matmul %66, %68, %cst_45 {dimension_numbers = #tpu.dot_dimension_numbers<[1], [0], [0], [1], [0, 0, 1, 1], [], []>} : vector<128x96xbf16>, vector<96x3xbf16>, vector<128x3xf32> -> vector<128x3xf32>
    %70 = arith.addf %64, %69 : vector<128x3xf32>
    %c0_46 = arith.constant 0 : index
    %c0_47 = arith.constant 0 : index
    %71 = vector.load %arg8[%c0_46, %c0_47] : memref<1x3xf32, #tpu.memory_space<vmem>>, vector<1x3xf32>
    %72 = vector.broadcast %71 : vector<1x3xf32> to vector<128x3xf32>
    %73 = arith.addf %70, %72 : vector<128x3xf32>
    %74 = vector.shape_cast %73 : vector<128x3xf32> to vector<1x8x16x3xf32>
    %c0_48 = arith.constant 0 : index
    %c0_49 = arith.constant 0 : index
    %c0_50 = arith.constant 0 : index
    %c0_51 = arith.constant 0 : index
    %75 = vector.load %arg9[%c0_48, %c0_49, %c0_50, %c0_51] : memref<1x8x16x3xf32, #tpu.memory_space<vmem>>, vector<1x8x16x3xf32>
    tpu.vector_store %arg9[%c0_48, %c0_49, %c0_50, %c0_51], %74 {strides = array<i32>} : memref<1x8x16x3xf32, #tpu.memory_space<vmem>>, vector<1x8x16x3xf32>,
    return
  }
  func.func @transform_0(%arg0: i32, %arg1: i32) -> (i32, i32) {
    %c0_i32 = arith.constant 0 : i32
    %c0_i32_0 = arith.constant 0 : i32
    %c0_i32_1 = arith.constant 0 : i32
    return %c0_i32, %c0_i32_0 : i32, i32
  }
  func.func @transform_1(%arg0: i32, %arg1: i32) -> (i32, i32) {
    %c0_i32 = arith.constant 0 : i32
    %c0_i32_0 = arith.constant 0 : i32
    %c0_i32_1 = arith.constant 0 : i32
    return %c0_i32, %c0_i32_0 : i32, i32
  }
  func.func @transform_2(%arg0: i32, %arg1: i32) -> (i32, i32, i32, i32) {
    %c0_i32 = arith.constant 0 : i32
    %c0_i32_0 = arith.constant 0 : i32
    %c0_i32_1 = arith.constant 0 : i32
    return %arg0, %arg1, %c0_i32, %c0_i32_0 : i32, i32, i32, i32
  }
  func.func @transform_3(%arg0: i32, %arg1: i32) -> (i32, i32, i32, i32) {
    %c8_i32 = arith.constant 8 : i32
    %0 = arith.muli %arg1, %c8_i32 : i32
    %c1_i32 = arith.constant 1 : i32
    %1 = arith.subi %0, %c1_i32 : i32
    %c0_i32 = arith.constant 0 : i32
    %2 = arith.maxsi %1, %c0_i32 : i32
    %c0_i32_0 = arith.constant 0 : i32
    %c0_i32_1 = arith.constant 0 : i32
    %c0_i32_2 = arith.constant 0 : i32
    return %arg0, %2, %c0_i32_0, %c0_i32_1 : i32, i32, i32, i32
  }
  func.func @transform_4(%arg0: i32, %arg1: i32) -> (i32, i32, i32, i32) {
    %c8_i32 = arith.constant 8 : i32
    %0 = arith.muli %arg1, %c8_i32 : i32
    %c8_i32_0 = arith.constant 8 : i32
    %1 = arith.addi %0, %c8_i32_0 : i32
    %c15_i32 = arith.constant 15 : i32
    %2 = arith.minsi %1, %c15_i32 : i32
    %c0_i32 = arith.constant 0 : i32
    %c0_i32_1 = arith.constant 0 : i32
    %c0_i32_2 = arith.constant 0 : i32
    return %arg0, %2, %c0_i32, %c0_i32_1 : i32, i32, i32, i32
  }
  func.func @transform_5(%arg0: i32, %arg1: i32) -> (i32, i32, i32) {
    %c0_i32 = arith.constant 0 : i32
    %c0_i32_0 = arith.constant 0 : i32
    %c0_i32_1 = arith.constant 0 : i32
    %c0_i32_2 = arith.constant 0 : i32
    return %c0_i32, %c0_i32_0, %c0_i32_1 : i32, i32, i32
  }
  func.func @transform_6(%arg0: i32, %arg1: i32) -> (i32, i32) {
    %c0_i32 = arith.constant 0 : i32
    %c0_i32_0 = arith.constant 0 : i32
    %c0_i32_1 = arith.constant 0 : i32
    return %c0_i32, %c0_i32_0 : i32, i32
  }
  func.func @transform_7(%arg0: i32, %arg1: i32) -> (i32, i32, i32, i32) {
    %c0_i32 = arith.constant 0 : i32
    %c0_i32_0 = arith.constant 0 : i32
    %c0_i32_1 = arith.constant 0 : i32
    return %arg0, %arg1, %c0_i32, %c0_i32_0 : i32, i32, i32, i32
  }
}

</mosaic_0001>

<bundles_post_ra>
// kernel: dncnn_forward.5
= control target key start
LH: loop header
LB: loop body
LE: loop exit
PB: predicated region body
PF: predicated region fallthrough
CT: control target
= control target key end

     0   :  { %s1935_s18 = smov 0   ;;  %s1937_s19 = smov 0   ;;  %s2516_s0 = inlined_call_operand.vmem [shape: f32[2,16,16,3], index: 0, kind: input, shape index: {}, may-alias: {0,1,2}]   ;;  %s2517_s1 = inlined_call_operand.vmem [shape: f32[2,16,16,3], index: 1, kind: input, shape index: {}, may-alias: {0,1,2}]   ;;  %s2518_s2 = inlined_call_operand.vmem [shape: f32[2,16,16,3], index: 2, kind: input, shape index: {}, may-alias: {0,1,2}]   ;;  %s2519_s3 = inlined_call_operand.vmem [shape: bf16[3,9,32], index: 3, kind: input, shape index: {}]   ;;  %s2520_s4 = inlined_call_operand.vmem [shape: f32[1,32], index: 4, kind: input, shape index: {}]   ;;  %s2521_s5 = inlined_call_operand.vmem [shape: bf16[2,16,16,32], index: 5, kind: output, shape index: {}]  }
   0x1   :  { %s1939_s20 = smov 0   ;;  %s1941_s21 = smov 0  }
   0x2   :  { %s1943_s22 = smov 0  }
   0x3 LB: > { %s24_s23 = sadd.s32 1, %s1892_s20  ;;  %s27_s24 = sadd.s32 1, %s1896_s21  ;;  %s1900_s22 = sphi %s1943_s22, %s15_s22   ;;  %s1896_s21 = sphi %s1941_s21, %s2526_s21   ;;  %s1892_s20 = sphi %s1939_s20, %s2525_s20   ;;  %s1888_s19 = sphi %s1937_s19, %s2524_s19   ;;  %s1884_s18 = sphi %s1935_s18, %s2523_s18  }
   0x4   : > { %p25_p0 = scmp.ge.s32.totalorder %s24_s23, 2  ;;  %p1610_p1 = scmp.ge.s32.totalorder %s1900_s22, 1 }
   0x5   : > { %p273_p2 = scmp.lt.s32.totalorder %s1900_s22, 5 }
   0x6   : > { %s2528_s23 = smov (%p25_p0, %s24_s23), 0  ;;  %s2530_s24 = smov (!%p25_p0, %s27_s24), %s1896_s21 }
   0x7   : > { %p274_p3 = pnand %p1610_p1, %p273_p2  ;;  %p29_p4 = scmp.ge.s32.totalorder %s2530_s24, 2 }
   0x8   : > { %s1968_s25 = sshll.u32 (!%p274_p3), %s1884_s18, 3  ;;  %p338_p5 = scmp.lt.s32.totalorder (!%p274_p3), %s1888_s19, 1 }
   0x9   : > { %s2532_s24 = smov (%p29_p4, %s2530_s24), 0  ;;  %277 = sbr.rel (%p274_p3) target bundleno = 402 (0x192), region = 40 }
   0xa   : > { %p340_p6 = scmp.lt.s32.totalorder (!%p274_p3), %s1968_s25, 15  ;;  %s1616_s29 = sadd.s32 (!%p274_p3), 4294967295, %s1968_s25 }
   0xb   : > { %p350_p7 = scmp.gt.s32.totalorder (!%p274_p3), %s1616_s29, 0  ;;  %p1617_p8 = scmp.lt.s32.totalorder (!%p274_p3), %s1616_s29, 15 }
   0xc   : > { %p410_p9 = scmp.gt.s32.totalorder (!%p274_p3), %s1884_s18, 0  ;;  %s1902_s13 = smov (!%p274_p3), 3  }
   0xd   : > { %p418_p11 = scmp.lt.s32.totalorder (!%p274_p3), %s1884_s18, 1 }
   0xe   : > { %v426_v0 = vlaneseq  ;;  %s2534_s19 = smov (!%p338_p5, %s1888_s19), 1  ;;  %vm1056_vm4 = vcmask 1043456   ;;  %vm1057_vm5 = vcmask 1044480   ;;  %vm805_vm6 = vcmask 23552  }
   0xf   : > { %s341_s26 = scalar_select %p340_p6, %s1968_s25, 15  ;;  %vm836_vm7 = vcmask 48128   ;;  %vm927_vm8 = vcmask 68608   ;;  %vm1031_vm9 = vcmask 72704   ;;  %vm1442_vm10 = vcmask 257024  }
  0x10   : > { %v1972_v1 = vshrl.u32 %v426_v0, 7  ;;  %s1974_s27 = sshll.u32 %s2534_s19, 5  ;;  %s366_s19 = sadd.s32 8, %s1968_s25 }
  0x11   : > { %s1612_s28 = sshll.u32 %s341_s26, 1  ;;  %p2052_p10 = scmp.lt.s32.totalorder %s366_s19, 15 }
  0x12   : > { %s1978_s30 = sadd.s32 %s1974_s27, %s1612_s28  ;;  %v1982_v2 = vadd.s32 8, %v1972_v1  ;;  %vm514_vm0 = vcmp.lt.s32.totalorder %v1972_v1, 7  ;;  %vm451_vm2 = vcmp.lt.s32.totalorder %v1972_v1, 1  ;;  %vm429_vm3 = vcmp.eq.s32.totalorder %v1972_v1, 0 }
  0x13   : > { %s1614_s6 = sshll.u32 %s1978_s30, 3  ;;  %s2538_s19 = smov (!%p2052_p10, %s366_s19), 15 }
  0x14   : > { %s1987_s9 = scalar_lea.vmem %s2516_s0, %s1614_s6  ;;  %vm493_vm1 = vcmp.eq.s32.totalorder %v1982_v2, 15  ;;  %s2540_s19 = smov (!%p2052_p10, %s2538_s19), 15 }
  0x15   : > { %v1990_v3 = vld [vmem:[%s1987_s9 + $0x10] sm:$0xff]  ;;  %v1993_v4 = vld [vmem:[%s1987_s9 + $0x18] sm:$0xff]  ;;  %v1996_v5 = vld [vmem:[%s1987_s9 + $0x60] sm:$0xff]  ;;  %s351_s10 = scalar_select %p350_p7, %s1616_s29, 0 }
  0x16   : > { %v506_v6 = vrot.slane %v1993_v4, 1  ;;  %v579_v7 = vpack.c.bf16 %v1990_v3, %v1990_v3  ;;  %v580_v8 = vpack.c.bf16 %v1993_v4, %v1993_v4  ;;  %v2005_v9 = vld [vmem:[%s1987_s9 + $0x68] sm:$0xff]  ;;  %v496_v10 = vrot.slane %v1990_v3, 1  ;;  %v2028_v27 = vld [vmem:[%s1987_s9] sm:$0xff]  ;;  %s1850_s26 = scalar_select %p410_p9, 255, 0 }
  0x17   : > { %v501_v13 = vrot.slane %v1996_v5, 1  ;;  %v511_v14 = vrot.slane %v2005_v9, 1  ;;  %s2536_s10 = smov (!%p1617_p8, %s351_s10), 15  ;;  %v589_v17 = vpack.c.bf16 %v1996_v5, %v1996_v5  ;;  %v590_v18 = vpack.c.bf16 %v2005_v9, %v2005_v9  ;;  %v2031_v28 = vld [vmem:[%s1987_s9 + $0x8] sm:$0xff]  ;;  %s1903_s29 = smov 6   ;;  %v2063_v46 = vld [vmem:[%s1987_s9 + $0x20] sm:$0xff] }
  0x18   : > { %v689_v11 = vunpack.c.l.b16 %v579_v7  ;;  %v690_v12 = vunpack.c.l.b16 %v580_v8  ;;  %v517_v15 = vsel %vm514_vm0, %v496_v10, %v506_v6  ;;  %v527_v16 = vsel %vm514_vm0, %v506_v6, %v496_v10  ;;  %s1622_s11 = sshll.u32 %s2536_s10, 1  ;;  %v2071_v52 = vld [vmem:[%s1987_s9 + $0x28] sm:$0xff]  ;;  %v2079_v56 = vld [vmem:[%s1987_s9 + $0x70] sm:$0xff]  ;;  %v2082_v57 = vld [vmem:[%s1987_s9 + $0x78] sm:$0xff]  ;;  %s1629_s25 = sshll.u32 %s2540_s19, 1 }
  0x19   : > { %v540_v20 = vsel %vm493_vm1, 0.0, %v527_v16  ;;  %v599_v21 = vpack.c.bf16 %v517_v15, %v517_v15  ;;  %v522_v22 = vsel %vm514_vm0, %v501_v13, %v511_v14  ;;  %v699_v24 = vunpack.c.l.b16 %v589_v17  ;;  %s358_s12 = sadd.s32 %s1622_s11, %s1974_s27  ;;  %s375_s6 = sadd.s32 %s1629_s25, %s1974_s27 }
  0x1a   : > { %v707_v19 = vpack.c.b16 %v690_v12, %v689_v11  ;;  %v600_v23 = vpack.c.bf16 %v540_v20, %v540_v20  ;;  %v700_v25 = vunpack.c.l.b16 %v590_v18  ;;  %v532_v26 = vsel %vm514_vm0, %v511_v14, %v501_v13  ;;  %s1624_s14 = sshll.u32 %s358_s12, 3  ;;  %v2116_v20 = vld [vmem:[%s1987_s9 + $0x58] sm:$0xff]  ;;  %s1631_s27 = sshll.u32 %s375_s6, 3 }
  0x1b   : > { %v759_v29 = vunpack.c.l.b16 %v599_v21  ;;  %v550_v30 = vsel %vm493_vm1, 0.0, %v532_v26  ;;  %v609_v31 = vpack.c.bf16 %v522_v22, %v522_v22  ;;  %s360_s17 = scalar_lea.vmem %s2517_s1, %s1624_s14  ;;  %v495_v34 = vrot.slane %v2028_v27, 1  ;;  %s377_s18 = scalar_lea.vmem %s2518_s2, %s1631_s27 }
  0x1c   : > { %719 = vrot.lane.b32.xlu0 %v707_v19, %s1902_s13  ;;  %v760_v32 = vunpack.c.l.b16 %v600_v23  ;;  %v610_v33 = vpack.c.bf16 %v550_v30, %v550_v30  ;;  %v505_v35 = vrot.slane %v2031_v28, 1  ;;  %v712_v39 = vpack.c.b16 %v700_v25, %v699_v24  ;;  %v2044_v40 = vld [vmem:[%s360_s17] sm:%s1850_s26]  ;;  %v2113_v19 = vld [vmem:[%s1987_s9 + $0x50] sm:$0xff]  ;;  %s1856_s7 = scalar_select %p418_p11, 255, 0 }
  0x1d   : > { %v769_v37 = vunpack.c.l.b16 %v609_v31  ;;  %v2057_v43 = vld [vmem:[%s360_s17 + $0x8] sm:%s1850_s26]  ;;  %v494_v44 = vrot.slane %v2044_v40, 1  ;;  %v577_v50 = vpack.c.bf16 %v2028_v27, %v2028_v27  ;;  %v578_v51 = vpack.c.bf16 %v2031_v28, %v2031_v28  ;;  %v2124_v30 = vld [vmem:[%s1987_s9 + $0x30] sm:$0xff]  ;;  %v2127_v31 = vld [vmem:[%s1987_s9 + $0x38] sm:$0xff]  ;;  %s1635_s27 = sshll.u32 %s1978_s30, 2 }
  0x1e   : > { %v777_v36 = vpack.c.b16 %v760_v32, %v759_v29  ;;  %v770_v38 = vunpack.c.l.b16 %v610_v33  ;;  %v516_v41 = vsel %vm514_vm0, %v495_v34, %v505_v35  ;;  %v526_v42 = vsel %vm514_vm0, %v505_v35, %v495_v34  ;;  %s2444_s10 = scalar_lea.vmem %s2521_s5, %s1635_s27 }
  0x1f   : > { %v538_v45 = vsel %vm493_vm1, 0.0, %v526_v42  ;;  %v504_v47 = vrot.slane %v2057_v43, 1  ;;  %v597_v49 = vpack.c.bf16 %v516_v41, %v516_v41  ;;  %v497_v58 = vrot.slane %v2063_v46, 1 }
  0x20   : > { %789 = vrot.lane.b32.xlu1 %v777_v36, %s1903_s29  ;;  %v782_v48 = vpack.c.b16 %v770_v38, %v769_v37  ;;  %v598_v55 = vpack.c.bf16 %v538_v45, %v538_v45  ;;  %v687_v61 = vunpack.c.l.b16 %v577_v50  ;;  %v688_v62 = vunpack.c.l.b16 %v578_v51 }
  0x21   : > { %v515_v53 = vsel %vm514_vm0, %v494_v44, %v504_v47  ;;  %v525_v54 = vsel %vm514_vm0, %v504_v47, %v494_v44  ;;  %v507_v0 = vrot.slane %v2071_v52, 1  ;;  %v591_v7 = vpack.c.bf16 %v2079_v56, %v2079_v56 }
  0x22   : > { %v536_v59 = vsel %vm493_vm1, 0.0, %v525_v54  ;;  %v595_v60 = vpack.c.bf16 %v515_v53, %v515_v53  ;;  %v592_v8 = vpack.c.bf16 %v2082_v57, %v2082_v57  ;;  %v706_v10 = vpack.c.b16 %v688_v62, %v687_v61 }
  0x23   : > { %v596_v63 = vpack.c.bf16 %v536_v59, %v536_v59  ;;  %v528_v12 = vsel %vm514_vm0, %v507_v0, %v497_v58  ;;  %v757_v13 = vunpack.c.l.b16 %v597_v49  ;;  %v758_v14 = vunpack.c.l.b16 %v598_v55 }
  0x24   : > { %729 = vrot.lane.b32.xlu0 %v712_v39, %s1902_s13  ;;  %v755_v6 = vunpack.c.l.b16 %v595_v60  ;;  %717 = vrot.lane.b32.xlu2 %v706_v10, %s1902_s13  ;;  %v518_v15 = vsel %vm514_vm0, %v497_v58, %v507_v0  ;;  %v542_v16 = vsel %vm493_vm1, 0.0, %v528_v12  ;;  %v575_v18 = vpack.c.bf16 %v2044_v40, %v2044_v40 }
  0x25   : > { %v756_v11 = vunpack.c.l.b16 %v596_v63  ;;  %v502_v21 = vrot.slane %v2079_v56, 1  ;;  %v701_v22 = vunpack.c.l.b16 %v591_v7  ;;  %v702_v23 = vunpack.c.l.b16 %v592_v8 }
  0x26   : > { %v576_v24 = vpack.c.bf16 %v2057_v43, %v2057_v43  ;;  %v512_v25 = vrot.slane %v2082_v57, 1  ;;  %v601_v26 = vpack.c.bf16 %v518_v15, %v518_v15  ;;  %v602_v29 = vpack.c.bf16 %v542_v16, %v542_v16 }
  0x27   : > { %v775_v17 = vpack.c.b16 %v756_v11, %v755_v6  ;;  %v685_v32 = vunpack.c.l.b16 %v575_v18  ;;  %v776_v33 = vpack.c.b16 %v758_v14, %v757_v13  ;;  %v500_v35 = vrot.slane %v2113_v19, 1  ;;  %v2167_v13 = vld [vmem:[%s1987_s9 + $0x40] sm:$0xff] }
  0x28   : > { %799 = vrot.lane.b32.xlu1 %v782_v48, %s1903_s29  ;;  %v686_v34 = vunpack.c.l.b16 %v576_v24  ;;  %v510_v36 = vrot.slane %v2116_v20, 1  ;;  %v581_v37 = vpack.c.bf16 %v2063_v46, %v2063_v46  ;;  %v713_v38 = vpack.c.b16 %v702_v23, %v701_v22  ;;  %v2171_v18 = vld [vmem:[%s377_s18] sm:%s1856_s7] }
  0x29   : > { %v583_v39 = vpack.c.bf16 %v2124_v30, %v2124_v30  ;;  %v584_v41 = vpack.c.bf16 %v2127_v31, %v2127_v31  ;;  %v761_v44 = vunpack.c.l.b16 %v601_v26  ;;  %v762_v45 = vunpack.c.l.b16 %v602_v29 }
  0x2a   : > { %v705_v42 = vpack.c.b16 %v686_v34, %v685_v32  ;;  %v531_v47 = vsel %vm514_vm0, %v510_v36, %v500_v35  ;;  %v582_v48 = vpack.c.bf16 %v2071_v52, %v2071_v52  ;;  %v691_v49 = vunpack.c.l.b16 %v581_v37 }
  0x2b   : > { %v533_v50 = vsel %vm514_vm0, %v512_v25, %v502_v21  ;;  %v521_v51 = vsel %vm514_vm0, %v500_v35, %v510_v36  ;;  %v523_v54 = vsel %vm514_vm0, %v502_v21, %v512_v25  ;;  %v498_v58 = vrot.slane %v2124_v30, 1  ;;  %v2173_v21 = vld [vmem:[%s377_s18 + $0x8] sm:%s1856_s7] }
  0x2c   : > { %785 = vrot.lane.b32.xlu0 %v775_v17, %s1903_s29  ;;  %715 = vrot.lane.b32.xlu2 %v705_v42, %s1902_s13  ;;  %v692_v53 = vunpack.c.l.b16 %v582_v48  ;;  %v552_v55 = vsel %vm493_vm1, 0.0, %v533_v50  ;;  %v508_v59 = vrot.slane %v2127_v31, 1  ;;  %v693_v60 = vunpack.c.l.b16 %v583_v39  ;;  %v2178_v25 = vld [vmem:[%s1987_s9 + $0x48] sm:$0xff] }
  0x2d   : > { %v548_v61 = vsel %vm493_vm1, 0.0, %v531_v47  ;;  %v778_v62 = vpack.c.b16 %v762_v45, %v761_v44  ;;  %v694_v63 = vunpack.c.l.b16 %v584_v41  ;;  %v587_v0 = vpack.c.bf16 %v2113_v19, %v2113_v19 }
  0x2e   : > { %v588_v6 = vpack.c.bf16 %v2116_v20, %v2116_v20  ;;  %v607_v7 = vpack.c.bf16 %v521_v51, %v521_v51  ;;  %v708_v8 = vpack.c.b16 %v692_v53, %v691_v49  ;;  %v611_v10 = vpack.c.bf16 %v523_v54, %v523_v54 }
  0x2f   : > { %v612_v11 = vpack.c.bf16 %v552_v55, %v552_v55  ;;  %v608_v12 = vpack.c.bf16 %v548_v61, %v548_v61  ;;  %v529_v14 = vsel %vm514_vm0, %v508_v59, %v498_v58  ;;  %v709_v15 = vpack.c.b16 %v694_v63, %v693_v60 }
  0x30   : > { %787 = vrot.lane.b32.xlu1 %v776_v33, %s1903_s29  ;;  %v697_v16 = vunpack.c.l.b16 %v587_v0  ;;  %v698_v17 = vunpack.c.l.b16 %v588_v6  ;;  %v767_v22 = vunpack.c.l.b16 %v607_v7  ;;  %v771_v23 = vunpack.c.l.b16 %v611_v10 }
  0x31   : > { %v772_v24 = vunpack.c.l.b16 %v612_v11  ;;  %v768_v26 = vunpack.c.l.b16 %v608_v12  ;;  %v499_v29 = vrot.slane %v2167_v13, 1  ;;  %v519_v32 = vsel %vm514_vm0, %v498_v58, %v508_v59 }
  0x32   : > { %v544_v33 = vsel %vm493_vm1, 0.0, %v529_v14  ;;  %v509_v34 = vrot.slane %v2178_v25, 1  ;;  %v503_v35 = vrot.slane %v2171_v18, 1  ;;  %v513_v36 = vrot.slane %v2173_v21, 1 }
  0x33   : > { %v585_v37 = vpack.c.bf16 %v2167_v13, %v2167_v13  ;;  %v711_v39 = vpack.c.b16 %v698_v17, %v697_v16  ;;  %v783_v41 = vpack.c.b16 %v772_v24, %v771_v23  ;;  %v603_v42 = vpack.c.bf16 %v519_v32, %v519_v32 }
  0x34   : > { %731 = vrot.lane.b32.xlu0 %v713_v38, %s1902_s13  ;;  %721 = vrot.lane.b32.xlu2 %v708_v8, %s1902_s13  ;;  %v586_v38 = vpack.c.bf16 %v2178_v25, %v2178_v25  ;;  %v604_v44 = vpack.c.bf16 %v544_v33, %v544_v33  ;;  %v781_v45 = vpack.c.b16 %v768_v26, %v767_v22  ;;  %v443_v23 = vrot.slane %v1993_v4, 7 }
  0x35   : > { %v530_v47 = vsel %vm514_vm0, %v509_v34, %v499_v29  ;;  %v534_v48 = vsel %vm514_vm0, %v513_v36, %v503_v35  ;;  %v695_v49 = vunpack.c.l.b16 %v585_v37  ;;  %v593_v51 = vpack.c.bf16 %v2171_v18, %v2171_v18 }
  0x36   : > { %v696_v50 = vunpack.c.l.b16 %v586_v38  ;;  %v594_v53 = vpack.c.bf16 %v2173_v21, %v2173_v21  ;;  %v763_v54 = vunpack.c.l.b16 %v603_v42  ;;  %v764_v55 = vunpack.c.l.b16 %v604_v44 }
  0x37   : > { %v520_v58 = vsel %vm514_vm0, %v499_v29, %v509_v34  ;;  %v546_v59 = vsel %vm493_vm1, 0.0, %v530_v47  ;;  %v524_v60 = vsel %vm514_vm0, %v503_v35, %v513_v36  ;;  %v554_v61 = vsel %vm493_vm1, 0.0, %v534_v48  ;;  %v1802_v48 = vld [vmem:[%s2519_s3 + $0x10] sm:$0x10] }
  0x38   : > { %791 = vrot.lane.b32.xlu1 %v778_v62, %s1903_s29  ;;  %v710_v62 = vpack.c.b16 %v696_v50, %v695_v49  ;;  %v605_v63 = vpack.c.bf16 %v520_v58, %v520_v58  ;;  %v703_v0 = vunpack.c.l.b16 %v593_v51  ;;  %v704_v6 = vunpack.c.l.b16 %v594_v53 }
  0x39   : > { %v779_v7 = vpack.c.b16 %v764_v55, %v763_v54  ;;  %v606_v8 = vpack.c.bf16 %v546_v59, %v546_v59  ;;  %v613_v10 = vpack.c.bf16 %v524_v60, %v524_v60  ;;  %v614_v11 = vpack.c.bf16 %v554_v61, %v554_v61  ;;  %v1672_v59 = vld [vmem:[%s2519_s3 + $0x8] sm:$0xf]  ;;  %v1793_v60 = vld [vmem:[%s2519_s3 + $0x8] sm:$0x10] }
  0x3a   : > { %v714_v12 = vpack.c.b16 %v704_v6, %v703_v0  ;;  %v765_v14 = vunpack.c.l.b16 %v605_v63  ;;  %v433_v24 = vrot.slane %v1990_v3, 7  ;;  %v438_v3 = vrot.slane %v1996_v5, 7 }
  0x3b   : > { %v773_v16 = vunpack.c.l.b16 %v613_v10  ;;  %v774_v2 = vunpack.c.l.b16 %v614_v11  ;;  %v448_v36 = vrot.slane %v2005_v9, 7  ;;  %v1762_v9 = vld [vmem:[%s2519_s3 + $0x10] sm:$0xf]  ;;  %v1904_v49 = vmov 65535   ;;  %v1716_v11 = vld [vmem:[%s2519_s3] sm:$0xf] }
  0x3c   : > { %723 = vrot.lane.b32.xlu0 %v709_v15, %s1902_s13  ;;  %801 = vrot.lane.b32.xlu2 %v783_v41, %s1903_s29  ;;  %v766_v15 = vunpack.c.l.b16 %v606_v8  ;;  %v464_v26 = vsel %vm451_vm2, %v443_v23, %v433_v24  ;;  %v454_v29 = vsel %vm451_vm2, %v433_v24, %v443_v23  ;;  %v1058_v50 = vsel %vm1056_vm4, 4294967295, %v1904_v49 }
  0x3d   : > { %v784_v22 = vpack.c.b16 %v774_v2, %v773_v16  ;;  %v476_v32 = vsel %vm429_vm3, 0.0, %v464_v26  ;;  %v560_v34 = vpack.c.bf16 %v454_v29, %v454_v29  ;;  %v469_v38 = vsel %vm451_vm2, %v448_v36, %v438_v3 }
  0x3e   : > { %v780_v17 = vpack.c.b16 %v766_v15, %v765_v14  ;;  %v559_v33 = vpack.c.bf16 %v476_v32, %v476_v32  ;;  %v486_v41 = vsel %vm429_vm3, 0.0, %v469_v38  ;;  %v1763_v51 = vor.u32 %v1802_v48, %v1762_v9 }
  0x3f   : > { %v2229_v4 = vunpack.c.l.b16 %v560_v34  ;;  %v569_v42 = vpack.c.bf16 %v486_v41, %v486_v41  ;;  %v1059_v53 = vsel %vm1057_vm5, %v1058_v50, 0  ;;  %v439_v55 = vrot.slane %v2079_v56, 7 }
  0x40   : > { %727 = vrot.lane.b32.xlu1 %v711_v39, %s1902_s13  ;;  %v2227_v35 = vunpack.c.l.b16 %v559_v33  ;;  %v459_v39 = vsel %vm451_vm2, %v438_v3, %v448_v36  ;;  %v2253_v54 = vand.u32 %v1763_v51, %v1059_v53  ;;  %v449_v58 = vrot.slane %v2082_v57, 7 }
  0x41   : > { %v570_v44 = vpack.c.bf16 %v459_v39, %v459_v39  ;;  %v1673_v61 = vor.u32 %v1793_v60, %v1672_v59  ;;  %v431_v63 = vrot.slane %v2044_v40, 7  ;;  %v441_v56 = vrot.slane %v2057_v43, 7  ;;  %v1784_v40 = vld [vmem:[%s2519_s3] sm:$0x10] }
  0x42   : > { %v657_v37 = vpack.c.b16 %v2229_v4, %v2227_v35  ;;  %1332 = vmatpush.bf16.msra.mxu2 %v2253_v54  ;;  %v460_v57 = vsel %vm451_vm2, %v439_v55, %v449_v58  ;;  %v1717_v14 = vor.u32 %v1784_v40, %v1716_v11  ;;  %v435_v26 = vrot.slane %v2124_v30, 7 }
  0x43   : > { %v2243_v47 = vunpack.c.l.b16 %v570_v44  ;;  %v1061_v6 = vand.u32 %v1673_v61, %v1059_v53  ;;  %v572_v8 = vpack.c.bf16 %v460_v57, %v460_v57  ;;  %v462_v15 = vsel %vm451_vm2, %v441_v56, %v431_v63 }
  0x44   : > { %797 = vrot.lane.b32.xlu0 %v781_v45, %s1903_s29  ;;  %793 = vrot.lane.b32.xlu2 %v779_v7, %s1903_s29  ;;  %v2241_v45 = vunpack.c.l.b16 %v569_v42  ;;  %v1182_v2 = vand.u32 %v1717_v14, %v1059_v53  ;;  %v452_v23 = vsel %vm451_vm2, %v431_v63, %v441_v56  ;;  %v472_v24 = vsel %vm429_vm3, 0.0, %v462_v15 }
  0x45   : > { %1803 = vmatpush.bf16.msra.mxu3 %v1061_v6  ;;  %1070 = vmatpush.bf16.msra.mxu0 %v1061_v6  ;;  %v445_v29 = vrot.slane %v2127_v31, 7  ;;  %v556_v34 = vpack.c.bf16 %v452_v23, %v452_v23  ;;  %v447_v35 = vrot.slane %v2116_v20, 7  ;;  %v434_v9 = vrot.slane %v2063_v46, 7 }
  0x46   : > { %v662_v5 = vpack.c.b16 %v2243_v47, %v2241_v45  ;;  %1191 = vmatpush.bf16.msra.mxu1 %v1182_v2  ;;  %v444_v48 = vrot.slane %v2071_v52, 7 }
  0x47   : > { %v466_v30 = vsel %vm451_vm2, %v445_v29, %v435_v26  ;;  %v456_v38 = vsel %vm451_vm2, %v435_v26, %v445_v29  ;;  %v436_v26 = vrot.slane %v2167_v13, 7  ;;  %v446_v29 = vrot.slane %v2178_v25, 7 }
  0x48   : > { %725 = vrot.lane.b32.xlu1 %v710_v62, %s1902_s13  ;;  %v470_v62 = vsel %vm451_vm2, %v449_v58, %v439_v55  ;;  %v564_v42 = vpack.c.bf16 %v456_v38, %v456_v38  ;;  %v465_v57 = vsel %vm451_vm2, %v444_v48, %v434_v9 }
  0x49   : > { %v488_v0 = vsel %vm429_vm3, 0.0, %v470_v62  ;;  %1804 = vmatpush.bf16.msrb.mxu3 %v1182_v2  ;;  %v455_v2 = vsel %vm451_vm2, %v434_v9, %v444_v48 }
  0x4a   : > { %v571_v7 = vpack.c.bf16 %v488_v0, %v488_v0  ;;  %v2318_v55 = vunpack.c.l.b16 %v564_v42 }
  0x4c   : > { %733 = vrot.lane.b32.xlu0 %v714_v12, %s1902_s13  ;;  %795 = vrot.lane.b32.xlu2 %v780_v17, %s1903_s29  ;;  %v2280_v43 = vunpack.c.l.b16 %v571_v7  ;;  %v2282_v12 = vunpack.c.l.b16 %v572_v8  ;;  %v442_v17 = vrot.slane %v2031_v28, 7  ;;  %v555_v28 = vpack.c.bf16 %v472_v24, %v472_v24 }
  0x4e   : > { %v663_v16 = vpack.c.b16 %v2282_v12, %v2280_v43  ;;  %v635_v39 = vunpack.c.l.b16 %v555_v28  ;;  %v562_v28 = vpack.c.bf16 %v455_v2, %v455_v2 }
  0x50   : > { %803 = vrot.lane.b32.xlu1 %v784_v22, %s1903_s29  ;;  %v432_v22 = vrot.slane %v2028_v27, 7  ;;  %v437_v27 = vrot.slane %v2113_v19, 7  ;;  %v480_v19 = vsel %vm429_vm3, 0.0, %v466_v30  ;;  %v642_v25 = vunpack.c.l.b16 %v562_v28 }
  0x51   : > { %v563_v41 = vpack.c.bf16 %v480_v19, %v480_v19 }
  0x52   : > { %v463_v33 = vsel %vm451_vm2, %v442_v17, %v432_v22  ;;  %v453_v31 = vsel %vm451_vm2, %v432_v22, %v442_v17  ;;  %v468_v49 = vsel %vm451_vm2, %v447_v35, %v437_v27  ;;  %v458_v60 = vsel %vm451_vm2, %v437_v27, %v447_v35 }
  0x53   : > { %v474_v36 = vsel %vm429_vm3, 0.0, %v463_v33  ;;  %v2316_v53 = vunpack.c.l.b16 %v563_v41  ;;  %v558_v58 = vpack.c.bf16 %v453_v31, %v453_v31  ;;  %v484_v46 = vsel %vm429_vm3, 0.0, %v468_v49 }
  0x54   : > { %v557_v62 = vpack.c.bf16 %v474_v36, %v474_v36  ;;  %v567_v0 = vpack.c.bf16 %v484_v46, %v484_v46  ;;  %v568_v6 = vpack.c.bf16 %v458_v60, %v458_v60  ;;  %v478_v17 = vsel %vm429_vm3, 0.0, %v465_v57 }
  0x55   : > { %v659_v63 = vpack.c.b16 %v2318_v55, %v2316_v53  ;;  %v638_v14 = vunpack.c.l.b16 %v558_v58  ;;  %v561_v33 = vpack.c.bf16 %v478_v17, %v478_v17 }
  0x56   : > { %v2334_v8 = vunpack.c.l.b16 %v567_v0  ;;  %v2336_v11 = vunpack.c.l.b16 %v568_v6  ;;  %v637_v40 = vunpack.c.l.b16 %v557_v62 }
  0x57   : > { %v641_v38 = vunpack.c.l.b16 %v561_v33 }
  0x7e   : > { %v2272_v10 = vpop.permute.xlu2 %717 }
  0x86   : > { %v716_v3 = vpop.permute.xlu2 %715 }
  0x8e   : > { %v720_v32 = vpop.permute.xlu0 %719  ;;  %v722_v22 = vpop.permute.xlu2 %721 }
  0x8f   : > { %v814_v4 = vsel %vm805_vm6, %v657_v37, %v720_v32  ;;  %v636_v37 = vunpack.c.l.b16 %v556_v34  ;;  %v656_v34 = vpack.c.b16 %v638_v14, %v637_v40 }
  0x91   : > { %v655_v56 = vpack.c.b16 %v636_v37, %v635_v39  ;;  %v811_v19 = vsel %vm805_vm6, %v656_v34, %v2272_v10  ;;  %v457_v39 = vsel %vm451_vm2, %v436_v26, %v446_v29  ;;  %v467_v37 = vsel %vm451_vm2, %v446_v29, %v436_v26 }
  0x92   : > { %v790_v20 = vpop.permute.xlu1 %789  ;;  %v482_v42 = vsel %vm429_vm3, 0.0, %v467_v37 }
  0x93   : > { %v842_v44 = vsel %vm836_vm7, %v814_v4, %v790_v20  ;;  %v808_v47 = vsel %vm805_vm6, %v655_v56, %v716_v3  ;;  %v565_v49 = vpack.c.bf16 %v482_v42, %v482_v42 }
  0x94   : > { %v871_v50 = vunpack.c.l.b16 %v842_v44  ;;  %v872_v51 = vunpack.c.h.b16 %v842_v44  ;;  %v566_v44 = vpack.c.bf16 %v457_v39, %v457_v39 }
  0x96   : > { %v730_v59 = vpop.permute.xlu0 %729  ;;  %v891_v61 = vpack.c.b16 %v871_v50, %v871_v50  ;;  %v892_v52 = vpack.c.b16 %v872_v51, %v872_v51  ;;  %v802_v48 = vpop.permute.xlu2 %801  ;;  %v658_v50 = vpack.c.b16 %v642_v25, %v641_v38  ;;  %v646_v58 = vunpack.c.l.b16 %v566_v44 }
  0x97   : > { %v829_v7 = vsel %vm805_vm6, %v662_v5, %v730_v59  ;;  %v661_v5 = vpack.c.b16 %v2336_v11, %v2334_v8  ;;  %v440_v38 = vrot.slane %v2171_v18, 7  ;;  %v450_v25 = vrot.slane %v2173_v21, 7 }
  0x98   : > { %932 = vst.msk [vmem:[#allocation2 + $0x10] sm:$0xf] %vm927_vm8, %v891_v61  ;;  %v645_v61 = vunpack.c.l.b16 %v565_v49  ;;  %v817_v6 = vsel %vm805_vm6, %v658_v50, %v722_v22 }
  0x99   : > { %933 = vst.msk [vmem:[#allocation2 + $0x14] sm:$0xf] %vm927_vm8, %v892_v52  ;;  %v461_v37 = vsel %vm451_vm2, %v440_v38, %v450_v25 }
  0x9a   : > { %v800_v15 = vpop.permute.xlu1 %799  ;;  %v660_v0 = vpack.c.b16 %v646_v58, %v645_v61  ;;  %v574_v42 = vpack.c.bf16 %v461_v37, %v461_v37 }
  0x9b   : > { %v852_v45 = vsel %vm836_vm7, %v829_v7, %v800_v15 }
  0x9c   : > { %v881_v23 = vunpack.c.l.b16 %v852_v45  ;;  %v882_v24 = vunpack.c.h.b16 %v852_v45  ;;  %v654_v44 = vunpack.c.l.b16 %v574_v42 }
  0x9e   : > { %v786_v32 = vpop.permute.xlu0 %785  ;;  %v901_v27 = vpack.c.b16 %v881_v23, %v881_v23  ;;  %v902_v35 = vpack.c.b16 %v882_v24, %v882_v24  ;;  %v794_v2 = vpop.permute.xlu2 %793 }
  0x9f   : > { %v838_v4 = vsel %vm836_vm7, %v808_v47, %v786_v32 }
  0xa0   : > { %v867_v30 = vunpack.c.l.b16 %v838_v4  ;;  %v868_v31 = vunpack.c.h.b16 %v838_v4  ;;  %942 = vst.msk [vmem:[#allocation2 + $0x38] sm:$0xf] %vm927_vm8, %v901_v27  ;;  %v1794_v3 = vld [vmem:[#allocation2 + $0x10] sm:$0xff] }
  0xa1   : > { %943 = vst.msk [vmem:[#allocation2 + $0x3c] sm:$0xf] %vm927_vm8, %v902_v35  ;;  %1764 = vmatmul.msk.bf16.vlgmr.msra.gmra.mxu2 %vm1031_vm9, %v1794_v3  ;;  %v1786_v39 = vld [vmem:[#allocation2 + $0x10] sm:$0xff] }
  0xa2   : > { %v887_v36 = vpack.c.b16 %v867_v30, %v867_v30  ;;  %v888_v13 = vpack.c.b16 %v868_v31, %v868_v31  ;;  %v788_v20 = vpop.permute.xlu1 %787 }
  0xa3   : > { %v840_v41 = vsel %vm836_vm7, %v811_v19, %v788_v20 }
  0xa4   : > { %928 = vst.msk [vmem:[#allocation2] sm:$0xf] %vm927_vm8, %v887_v36  ;;  %v869_v10 = vunpack.c.l.b16 %v840_v41  ;;  %v870_v9 = vunpack.c.h.b16 %v840_v41  ;;  %v471_v41 = vsel %vm451_vm2, %v450_v25, %v440_v38 }
  0xa5   : > { %929 = vst.msk [vmem:[#allocation2 + $0x4] sm:$0xf] %vm927_vm8, %v888_v13  ;;  %v490_v18 = vsel %vm429_vm3, 0.0, %v471_v41 }
  0xa6   : > { %v732_v51 = vpop.permute.xlu0 %731  ;;  %v889_v59 = vpack.c.b16 %v869_v10, %v869_v10  ;;  %v890_v60 = vpack.c.b16 %v870_v9, %v870_v9  ;;  %v796_v31 = vpop.permute.xlu2 %795  ;;  %v573_v21 = vpack.c.bf16 %v490_v18, %v490_v18 }
  0xa7   : > { %v832_v46 = vsel %vm805_vm6, %v663_v16, %v732_v51 }
  0xa8   : > { %v854_v52 = vsel %vm836_vm7, %v832_v46, %v802_v48  ;;  %930 = vst.msk [vmem:[#allocation2 + $0x8] sm:$0xf] %vm927_vm8, %v889_v59  ;;  %v1791_v62 = vld [vmem:[#allocation2 + $0x38] sm:$0xff]  ;;  %v653_v9 = vunpack.c.l.b16 %v573_v21  ;;  %v1778_v59 = vld [vmem:[#allocation2 + $0x10] sm:$0xff] }
  0xa9   : > { %v883_v56 = vunpack.c.l.b16 %v854_v52  ;;  %v884_v57 = vunpack.c.h.b16 %v854_v52  ;;  %931 = vst.msk [vmem:[#allocation2 + $0xc] sm:$0xf] %vm927_vm8, %v890_v60  ;;  %1680 = vmatmul.msk.bf16.vlgmr.msra.gmra.mxu3 %vm1031_vm9, %v1791_v62 }
  0xaa   : > { %v792_v43 = vpop.permute.xlu1 %791  ;;  %1805 = vmatpush.bf16.msra.mxu3 %v2253_v54  ;;  %v664_v50 = vpack.c.b16 %v654_v44, %v653_v9 }
  0xab   : > { %v903_v7 = vpack.c.b16 %v883_v56, %v883_v56  ;;  %v904_v40 = vpack.c.b16 %v884_v57, %v884_v57  ;;  %v844_v12 = vsel %vm836_vm7, %v817_v6, %v792_v43  ;;  %v1783_v57 = vld [vmem:[#allocation2 + $0x38] sm:$0xff] }
  0xac   : > { %v1776_v16 = vld [vmem:[#allocation2] sm:$0xff]  ;;  %v873_v14 = vunpack.c.l.b16 %v844_v12  ;;  %v874_v15 = vunpack.c.h.b16 %v844_v12 }
  0xad   : > { %944 = vst.msk [vmem:[#allocation2 + $0x40] sm:$0xf] %vm927_vm8, %v903_v7  ;;  %1718 = vmatmul.msk.bf16.vlgmr.msra.gmra.mxu1 %vm1031_vm9, %v1776_v16 }
  0xae   : > { %945 = vst.msk [vmem:[#allocation2 + $0x44] sm:$0xf] %vm927_vm8, %v904_v40  ;;  %v724_v17 = vpop.permute.xlu0 %723  ;;  %v893_v22 = vpack.c.b16 %v873_v14, %v873_v14  ;;  %v894_v45 = vpack.c.b16 %v874_v15, %v874_v15  ;;  %v1799_v14 = vld [vmem:[#allocation2 + $0x38] sm:$0xff] }
  0xaf   : > { %v820_v47 = vsel %vm805_vm6, %v659_v63, %v724_v17 }
  0xb0   : > { %v846_v23 = vsel %vm836_vm7, %v820_v47, %v794_v2  ;;  %934 = vst.msk [vmem:[#allocation2 + $0x18] sm:$0xf] %vm927_vm8, %v893_v22  ;;  %v1785_v54 = vld [vmem:[#allocation2 + $0x8] sm:$0xff] }
  0xb1   : > { %v875_v24 = vunpack.c.l.b16 %v846_v23  ;;  %v876_v26 = vunpack.c.h.b16 %v846_v23  ;;  %935 = vst.msk [vmem:[#allocation2 + $0x1c] sm:$0xf] %vm927_vm8, %v894_v45  ;;  %1674 = vmatmul.msk.bf16.vlgmr.msra.gmra.mxu0 %vm1031_vm9, %v1785_v54  ;;  %v1777_v11 = vld [vmem:[#allocation2 + $0x8] sm:$0xff]  ;;  %v2435_v54 = vld [vmem:[%s2520_s4] ss:$0 sm:$0xff] }
  0xb2   : > { %v728_v33 = vpop.permute.xlu1 %727 }
  0xb3   : > { %v895_v29 = vpack.c.b16 %v875_v24, %v875_v24  ;;  %v896_v32 = vpack.c.b16 %v876_v26, %v876_v26  ;;  %v826_v53 = vsel %vm805_vm6, %v661_v5, %v728_v33 }
  0xb5   : > { %936 = vst.msk [vmem:[#allocation2 + $0x20] sm:$0xf] %vm927_vm8, %v895_v29  ;;  %v1792_v28 = vld [vmem:[#allocation2 + $0x40] sm:$0xff] }
  0xb6   : > { %937 = vst.msk [vmem:[#allocation2 + $0x24] sm:$0xf] %vm927_vm8, %v896_v32  ;;  %v798_v55 = vpop.permute.xlu0 %797  ;;  %v1800_v40 = vld [vmem:[#allocation2 + $0x40] sm:$0xff] }
  0xb7   : > { %v850_v63 = vsel %vm836_vm7, %v826_v53, %v798_v55 }
  0xb8   : > { %v879_v34 = vunpack.c.l.b16 %v850_v63  ;;  %v880_v27 = vunpack.c.h.b16 %v850_v63  ;;  %v1795_v35 = vld [vmem:[#allocation2 + $0x18] sm:$0xff] }
  0xb9   : > { %1681 = vmatmul.msk.bf16.gmra.mxu3 %vm1031_vm9, %v1792_v28  ;;  %1765 = vmatmul.msk.bf16.gmra.mxu2 %vm1031_vm9, %v1795_v35  ;;  %v1787_v62 = vld [vmem:[#allocation2 + $0x18] sm:$0xff] }
  0xba   : > { %v899_v4 = vpack.c.b16 %v879_v34, %v879_v34  ;;  %v900_v30 = vpack.c.b16 %v880_v27, %v880_v27  ;;  %v726_v8 = vpop.permute.xlu1 %725 }
  0xbb   : > { %v823_v5 = vsel %vm805_vm6, %v660_v0, %v726_v8  ;;  %v1779_v0 = vld [vmem:[#allocation2 + $0x18] sm:$0xff] }
  0xbc   : > { %940 = vst.msk [vmem:[#allocation2 + $0x30] sm:$0xf] %vm927_vm8, %v899_v4  ;;  %v848_v3 = vsel %vm836_vm7, %v823_v5, %v796_v31 }
  0xbd   : > { %941 = vst.msk [vmem:[#allocation2 + $0x34] sm:$0xf] %vm927_vm8, %v900_v30  ;;  %1719 = vmatmul.msk.bf16.gmra.mxu1 %vm1031_vm9, %v1777_v11  ;;  %v877_v36 = vunpack.c.l.b16 %v848_v3  ;;  %v878_v13 = vunpack.c.h.b16 %v848_v3  ;;  %v1796_v49 = vld [vmem:[#allocation2 + $0x20] sm:$0xff] }
  0xbe   : > { %v734_v48 = vpop.permute.xlu0 %733  ;;  %v1788_v6 = vld [vmem:[#allocation2 + $0x20] sm:$0xff] }
  0xbf   : > { %v897_v19 = vpack.c.b16 %v877_v36, %v877_v36  ;;  %v898_v20 = vpack.c.b16 %v878_v13, %v878_v13  ;;  %v835_v51 = vsel %vm805_vm6, %v664_v50, %v734_v48  ;;  %v1780_v43 = vld [vmem:[#allocation2 + $0x20] sm:$0xff] }
  0xc1   : > { %938 = vst.msk [vmem:[#allocation2 + $0x28] sm:$0xf] %vm927_vm8, %v897_v19  ;;  %1675 = vmatmul.msk.bf16.gmra.mxu0 %vm1031_vm9, %v1786_v39 }
  0xc2   : > { %939 = vst.msk [vmem:[#allocation2 + $0x2c] sm:$0xf] %vm927_vm8, %v898_v20  ;;  %v804_v58 = vpop.permute.xlu1 %803 }
  0xc3   : > { %v856_v60 = vsel %vm836_vm7, %v835_v51, %v804_v58 }
  0xc4   : > { %v1782_v10 = vld [vmem:[#allocation2 + $0x30] sm:$0xff]  ;;  %v885_v1 = vunpack.c.l.b16 %v856_v60  ;;  %v886_v46 = vunpack.c.h.b16 %v856_v60 }
  0xc5   : > { %v1798_v7 = vld [vmem:[#allocation2 + $0x30] sm:$0xff] }
  0xc6   : > { %v905_v61 = vpack.c.b16 %v885_v1, %v885_v1  ;;  %v906_v52 = vpack.c.b16 %v886_v46, %v886_v46  ;;  %v1790_v2 = vld [vmem:[#allocation2 + $0x30] sm:$0xff] }
  0xc8   : > { %946 = vst.msk [vmem:[#allocation2 + $0x48] sm:$0xf] %vm927_vm8, %v905_v61 }
  0xc9   : > { %1724 = vmatmul.msk.bf16.vlgmr.msrb.gmra.mxu3 %vm1031_vm9, %v1782_v10  ;;  %1766 = vmatmul.msk.bf16.gmra.mxu2 %vm1031_vm9, %v1796_v49  ;;  %947 = vst.msk [vmem:[#allocation2 + $0x4c] sm:$0xf] %vm927_vm8, %v906_v52  ;;  %v1797_v56 = vld [vmem:[#allocation2 + $0x28] sm:$0xff] }
  0xca   : > { %v1789_v12 = vld [vmem:[#allocation2 + $0x28] sm:$0xff] }
  0xcb   : > { %v1781_v15 = vld [vmem:[#allocation2 + $0x28] sm:$0xff] }
  0xcd   : > { %1720 = vmatmul.msk.bf16.gmra.mxu1 %vm1031_vm9, %v1778_v59 }
  0xd0   : > { %v1801_v16 = vld [vmem:[#allocation2 + $0x48] sm:$0xff] }
  0xd1   : > { %1676 = vmatmul.msk.bf16.gmra.mxu0 %vm1031_vm9, %v1787_v62 }
  0xd9   : > { %1725 = vmatmul.msk.bf16.gmra.mxu3 %vm1031_vm9, %v1783_v57  ;;  %1767 = vmatmul.msk.bf16.gmra.mxu2 %vm1031_vm9, %v1797_v56 }
  0xdd   : > { %1721 = vmatmul.msk.bf16.gmra.mxu1 %vm1031_vm9, %v1779_v0 }
  0xe1   : > { %1677 = vmatmul.msk.bf16.gmra.mxu0 %vm1031_vm9, %v1788_v6 }
  0xe9   : > { %1768 = vmatmul.msk.bf16.gmra.mxu2 %vm1031_vm9, %v1798_v7  ;;  %1770 = vmatmul.msk.bf16.vlgmr.msra.gmra.mxu3 %vm1031_vm9, %v1800_v40 }
  0xed   : > { %1722 = vmatmul.msk.bf16.gmra.mxu1 %vm1031_vm9, %v1780_v43 }
  0xf1   : > { %1678 = vmatmul.msk.bf16.gmra.mxu0 %vm1031_vm9, %v1789_v12 }
  0xf9   : > { %1769 = vmatmul.msk.bf16.gmra.mxu2 %vm1031_vm9, %v1799_v14  ;;  %1771 = vmatmul.msk.bf16.gmra.mxu3 %vm1031_vm9, %v1801_v16 }
  0xfd   : > { %1723 = vmatmul.msk.bf16.gmra.mxu1 %vm1031_vm9, %v1781_v15 }
 0x101   : > { %1679 = vmatmul.msk.bf16.gmra.mxu0 %vm1031_vm9, %v1790_v2 }
 0x124   : > { %v1334_v22 = vpop.f32.mrf.mxu2 }
 0x12a   : > { %v1193_v17 = vpop.f32.mrf.mxu1 }
 0x12c   : > { %v2430_v45 = vpop.f32.mrf.mxu3  ;;  %v1336_v32 = vpop.f32.mrf.mxu2 }
 0x12e   : > { %v1072_v47 = vpop.f32.mrf.mxu0 }
 0x12f   : > { %v1194_v23 = vadd.f32 %v1193_v17, %v1072_v47 }
 0x131   : > { %v1374_v24 = vadd.f32 %v1334_v22, %v1194_v23 }
 0x132   : > { %v1195_v26 = vpop.f32.mrf.mxu1 }
 0x133   : > { %v1394_v29 = vadd.f32 %v2435_v54, %v1374_v24 }
 0x134   : > { %v2439_v33 = vpop.f32.mrf.mxu3 }
 0x135   : > { %v1410_v53 = vmax.f32 %v1394_v29, 0.0 }
 0x136   : > { %v1074_v55 = vpop.f32.mrf.mxu0 }
 0x137   : > { %v1426_v63 = vpack.c.bf16 %v1410_v53, %v1410_v53  ;;  %v1196_v28 = vadd.f32 %v1195_v26, %v1074_v55 }
 0x139   : > { %1443 = vst.msk [vmem:[%s2444_s10] sm:$0xf] %vm1442_vm10, %v1426_v63  ;;  %v1375_v34 = vadd.f32 %v1336_v32, %v1196_v28 }
 0x13a   : > { %v1198_v27 = vpop.f32.mrf.mxu1 }
 0x13b   : > { %v1395_v35 = vadd.f32 %v2435_v54, %v1375_v34 }
 0x13c   : > { %v2449_v4 = vpop.f32.mrf.mxu3  ;;  %v1339_v30 = vpop.f32.mrf.mxu2 }
 0x13d   : > { %v1411_v31 = vmax.f32 %v1395_v35, 0.0 }
 0x13e   : > { %v1077_v8 = vpop.f32.mrf.mxu0 }
 0x13f   : > { %v1427_v11 = vpack.c.bf16 %v1411_v31, %v1411_v31  ;;  %v1199_v5 = vadd.f32 %v1198_v27, %v1077_v8 }
 0x141   : > { %1444 = vst.msk [vmem:[%s2444_s10 + $0x4] sm:$0xf] %vm1442_vm10, %v1427_v11  ;;  %v1376_v3 = vadd.f32 %v1339_v30, %v1199_v5 }
 0x142   : > { %v1200_v36 = vpop.f32.mrf.mxu1 }
 0x143   : > { %v1396_v13 = vadd.f32 %v2435_v54, %v1376_v3 }
 0x144   : > { %v2454_v38 = vpop.f32.mrf.mxu3  ;;  %v1341_v25 = vpop.f32.mrf.mxu2 }
 0x145   : > { %v1412_v19 = vmax.f32 %v1396_v13, 0.0 }
 0x146   : > { %v1079_v20 = vpop.f32.mrf.mxu0 }
 0x147   : > { %v1428_v39 = vpack.c.bf16 %v1412_v19, %v1412_v19  ;;  %v1201_v37 = vadd.f32 %v1200_v36, %v1079_v20 }
 0x149   : > { %1445 = vst.msk [vmem:[%s2444_s10 + $0x8] sm:$0xf] %vm1442_vm10, %v1428_v39  ;;  %v1377_v41 = vadd.f32 %v1341_v25, %v1201_v37 }
 0x14a   : > { %v1203_v18 = vpop.f32.mrf.mxu1 }
 0x14b   : > { %v1397_v42 = vadd.f32 %v2435_v54, %v1377_v41 }
 0x14c   : > { %v1223_v21 = vpop.f32.mrf.mxu3  ;;  %v1344_v44 = vpop.f32.mrf.mxu2 }
 0x14d   : > { %v1413_v10 = vmax.f32 %v1397_v42, 0.0  ;;  %v1224_v32 = vadd.f32 %v1223_v21, %v2430_v45 }
 0x14e   : > { %v1082_v9 = vpop.f32.mrf.mxu0 }
 0x14f   : > { %v1429_v48 = vpack.c.bf16 %v1413_v10, %v1413_v10  ;;  %v1204_v49 = vadd.f32 %v1203_v18, %v1082_v9 }
 0x151   : > { %1446 = vst.msk [vmem:[%s2444_s10 + $0xc] sm:$0xf] %vm1442_vm10, %v1429_v48  ;;  %v1378_v50 = vadd.f32 %v1344_v44, %v1204_v49 }
 0x152   : > { %v1205_v51 = vpop.f32.mrf.mxu1 }
 0x153   : > { %v1398_v58 = vadd.f32 %v2435_v54, %v1378_v50 }
 0x154   : > { %v1225_v59 = vpop.f32.mrf.mxu3  ;;  %v1346_v60 = vpop.f32.mrf.mxu2 }
 0x155   : > { %v1414_v1 = vmax.f32 %v1398_v58, 0.0  ;;  %v1226_v45 = vadd.f32 %v1225_v59, %v2439_v33 }
 0x156   : > { %v1084_v46 = vpop.f32.mrf.mxu0 }
 0x157   : > { %v1430_v61 = vpack.c.bf16 %v1414_v1, %v1414_v1  ;;  %v1206_v52 = vadd.f32 %v1205_v51, %v1084_v46 }
 0x159   : > { %1447 = vst.msk [vmem:[%s2444_s10 + $0x10] sm:$0xf] %vm1442_vm10, %v1430_v61  ;;  %v1379_v62 = vadd.f32 %v1346_v60, %v1206_v52 }
 0x15a   : > { %v1208_v56 = vpop.f32.mrf.mxu1 }
 0x15b   : > { %v1399_v57 = vadd.f32 %v2435_v54, %v1379_v62 }
 0x15c   : > { %v1228_v0 = vpop.f32.mrf.mxu3  ;;  %v1349_v6 = vpop.f32.mrf.mxu2 }
 0x15d   : > { %v1415_v7 = vmax.f32 %v1399_v57, 0.0  ;;  %v1229_v21 = vadd.f32 %v1228_v0, %v2449_v4 }
 0x15e   : > { %v1087_v40 = vpop.f32.mrf.mxu0 }
 0x15f   : > { %v1431_v43 = vpack.c.bf16 %v1415_v7, %v1415_v7  ;;  %v1209_v12 = vadd.f32 %v1208_v56, %v1087_v40 }
 0x161   : > { %1448 = vst.msk [vmem:[%s2444_s10 + $0x14] sm:$0xf] %vm1442_vm10, %v1431_v43  ;;  %v1380_v16 = vadd.f32 %v1349_v6, %v1209_v12 }
 0x162   : > { %v1210_v14 = vpop.f32.mrf.mxu1 }
 0x163   : > { %v1400_v15 = vadd.f32 %v2435_v54, %v1380_v16 }
 0x164   : > { %v1230_v2 = vpop.f32.mrf.mxu3  ;;  %v1351_v17 = vpop.f32.mrf.mxu2 }
 0x165   : > { %v1416_v22 = vmax.f32 %v1400_v15, 0.0  ;;  %v1231_v61 = vadd.f32 %v1230_v2, %v2454_v38 }
 0x166   : > { %v1089_v47 = vpop.f32.mrf.mxu0 }
 0x167   : > { %v1432_v23 = vpack.c.bf16 %v1416_v22, %v1416_v22  ;;  %v1211_v24 = vadd.f32 %v1210_v14, %v1089_v47 }
 0x169   : > { %1449 = vst.msk [vmem:[%s2444_s10 + $0x18] sm:$0xf] %vm1442_vm10, %v1432_v23  ;;  %v1381_v26 = vadd.f32 %v1351_v17, %v1211_v24 }
 0x16a   : > { %v1213_v29 = vpop.f32.mrf.mxu1 }
 0x16b   : > { %v1401_v53 = vadd.f32 %v2435_v54, %v1381_v26 }
 0x16c   : > { %v1354_v55 = vpop.f32.mrf.mxu2  ;;  %v1364_v63 = vpop.f32.mrf.mxu3 }
 0x16d   : > { %v1417_v28 = vmax.f32 %v1401_v53, 0.0  ;;  %v1386_v34 = vadd.f32 %v1364_v63, %v1224_v32 }
 0x16e   : > { %v1092_v27 = vpop.f32.mrf.mxu0 }
 0x16f   : > { %v1433_v35 = vpack.c.bf16 %v1417_v28, %v1417_v28  ;;  %v1406_v30 = vadd.f32 %v2435_v54, %v1386_v34  ;;  %v1214_v31 = vadd.f32 %v1213_v29, %v1092_v27 }
 0x171   : > { %1450 = vst.msk [vmem:[%s2444_s10 + $0x1c] sm:$0xf] %vm1442_vm10, %v1433_v35  ;;  %v1422_v8 = vmax.f32 %v1406_v30, 0.0  ;;  %v1382_v11 = vadd.f32 %v1354_v55, %v1214_v31 }
 0x172   : > { %v1215_v5 = vpop.f32.mrf.mxu1 }
 0x173   : > { %v1438_v3 = vpack.c.bf16 %v1422_v8, %v1422_v8  ;;  %v1402_v36 = vadd.f32 %v2435_v54, %v1382_v11 }
 0x174   : > { %v1356_v13 = vpop.f32.mrf.mxu2  ;;  %v1366_v25 = vpop.f32.mrf.mxu3 }
 0x175   : > { %1455 = vst.msk [vmem:[%s2444_s10 + $0x30] sm:$0xf] %vm1442_vm10, %v1438_v3  ;;  %v1418_v19 = vmax.f32 %v1402_v36, 0.0  ;;  %v1387_v20 = vadd.f32 %v1366_v25, %v1226_v45 }
 0x176   : > { %v1094_v39 = vpop.f32.mrf.mxu0 }
 0x177   : > { %v1434_v37 = vpack.c.bf16 %v1418_v19, %v1418_v19  ;;  %v1407_v41 = vadd.f32 %v2435_v54, %v1387_v20  ;;  %v1216_v18 = vadd.f32 %v1215_v5, %v1094_v39 }
 0x179   : > { %1451 = vst.msk [vmem:[%s2444_s10 + $0x20] sm:$0xf] %vm1442_vm10, %v1434_v37  ;;  %v1423_v42 = vmax.f32 %v1407_v41, 0.0  ;;  %v1383_v33 = vadd.f32 %v1356_v13, %v1216_v18 }
 0x17a   : > { %v1218_v9 = vpop.f32.mrf.mxu1 }
 0x17b   : > { %v1439_v44 = vpack.c.bf16 %v1423_v42, %v1423_v42  ;;  %v1403_v10 = vadd.f32 %v2435_v54, %v1383_v33 }
 0x17c   : > { %v1369_v48 = vpop.f32.mrf.mxu3  ;;  %v1359_v51 = vpop.f32.mrf.mxu2 }
 0x17d   : > { %1456 = vst.msk [vmem:[%s2444_s10 + $0x34] sm:$0xf] %vm1442_vm10, %v1439_v44  ;;  %v1419_v49 = vmax.f32 %v1403_v10, 0.0  ;;  %v1388_v50 = vadd.f32 %v1369_v48, %v1229_v21 }
 0x17e   : > { %v1097_v58 = vpop.f32.mrf.mxu0 }
 0x17f   : > { %v1435_v59 = vpack.c.bf16 %v1419_v49, %v1419_v49  ;;  %v1408_v60 = vadd.f32 %v2435_v54, %v1388_v50  ;;  %v1219_v1 = vadd.f32 %v1218_v9, %v1097_v58 }
 0x181   : > { %1452 = vst.msk [vmem:[%s2444_s10 + $0x24] sm:$0xf] %vm1442_vm10, %v1435_v59  ;;  %v1424_v4 = vmax.f32 %v1408_v60, 0.0  ;;  %v1384_v46 = vadd.f32 %v1359_v51, %v1219_v1 }
 0x182   : > { %v1220_v6 = vpop.f32.mrf.mxu1 }
 0x183   : > { %v1440_v52 = vpack.c.bf16 %v1424_v4, %v1424_v4  ;;  %v1404_v62 = vadd.f32 %v2435_v54, %v1384_v46 }
 0x184   : > { %v1371_v56 = vpop.f32.mrf.mxu3  ;;  %v1361_v16 = vpop.f32.mrf.mxu2 }
 0x185   : > { %1457 = vst.msk [vmem:[%s2444_s10 + $0x38] sm:$0xf] %vm1442_vm10, %v1440_v52  ;;  %v1420_v57 = vmax.f32 %v1404_v62, 0.0  ;;  %v1389_v0 = vadd.f32 %v1371_v56, %v1231_v61 }
 0x186   : > { %v1099_v7 = vpop.f32.mrf.mxu0 }
 0x187   : > { %v1436_v40 = vpack.c.bf16 %v1420_v57, %v1420_v57  ;;  %v1409_v43 = vadd.f32 %v2435_v54, %v1389_v0  ;;  %v1221_v12 = vadd.f32 %v1220_v6, %v1099_v7 }
 0x189   : > { %1453 = vst.msk [vmem:[%s2444_s10 + $0x28] sm:$0xf] %vm1442_vm10, %v1436_v40  ;;  %v1425_v38 = vmax.f32 %v1409_v43, 0.0  ;;  %v1385_v14 = vadd.f32 %v1361_v16, %v1221_v12 }
 0x18b   : > { %v1441_v15 = vpack.c.bf16 %v1425_v38, %v1425_v38  ;;  %v1405_v2 = vadd.f32 %v2435_v54, %v1385_v14 }
 0x18d   : > { %1458 = vst.msk [vmem:[%s2444_s10 + $0x3c] sm:$0xf] %vm1442_vm10, %v1441_v15  ;;  %v1421_v17 = vmax.f32 %v1405_v2, 0.0 }
 0x18f   : > { %v1437_v22 = vpack.c.bf16 %v1421_v17, %v1421_v17 }
 0x191   : > { %1454 = vst.msk [vmem:[%s2444_s10 + $0x2c] sm:$0xf] %vm1442_vm10, %v1437_v22 }
 0x192 PF: > { %s15_s22 = sadd.s32 1, %s1900_s22   ;;  %s2523_s18 = smov %s1892_s20 }
 0x193   : > { %p12_p12 = scmp.ge.s32.totalorder %s15_s22, 6   ;;  %s2524_s19 = smov %s1896_s21 }
 0x194   : > { %s2525_s20 = smov %s2528_s23  ;;  %s2526_s21 = smov %s2532_s24 }
 0x195   :  { %14 = sbr.rel (!%p12_p12) target bundleno = 3 (0x3), region = 80 }

// kernel: dncnn_forward.6
= control target key start
LH: loop header
LB: loop body
LE: loop exit
PB: predicated region body
PF: predicated region fallthrough
CT: control target
= control target key end

     0   :  { %s2487_s24 = smov 0   ;;  %s2489_s25 = smov 0   ;;  %s3254_s0 = inlined_call_operand.vmem [shape: bf16[2,16,16,32], index: 0, kind: input, shape index: {}, may-alias: {0,1,2}]   ;;  %s3255_s1 = inlined_call_operand.vmem [shape: bf16[2,16,16,32], index: 1, kind: input, shape index: {}, may-alias: {0,1,2}]   ;;  %s3256_s2 = inlined_call_operand.vmem [shape: bf16[2,16,16,32], index: 2, kind: input, shape index: {}, may-alias: {0,1,2}]   ;;  %s3257_s3 = inlined_call_operand.vmem [shape: bf16[3,96,32], index: 3, kind: input, shape index: {}]   ;;  %s3258_s4 = inlined_call_operand.vmem [shape: f32[1,32], index: 4, kind: input, shape index: {}]   ;;  %s3259_s5 = inlined_call_operand.vmem [shape: bf16[2,16,16,32], index: 5, kind: output, shape index: {0}]   ;;  %s3260_s6 = inlined_call_operand.vmem [shape: f32[2,2,1,32], index: 6, kind: output, shape index: {1}]   ;;  %s3261_s7 = inlined_call_operand.vmem [shape: f32[2,2,1,32], index: 7, kind: output, shape index: {2}]  }
   0x1   :  { %s2491_s26 = smov 0   ;;  %s2493_s27 = smov 0  }
   0x2   :  { %s2495_s28 = smov 0  }
   0x3 LB: > { %s27_s29 = sadd.s32 1, %s2435_s26  ;;  %s30_s30 = sadd.s32 1, %s2439_s27  ;;  %s2443_s28 = sphi %s2495_s28, %s18_s28   ;;  %s2439_s27 = sphi %s2493_s27, %s3268_s27   ;;  %s2435_s26 = sphi %s2491_s26, %s3267_s26   ;;  %s2431_s25 = sphi %s2489_s25, %s3266_s25   ;;  %s2427_s24 = sphi %s2487_s24, %s3265_s24  }
   0x4   : > { %p28_p0 = scmp.ge.s32.totalorder %s27_s29, 2  ;;  %p2007_p1 = scmp.ge.s32.totalorder %s2443_s28, 1 }
   0x5   : > { %p332_p2 = scmp.lt.s32.totalorder %s2443_s28, 5 }
   0x6   : > { %s3270_s29 = smov (%p28_p0, %s27_s29), 0  ;;  %s3272_s30 = smov (!%p28_p0, %s30_s30), %s2439_s27 }
   0x7   : > { %p333_p3 = pnand %p2007_p1, %p332_p2  ;;  %p32_p4 = scmp.ge.s32.totalorder %s3272_s30, 2 }
   0x8   : > { %s2520_s8 = sshll.u32 (!%p333_p3), %s2427_s24, 3  ;;  %p415_p5 = scmp.lt.s32.totalorder (!%p333_p3), %s2431_s25, 1 }
   0x9   : > { %s3274_s30 = smov (%p32_p4, %s3272_s30), 0  ;;  %336 = sbr.rel (%p333_p3) target bundleno = 465 (0x1d1), region = 40 }
   0xa   : > { %p417_p6 = scmp.lt.s32.totalorder (!%p333_p3), %s2520_s8, 15  ;;  %s2013_s12 = sadd.s32 (!%p333_p3), 4294967295, %s2520_s8 }
   0xb   : > { %p427_p7 = scmp.gt.s32.totalorder (!%p333_p3), %s2013_s12, 0  ;;  %p2014_p8 = scmp.lt.s32.totalorder (!%p333_p3), %s2013_s12, 15 }
   0xc   : > { %p517_p9 = scmp.gt.s32.totalorder (!%p333_p3), %s2427_s24, 0  ;;  %p472_p10 = scmp.lt.s32.totalorder (!%p333_p3), %s2427_s24, 1 }
   0xd   : > { %s2445_s15 = smov (!%p333_p3), 32  }
   0xe   : > { %v537_v0 = vlaneseq  ;;  %s3276_s25 = smov (!%p415_p5, %s2431_s25), 1  ;;  %s3278_s12 = smov (!%p427_p7, %s2013_s12), 0  ;;  %vm916_vm6 = vcmask 261120   ;;  %vm947_vm7 = vcmask 523264   ;;  %vm1038_vm8 = vcmask 781312  }
   0xf   : > { %s418_s9 = scalar_select %p417_p6, %s2520_s8, 15  ;;  %vm1193_vm9 = vcmask 785408   ;;  %vm1757_vm10 = vcmask 257024   ;;  %vm1685_vm11 = vcmask 253952  }
  0x10   : > { %s2527_s10 = sshll.u32 %s3276_s25, 5  ;;  %v2529_v1 = vshrl.u32 %v537_v0, 7  ;;  %s3280_s12 = smov (!%p2014_p8, %s3278_s12), 15 }
  0x11   : > { %s2009_s11 = sshll.u32 %s418_s9, 1  ;;  %s2019_s19 = sshll.u32 %s3280_s12, 1 }
  0x12   : > { %s2533_s13 = sadd.s32 %s2527_s10, %s2009_s11  ;;  %v2544_v2 = vadd.s32 8, %v2529_v1  ;;  %vm625_vm1 = vcmp.lt.s32.totalorder %v2529_v1, 7  ;;  %s435_s20 = sadd.s32 %s2019_s19, %s2527_s10  ;;  %vm562_vm4 = vcmp.lt.s32.totalorder %v2529_v1, 1  ;;  %vm540_vm5 = vcmp.eq.s32.totalorder %v2529_v1, 0 }
  0x13   : > { %s2011_s14 = sshll.u32 %s2533_s13, 2  ;;  %s2021_s21 = sshll.u32 %s435_s20, 2 }
  0x14   : > { %s2541_s17 = scalar_lea.vmem %s3254_s0, %s2011_s14  ;;  %vm604_vm0 = vcmp.eq.s32.totalorder %v2544_v2, 15  ;;  %s437_s9 = scalar_lea.vmem %s3255_s1, %s2021_s21 }
  0x15   : > { %v2337_v3 = vld [vmem:[%s2541_s17 + $0x8] sm:$0xff]   ;;  %v2298_v4 = vld [vmem:[%s2541_s17] sm:$0xff]   ;;  %v2342_v9 = vld [vmem:[%s2541_s17 + $0x30] sm:$0xff]   ;;  %s522_s18 = scalar_select %p517_p9, 1, 0 }
  0x16   : > { %v2548_v5 = vunpack.c.l.bf16 %v2337_v3  ;;  %v2550_v6 = vunpack.c.h.bf16 %v2337_v3  ;;  %v2552_v7 = vunpack.c.l.bf16 %v2298_v4  ;;  %v2554_v8 = vunpack.c.h.bf16 %v2298_v4  ;;  %v2338_v24 = vld [vmem:[%s2541_s17 + $0x10] sm:$0xff]   ;;  %v2330_v32 = vld [vmem:[%s437_s9] sm:$0xff]   ;;  %s443_s11 = sadd.s32 8, %s2520_s8  ;;  %s2033_s12 = sshll.u32 %s3276_s25, 1  ;;  %v2343_v61 = vld [vmem:[%s2541_s17 + $0x38] sm:$0xff]  }
  0x17   : > { %v2568_v14 = vunpack.c.l.bf16 %v2342_v9  ;;  %v2570_v15 = vunpack.c.h.bf16 %v2342_v9  ;;  %v523_v22 = vstv %s522_s18  ;;  %v2331_v35 = vunpack.c.l.bf16 %v2330_v32  ;;  %s473_s16 = scalar_select %p472_p10, %s2427_s24, 1 }
  0x18   : > { %v690_v10 = vpack.c.bf16 %v2548_v5, %v2548_v5  ;;  %v691_v11 = vpack.c.bf16 %v2550_v6, %v2550_v6  ;;  %v688_v12 = vpack.c.bf16 %v2552_v7, %v2552_v7  ;;  %v689_v13 = vpack.c.bf16 %v2554_v8, %v2554_v8  ;;  %p2617_p11 = scmp.lt.s32.totalorder %s443_s11, 15  ;;  %s2446_s19 = smov 64  }
  0x19   : > { %v607_v18 = vrot.slane %v2548_v5, 1  ;;  %v617_v19 = vrot.slane %v2550_v6, 1  ;;  %v700_v23 = vpack.c.bf16 %v2568_v14, %v2568_v14  ;;  %vm2585_vm2 = vcmp.eq.s32.totalorder %v523_v22, 1  ;;  %s2621_s18 = sadd.s32 %s2033_s12, %s473_s16 }
  0x1a   : > { %v800_v16 = vunpack.c.l.b16 %v690_v10  ;;  %v801_v17 = vunpack.c.l.b16 %v691_v11  ;;  %v798_v20 = vunpack.c.l.b16 %v688_v12  ;;  %v799_v21 = vunpack.c.l.b16 %v689_v13  ;;  %s3282_s11 = smov (!%p2617_p11, %s443_s11), 15  ;;  %s476_s21 = scalar_lea.vmem %s3260_s6, %s2621_s18 }
  0x1b   : > { %v628_v26 = vsel %vm625_vm1, %v607_v18, %v617_v19  ;;  %v638_v27 = vsel %vm625_vm1, %v617_v19, %v607_v18  ;;  %v701_v33 = vpack.c.bf16 %v2570_v15, %v2570_v15  ;;  %v2332_v36 = vunpack.c.h.bf16 %v2330_v32  ;;  %s3284_s11 = smov (!%p2617_p11, %s3282_s11), 15 }
  0x1c   : > { %v818_v25 = vpack.c.b16 %v801_v17, %v800_v16  ;;  %v817_v29 = vpack.c.b16 %v799_v21, %v798_v20  ;;  %v651_v30 = vsel %vm604_vm0, 0.0, %v638_v27  ;;  %v710_v31 = vpack.c.bf16 %v628_v26, %v628_v26  ;;  %v2339_v26 = vld [vmem:[%s2541_s17 + $0x18] sm:$0xff]   ;;  %s2026_s8 = sshll.u32 %s3284_s11, 1 }
  0x1d   : > { %v711_v34 = vpack.c.bf16 %v651_v30, %v651_v30  ;;  %v2597_v37 = vunpack.c.l.bf16 %v2338_v24  ;;  %v612_v39 = vrot.slane %v2568_v14, 1  ;;  %v622_v40 = vrot.slane %v2570_v15, 1  ;;  %s452_s20 = sadd.s32 %s2026_s8, %s2527_s10 }
  0x1e   : > { %830 = vrot.lane.b32.xlu0 %v818_v25, %s2445_s15  ;;  %828 = vrot.lane.b32.xlu1 %v817_v29, %s2445_s15  ;;  %v870_v38 = vunpack.c.l.b16 %v710_v31  ;;  %v2607_v42 = vsel %vm2585_vm2, %v2331_v35, 0.0  ;;  %v2611_v43 = vsel %vm2585_vm2, %v2332_v36, 0.0  ;;  %v2613_v44 = vunpack.c.h.bf16 %v2338_v24  ;;  %s2028_s10 = sshll.u32 %s452_s20, 2 }
  0x1f   : > { %v871_v41 = vunpack.c.l.b16 %v711_v34  ;;  %v686_v45 = vpack.c.bf16 %v2607_v42, %v2607_v42  ;;  %v687_v46 = vpack.c.bf16 %v2611_v43, %v2611_v43  ;;  %v810_v47 = vunpack.c.l.b16 %v700_v23  ;;  %s454_s23 = scalar_lea.vmem %s3256_s2, %s2028_s10  ;;  %s3039_s10 = scalar_lea.vmem %s3259_s5, %s2011_s14 }
  0x20   : > { %v811_v48 = vunpack.c.l.b16 %v701_v33  ;;  %v605_v50 = vrot.slane %v2607_v42, 1  ;;  %v615_v51 = vrot.slane %v2611_v43, 1  ;;  %v608_v52 = vrot.slane %v2597_v37, 1 }
  0x21   : > { %v888_v49 = vpack.c.b16 %v871_v41, %v870_v38  ;;  %v796_v53 = vunpack.c.l.b16 %v686_v45  ;;  %v797_v54 = vunpack.c.l.b16 %v687_v46  ;;  %v633_v55 = vsel %vm625_vm1, %v612_v39, %v622_v40  ;;  %v2341_v45 = vld [vmem:[%s2541_s17 + $0x28] sm:$0xff]  }
  0x22   : > { %v643_v56 = vsel %vm625_vm1, %v622_v40, %v612_v39  ;;  %v626_v57 = vsel %vm625_vm1, %v605_v50, %v615_v51  ;;  %v636_v58 = vsel %vm625_vm1, %v615_v51, %v605_v50  ;;  %v720_v60 = vpack.c.bf16 %v633_v55, %v633_v55 }
  0x23   : > { %v661_v59 = vsel %vm604_vm0, 0.0, %v643_v56  ;;  %v816_v62 = vpack.c.b16 %v797_v54, %v796_v53  ;;  %v647_v63 = vsel %vm604_vm0, 0.0, %v636_v58  ;;  %v706_v0 = vpack.c.bf16 %v626_v57, %v626_v57 }
  0x24   : > { %v721_v3 = vpack.c.bf16 %v661_v59, %v661_v59  ;;  %v707_v4 = vpack.c.bf16 %v647_v63, %v647_v63  ;;  %v880_v9 = vunpack.c.l.b16 %v720_v60  ;;  %v618_v10 = vrot.slane %v2613_v44, 1 }
  0x25   : > { %v606_v11 = vrot.slane %v2552_v7, 1  ;;  %v866_v12 = vunpack.c.l.b16 %v706_v0  ;;  %v616_v16 = vrot.slane %v2554_v8, 1  ;;  %v2654_v17 = vunpack.c.l.bf16 %v2343_v61 }
  0x26   : > { %900 = vrot.lane.b32.xlu0 %v888_v49, %s2446_s19  ;;  %826 = vrot.lane.b32.xlu1 %v816_v62, %s2445_s15  ;;  %v881_v13 = vunpack.c.l.b16 %v721_v3  ;;  %v867_v18 = vunpack.c.l.b16 %v707_v4  ;;  %v629_v19 = vsel %vm625_vm1, %v608_v52, %v618_v10  ;;  %v639_v20 = vsel %vm625_vm1, %v618_v10, %v608_v52  ;;  %v2340_v4 = vld [vmem:[%s2541_s17 + $0x20] sm:$0xff]   ;;  %s532_s17 = scalar_select %p472_p10, 1, 0 }
  0x27   : > { %v2660_v21 = vunpack.c.h.bf16 %v2343_v61  ;;  %v823_v22 = vpack.c.b16 %v811_v48, %v810_v47  ;;  %v653_v23 = vsel %vm604_vm0, 0.0, %v639_v20  ;;  %v712_v24 = vpack.c.bf16 %v629_v19, %v629_v19 }
  0x28   : > { %v627_v25 = vsel %vm625_vm1, %v606_v11, %v616_v16  ;;  %v886_v27 = vpack.c.b16 %v867_v18, %v866_v12  ;;  %v713_v28 = vpack.c.bf16 %v653_v23, %v653_v23  ;;  %v637_v29 = vsel %vm625_vm1, %v616_v16, %v606_v11 }
  0x29   : > { %v708_v30 = vpack.c.bf16 %v627_v25, %v627_v25  ;;  %v893_v31 = vpack.c.b16 %v881_v13, %v880_v9  ;;  %v649_v32 = vsel %vm604_vm0, 0.0, %v637_v29  ;;  %v702_v33 = vpack.c.bf16 %v2654_v17, %v2654_v17 }
  0x2a   : > { %v703_v34 = vpack.c.bf16 %v2660_v21, %v2660_v21  ;;  %896 = vrot.lane.b32.xlu2 %v886_v27, %s2446_s19  ;;  %v709_v35 = vpack.c.bf16 %v649_v32, %v649_v32  ;;  %v2679_v38 = vunpack.c.l.bf16 %v2339_v26  ;;  %v872_v39 = vunpack.c.l.b16 %v712_v24 }
  0x2b   : > { %v868_v36 = vunpack.c.l.b16 %v708_v30  ;;  %v873_v40 = vunpack.c.l.b16 %v713_v28  ;;  %v2681_v41 = vunpack.c.h.bf16 %v2339_v26  ;;  %v812_v48 = vunpack.c.l.b16 %v702_v33  ;;  %v2334_v30 = vld [vmem:[%s454_s23] sm:$0xff]  }
  0x2c   : > { %v869_v46 = vunpack.c.l.b16 %v709_v35  ;;  %v609_v47 = vrot.slane %v2679_v38, 1  ;;  %v813_v49 = vunpack.c.l.b16 %v703_v34  ;;  %v692_v52 = vpack.c.bf16 %v2597_v37, %v2597_v37 }
  0x2d   : > { %v619_v50 = vrot.slane %v2681_v41, 1  ;;  %v693_v53 = vpack.c.bf16 %v2613_v44, %v2613_v44  ;;  %v2693_v54 = vunpack.c.l.bf16 %v2341_v45  ;;  %v889_v55 = vpack.c.b16 %v873_v40, %v872_v39 }
  0x2e   : > { %840 = vrot.lane.b32.xlu0 %v823_v22, %s2445_s15  ;;  %910 = vrot.lane.b32.xlu1 %v893_v31, %s2446_s19  ;;  %v887_v51 = vpack.c.b16 %v869_v46, %v868_v36  ;;  %v694_v56 = vpack.c.bf16 %v2679_v38, %v2679_v38  ;;  %v695_v59 = vpack.c.bf16 %v2681_v41, %v2681_v41  ;;  %v2705_v61 = vunpack.c.h.bf16 %v2341_v45 }
  0x2f   : > { %v630_v57 = vsel %vm625_vm1, %v609_v47, %v619_v50  ;;  %v640_v58 = vsel %vm625_vm1, %v619_v50, %v609_v47  ;;  %v611_v62 = vrot.slane %v2693_v54, 1  ;;  %v824_v63 = vpack.c.b16 %v813_v49, %v812_v48 }
  0x30   : > { %v655_v60 = vsel %vm604_vm0, 0.0, %v640_v58  ;;  %v714_v0 = vpack.c.bf16 %v630_v57, %v630_v57  ;;  %v802_v9 = vunpack.c.l.b16 %v692_v52  ;;  %v803_v10 = vunpack.c.l.b16 %v693_v53 }
  0x31   : > { %v715_v3 = vpack.c.bf16 %v655_v60, %v655_v60  ;;  %v621_v11 = vrot.slane %v2705_v61, 1  ;;  %v613_v12 = vrot.slane %v2654_v17, 1  ;;  %v804_v13 = vunpack.c.l.b16 %v694_v56 }
  0x32   : > { %898 = vrot.lane.b32.xlu2 %v887_v51, %s2446_s19  ;;  %v623_v16 = vrot.slane %v2660_v21, 1  ;;  %v805_v18 = vunpack.c.l.b16 %v695_v59  ;;  %v2721_v22 = vunpack.c.l.bf16 %v2340_v4  ;;  %v874_v23 = vunpack.c.l.b16 %v714_v0 }
  0x33   : > { %v632_v19 = vsel %vm625_vm1, %v611_v62, %v621_v11  ;;  %v642_v20 = vsel %vm625_vm1, %v621_v11, %v611_v62  ;;  %v875_v24 = vunpack.c.l.b16 %v715_v3  ;;  %v2726_v26 = vunpack.c.h.bf16 %v2340_v4 }
  0x34   : > { %v659_v25 = vsel %vm604_vm0, 0.0, %v642_v20  ;;  %v819_v27 = vpack.c.b16 %v803_v10, %v802_v9  ;;  %v634_v28 = vsel %vm625_vm1, %v613_v12, %v623_v16  ;;  %v644_v29 = vsel %vm625_vm1, %v623_v16, %v613_v12 }
  0x35   : > { %v718_v31 = vpack.c.bf16 %v632_v19, %v632_v19  ;;  %v663_v32 = vsel %vm604_vm0, 0.0, %v644_v29  ;;  %v722_v33 = vpack.c.bf16 %v634_v28, %v634_v28  ;;  %v820_v34 = vpack.c.b16 %v805_v18, %v804_v13 }
  0x36   : > { %902 = vrot.lane.b32.xlu0 %v889_v55, %s2446_s19  ;;  %842 = vrot.lane.b32.xlu1 %v824_v63, %s2445_s15  ;;  %v719_v35 = vpack.c.bf16 %v659_v25, %v659_v25  ;;  %v723_v36 = vpack.c.bf16 %v663_v32, %v663_v32  ;;  %v890_v39 = vpack.c.b16 %v875_v24, %v874_v23  ;;  %v2335_v46 = vunpack.c.l.bf16 %v2334_v30 }
  0x37   : > { %v696_v40 = vpack.c.bf16 %v2721_v22, %v2721_v22  ;;  %v697_v45 = vpack.c.bf16 %v2726_v26, %v2726_v26  ;;  %v882_v47 = vunpack.c.l.b16 %v722_v33  ;;  %v2336_v49 = vunpack.c.h.bf16 %v2334_v30 }
  0x38   : > { %v883_v48 = vunpack.c.l.b16 %v723_v36  ;;  %v878_v50 = vunpack.c.l.b16 %v718_v31  ;;  %v533_v51 = vstv %s532_s17  ;;  %v879_v52 = vunpack.c.l.b16 %v719_v35  ;;  %s483_s17 = scalar_lea.vmem %s3261_s7, %s2621_s18 }
  0x39   : > { %v610_v53 = vrot.slane %v2721_v22, 1  ;;  %v620_v55 = vrot.slane %v2726_v26, 1  ;;  %vm534_vm3 = vcmp.eq.s32.totalorder %v533_v51, 1  ;;  %v806_v56 = vunpack.c.l.b16 %v696_v40 }
  0x3a   : > { %832 = vrot.lane.b32.xlu2 %v819_v27, %s2445_s15  ;;  %v807_v57 = vunpack.c.l.b16 %v697_v45  ;;  %v2745_v58 = vsel %vm534_vm3, %v2335_v46, 0.0  ;;  %v2747_v59 = vsel %vm534_vm3, %v2336_v49, 0.0  ;;  %v894_v60 = vpack.c.b16 %v883_v48, %v882_v47  ;;  %v2282_v49 = vld [vmem:[%s3257_s3 + $0x58] sm:$0xff] }
  0x3b   : > { %v698_v62 = vpack.c.bf16 %v2693_v54, %v2693_v54  ;;  %v699_v63 = vpack.c.bf16 %v2705_v61, %v2705_v61  ;;  %v614_v0 = vrot.slane %v2745_v58, 1  ;;  %v624_v3 = vrot.slane %v2747_v59, 1  ;;  %1220 = vmatpush.bf16.msra.mxu0 %v2282_v49  ;;  %2344 = vmatpush.bf16.msra.mxu3 %v2282_v49 }
  0x3c   : > { %v892_v4 = vpack.c.b16 %v879_v52, %v878_v50  ;;  %v641_v9 = vsel %vm625_vm1, %v620_v55, %v610_v53  ;;  %v704_v10 = vpack.c.bf16 %v2745_v58, %v2745_v58  ;;  %v705_v11 = vpack.c.bf16 %v2747_v59, %v2747_v59  ;;  %v2281_v50 = vld [vmem:[%s3257_s3 + $0x50] sm:$0xff] }
  0x3d   : > { %v821_v12 = vpack.c.b16 %v807_v57, %v806_v56  ;;  %v635_v13 = vsel %vm625_vm1, %v614_v0, %v624_v3  ;;  %v808_v16 = vunpack.c.l.b16 %v698_v62  ;;  %v809_v18 = vunpack.c.l.b16 %v699_v63 }
  0x3e   : > { %834 = vrot.lane.b32.xlu0 %v820_v34, %s2445_s15  ;;  %904 = vrot.lane.b32.xlu1 %v890_v39, %s2446_s19  ;;  %v645_v19 = vsel %vm625_vm1, %v624_v3, %v614_v0  ;;  %v724_v20 = vpack.c.bf16 %v635_v13, %v635_v13  ;;  %v631_v23 = vsel %vm625_vm1, %v610_v53, %v620_v55  ;;  %v657_v24 = vsel %vm604_vm0, 0.0, %v641_v9  ;;  %v2815_v9 = vld [vmem:[%s3257_s3 + $0x88] sm:$0xff]  ;;  %v2833_v13 = vld [vmem:[%s3257_s3 + $0x80] sm:$0xff] }
  0x3f   : > { %v665_v25 = vsel %vm604_vm0, 0.0, %v645_v19  ;;  %v814_v27 = vunpack.c.l.b16 %v704_v10  ;;  %v815_v28 = vunpack.c.l.b16 %v705_v11  ;;  %v822_v31 = vpack.c.b16 %v809_v18, %v808_v16  ;;  %1221 = vmatpush.bf16.msra.mxu0 %v2281_v50  ;;  %2345 = vmatpush.bf16.msra.mxu3 %v2281_v50  ;;  %v2279_v19 = vld [vmem:[%s3257_s3 + $0x40] sm:$0xff] }
  0x40   : > { %v725_v29 = vpack.c.bf16 %v665_v25, %v665_v25  ;;  %v884_v30 = vunpack.c.l.b16 %v724_v20  ;;  %v716_v32 = vpack.c.bf16 %v631_v23, %v631_v23  ;;  %v717_v33 = vpack.c.bf16 %v657_v24, %v657_v24  ;;  %1548 = vmatpush.bf16.msra.mxu2 %v2815_v9  ;;  %v2267_v20 = vld [vmem:[%s3257_s3 + $0x20] sm:$0xff] }
  0x41   : > { %v825_v35 = vpack.c.b16 %v815_v28, %v814_v27  ;;  %v554_v45 = vrot.slane %v2550_v6, 7  ;;  %v544_v46 = vrot.slane %v2548_v5, 7  ;;  %v553_v47 = vrot.slane %v2554_v8, 7  ;;  %v2853_v28 = vld [vmem:[%s3257_s3 + $0x78] sm:$0xff] }
  0x42   : > { %912 = vrot.lane.b32.xlu2 %v894_v60, %s2446_s19  ;;  %v885_v34 = vunpack.c.l.b16 %v725_v29  ;;  %v876_v39 = vunpack.c.l.b16 %v716_v32  ;;  %v877_v40 = vunpack.c.l.b16 %v717_v33  ;;  %v543_v48 = vrot.slane %v2552_v7, 7  ;;  %v2867_v32 = vld [vmem:[%s3257_s3 + $0x70] sm:$0xff] }
  0x43   : > { %v575_v5 = vsel %vm562_vm4, %v554_v45, %v544_v46  ;;  %v565_v7 = vsel %vm562_vm4, %v544_v46, %v554_v45  ;;  %v542_v3 = vrot.slane %v2607_v42, 7  ;;  %v2268_v42 = vld [vmem:[%s3257_s3 + $0x28] sm:$0xff]  ;;  %v2277_v33 = vld [vmem:[%s3257_s3 + $0x30] sm:$0xff]  ;;  %v549_v45 = vrot.slane %v2568_v14, 7 }
  0x44   : > { %v895_v36 = vpack.c.b16 %v885_v34, %v884_v30  ;;  %v891_v2 = vpack.c.b16 %v877_v40, %v876_v39  ;;  %v574_v6 = vsel %vm562_vm4, %v553_v47, %v543_v48  ;;  %v587_v8 = vsel %vm540_vm5, 0.0, %v575_v5  ;;  %1369 = vmatpush.bf16.msra.mxu1 %v2268_v42  ;;  %1549 = vmatpush.bf16.msra.mxu2 %v2833_v13  ;;  %v2278_v30 = vld [vmem:[%s3257_s3 + $0x38] sm:$0xff]  ;;  %v2265_v34 = vld [vmem:[%s3257_s3 + $0x10] sm:$0xff]  ;;  %v2888_v39 = vld [vmem:[%s3257_s3 + $0x60] sm:$0xff] }
  0x45   : > { %v564_v51 = vsel %vm562_vm4, %v543_v48, %v553_v47  ;;  %v585_v52 = vsel %vm540_vm5, 0.0, %v574_v6  ;;  %v670_v53 = vpack.c.bf16 %v587_v8, %v587_v8  ;;  %v671_v55 = vpack.c.bf16 %v565_v7, %v565_v7  ;;  %v2263_v40 = vld [vmem:[%s3257_s3] sm:$0xff] }
  0x46   : > { %908 = vrot.lane.b32.xlu0 %v892_v4, %s2446_s19  ;;  %836 = vrot.lane.b32.xlu1 %v821_v12, %s2445_s15  ;;  %v668_v56 = vpack.c.bf16 %v585_v52, %v585_v52  ;;  %v669_v57 = vpack.c.bf16 %v564_v51, %v564_v51  ;;  %v552_v4 = vrot.slane %v2611_v43, 7  ;;  %v2280_v12 = vld [vmem:[%s3257_s3 + $0x48] sm:$0xff]  ;;  %v559_v46 = vrot.slane %v2570_v15, 7 }
  0x47   : > { %v2802_v60 = vunpack.c.l.b16 %v670_v53  ;;  %v2804_v62 = vunpack.c.l.b16 %v671_v55  ;;  %1222 = vmatpush.bf16.msra.mxu0 %v2280_v12  ;;  %2346 = vmatpush.bf16.msra.mxu3 %v2280_v12  ;;  %v545_v48 = vrot.slane %v2597_v37, 7  ;;  %v555_v49 = vrot.slane %v2613_v44, 7 }
  0x48   : > { %v2806_v63 = vunpack.c.l.b16 %v668_v56  ;;  %v2808_v0 = vunpack.c.l.b16 %v669_v57  ;;  %v573_v43 = vsel %vm562_vm4, %v552_v4, %v542_v3  ;;  %v563_v16 = vsel %vm562_vm4, %v542_v3, %v552_v4  ;;  %1370 = vmatpush.bf16.msra.mxu1 %v2267_v20  ;;  %1550 = vmatpush.bf16.msra.mxu2 %v2853_v28 }
  0x49   : > { %v768_v10 = vpack.c.b16 %v2804_v62, %v2802_v60  ;;  %v583_v18 = vsel %vm540_vm5, 0.0, %v573_v43  ;;  %v667_v24 = vpack.c.bf16 %v563_v16, %v563_v16  ;;  %v580_v47 = vsel %vm562_vm4, %v559_v46, %v549_v45 }
  0x4a   : > { %838 = vrot.lane.b32.xlu2 %v822_v31, %s2445_s15  ;;  %v767_v11 = vpack.c.b16 %v2808_v0, %v2806_v63  ;;  %v666_v23 = vpack.c.bf16 %v583_v18, %v583_v18  ;;  %v2266_v31 = vld [vmem:[%s3257_s3 + $0x18] sm:$0xff]  ;;  %v597_v6 = vsel %vm540_vm5, 0.0, %v580_v47  ;;  %v570_v15 = vsel %vm562_vm4, %v549_v45, %v559_v46 }
  0x4b   : > { %1223 = vmatpush.bf16.msra.mxu0 %v2279_v19  ;;  %v2848_v27 = vunpack.c.l.b16 %v667_v24  ;;  %2347 = vmatpush.bf16.msra.mxu3 %v2279_v19  ;;  %v680_v51 = vpack.c.bf16 %v597_v6, %v597_v6  ;;  %v576_v37 = vsel %vm562_vm4, %v555_v49, %v545_v48  ;;  %v550_v53 = vrot.slane %v2654_v17, 7 }
  0x4c   : > { %v2846_v25 = vunpack.c.l.b16 %v666_v23  ;;  %1371 = vmatpush.bf16.msra.mxu1 %v2266_v31  ;;  %1551 = vmatpush.bf16.msra.mxu2 %v2867_v32  ;;  %v560_v55 = vrot.slane %v2660_v21, 7  ;;  %v681_v56 = vpack.c.bf16 %v570_v15, %v570_v15  ;;  %v566_v0 = vsel %vm562_vm4, %v545_v48, %v555_v49 }
  0x4d   : > { %v589_v3 = vsel %vm540_vm5, 0.0, %v576_v37  ;;  %v760_v21 = vunpack.c.l.b16 %v680_v51  ;;  %v673_v18 = vpack.c.bf16 %v566_v0, %v566_v0  ;;  %v546_v24 = vrot.slane %v2679_v38, 7 }
  0x4e   : > { %844 = vrot.lane.b32.xlu0 %v825_v35, %s2445_s15  ;;  %914 = vrot.lane.b32.xlu1 %v895_v36, %s2446_s19  ;;  %v766_v29 = vpack.c.b16 %v2848_v27, %v2846_v25  ;;  %v2879_v35 = vld [vmem:[%s3257_s3 + $0x68] sm:$0xff]  ;;  %v761_v43 = vunpack.c.l.b16 %v681_v56  ;;  %v672_v16 = vpack.c.bf16 %v589_v3, %v589_v3  ;;  %v571_v62 = vsel %vm562_vm4, %v550_v53, %v560_v55 }
  0x4f   : > { %1224 = vmatpush.bf16.msra.mxu0 %v2278_v30  ;;  %2348 = vmatpush.bf16.msra.mxu3 %v2278_v30  ;;  %v2264_v36 = vld [vmem:[%s3257_s3 + $0x8] sm:$0xff]  ;;  %v556_v30 = vrot.slane %v2681_v41, 7  ;;  %v753_v27 = vunpack.c.l.b16 %v673_v18  ;;  %v683_v47 = vpack.c.bf16 %v571_v62, %v571_v62  ;;  %v548_v41 = vrot.slane %v2693_v54, 7 }
  0x50   : > { %1372 = vmatpush.bf16.msra.mxu1 %v2265_v34  ;;  %1552 = vmatpush.bf16.msra.mxu2 %v2879_v35  ;;  %v752_v25 = vunpack.c.l.b16 %v672_v16  ;;  %v558_v48 = vrot.slane %v2705_v61, 7 }
  0x51   : > { %v577_v38 = vsel %vm562_vm4, %v556_v30, %v546_v24 }
  0x52   : > { %906 = vrot.lane.b32.xlu2 %v891_v2, %s2446_s19  ;;  %v591_v61 = vsel %vm540_vm5, 0.0, %v577_v38 }
  0x53   : > { %1225 = vmatpush.bf16.msra.mxu0 %v2277_v33  ;;  %2349 = vmatpush.bf16.msra.mxu3 %v2277_v33 }
  0x54   : > { %1373 = vmatpush.bf16.msra.mxu1 %v2264_v36  ;;  %1553 = vmatpush.bf16.msra.mxu2 %v2888_v39 }
  0x57   : > { %2350 = vmatpush.bf16.msrb.mxu3 %v2268_v42 }
  0x58   : > { %1374 = vmatpush.bf16.msra.mxu1 %v2263_v40 }
  0x5b   : > { %2351 = vmatpush.bf16.msrb.mxu3 %v2267_v20 }
  0x5f   : > { %2352 = vmatpush.bf16.msrb.mxu3 %v2266_v31 }
  0x63   : > { %2353 = vmatpush.bf16.msrb.mxu3 %v2265_v34 }
  0x67   : > { %2354 = vmatpush.bf16.msrb.mxu3 %v2264_v36 }
  0x6b   : > { %2355 = vmatpush.bf16.msrb.mxu3 %v2263_v40  ;;  %v773_v40 = vpack.c.b16 %v761_v43, %v760_v21  ;;  %v569_v21 = vsel %vm562_vm4, %v548_v41, %v558_v48 }
  0x84   : > { %v897_v2 = vpop.permute.xlu2 %896 }
  0x8c   : > { %v899_v5 = vpop.permute.xlu2 %898 }
  0x90   : > { %v831_v50 = vpop.permute.xlu0 %830  ;;  %v829_v7 = vpop.permute.xlu1 %828 }
  0x91   : > { %v922_v14 = vsel %vm916_vm6, %v767_v11, %v829_v7  ;;  %v925_v4 = vsel %vm916_vm6, %v768_v10, %v831_v50  ;;  %v581_v11 = vsel %vm562_vm4, %v560_v55, %v550_v53  ;;  %v769_v7 = vpack.c.b16 %v753_v27, %v752_v25 }
  0x92   : > { %v951_v8 = vsel %vm947_vm7, %v922_v14, %v899_v5  ;;  %v599_v23 = vsel %vm540_vm5, 0.0, %v581_v11  ;;  %v567_v14 = vsel %vm562_vm4, %v546_v24, %v556_v30  ;;  %v547_v53 = vrot.slane %v2721_v22, 7 }
  0x93   : > { %v980_v44 = vunpack.c.l.b16 %v951_v8  ;;  %v981_v52 = vunpack.c.h.b16 %v951_v8  ;;  %v763_v8 = vunpack.c.l.b16 %v683_v47  ;;  %v557_v55 = vrot.slane %v2726_v26, 7 }
  0x94   : > { %v833_v46 = vpop.permute.xlu2 %832 }
  0x95   : > { %v1000_v57 = vpack.c.b16 %v980_v44, %v980_v44  ;;  %v1001_v63 = vpack.c.b16 %v981_v52, %v981_v52  ;;  %v579_v44 = vsel %vm562_vm4, %v558_v48, %v548_v41  ;;  %v675_v52 = vpack.c.bf16 %v567_v14, %v567_v14 }
  0x96   : > { %v928_v0 = vsel %vm916_vm6, %v769_v7, %v833_v46  ;;  %v595_v11 = vsel %vm540_vm5, 0.0, %v579_v44  ;;  %v568_v24 = vsel %vm562_vm4, %v547_v53, %v557_v55 }
  0x97   : > { %1041 = vst.msk [vmem:[#allocation2 + $0x8] sm:$0xf] %vm1038_vm8, %v1000_v57  ;;  %v677_v47 = vpack.c.bf16 %v568_v24, %v568_v24 }
  0x98   : > { %v901_v17 = vpop.permute.xlu0 %900  ;;  %1042 = vst.msk [vmem:[#allocation2 + $0xc] sm:$0xf] %vm1038_vm8, %v1001_v63  ;;  %v827_v42 = vpop.permute.xlu1 %826  ;;  %v674_v63 = vpack.c.bf16 %v591_v61, %v591_v61 }
  0x99   : > { %v953_v12 = vsel %vm947_vm7, %v925_v4, %v901_v17  ;;  %v919_v60 = vsel %vm916_vm6, %v766_v29, %v827_v42  ;;  %v578_v42 = vsel %vm562_vm4, %v557_v55, %v547_v53  ;;  %v757_v14 = vunpack.c.l.b16 %v677_v47 }
  0x9a   : > { %v982_v19 = vunpack.c.l.b16 %v953_v12  ;;  %v983_v20 = vunpack.c.h.b16 %v953_v12  ;;  %v949_v10 = vsel %vm947_vm7, %v919_v60, %v897_v2  ;;  %v682_v2 = vpack.c.bf16 %v599_v23, %v599_v23 }
  0x9b   : > { %v978_v34 = vunpack.c.l.b16 %v949_v10  ;;  %v979_v36 = vunpack.c.h.b16 %v949_v10  ;;  %v755_v12 = vunpack.c.l.b16 %v675_v52  ;;  %v754_v18 = vunpack.c.l.b16 %v674_v63 }
  0x9c   : > { %v1002_v31 = vpack.c.b16 %v982_v19, %v982_v19  ;;  %v1003_v33 = vpack.c.b16 %v983_v20, %v983_v20  ;;  %v762_v54 = vunpack.c.l.b16 %v682_v2  ;;  %v913_v17 = vpop.permute.xlu2 %912  ;;  %v678_v19 = vpack.c.bf16 %v595_v11, %v595_v11 }
  0x9d   : > { %v998_v29 = vpack.c.b16 %v978_v34, %v978_v34  ;;  %v999_v45 = vpack.c.b16 %v979_v36, %v979_v36  ;;  %v679_v20 = vpack.c.bf16 %v569_v21, %v569_v21  ;;  %v593_v30 = vsel %vm540_vm5, 0.0, %v578_v42 }
  0x9e   : > { %1043 = vst.msk [vmem:[#allocation2 + $0x10] sm:$0xf] %vm1038_vm8, %v1002_v31  ;;  %v774_v4 = vpack.c.b16 %v763_v8, %v762_v54  ;;  %v758_v25 = vunpack.c.l.b16 %v678_v19  ;;  %v676_v2 = vpack.c.bf16 %v593_v30, %v593_v30  ;;  %v551_v42 = vrot.slane %v2745_v58, 7 }
  0x9f   : > { %1044 = vst.msk [vmem:[#allocation2 + $0x14] sm:$0xf] %vm1038_vm8, %v1003_v33  ;;  %v2269_v50 = vld [vmem:[#allocation2 + $0x8] sm:$0xff]  ;;  %v759_v27 = vunpack.c.l.b16 %v679_v20 }
  0xa0   : > { %1039 = vst.msk [vmem:[#allocation2] sm:$0xf] %vm1038_vm8, %v998_v29  ;;  %v841_v49 = vpop.permute.xlu0 %840  ;;  %v911_v6 = vpop.permute.xlu1 %910  ;;  %2103 = vmatmul.msk.bf16.vlgmr.msra.gmra.mxu0 %vm1193_vm9, %v2269_v50  ;;  %v756_v7 = vunpack.c.l.b16 %v676_v2  ;;  %v2256_v52 = vld [vmem:[#allocation2 + $0x8] sm:$0xff] }
  0xa1   : > { %1040 = vst.msk [vmem:[#allocation2 + $0x4] sm:$0xf] %vm1038_vm8, %v999_v45  ;;  %v940_v5 = vsel %vm916_vm6, %v773_v40, %v841_v49  ;;  %v770_v40 = vpack.c.b16 %v755_v12, %v754_v18 }
  0xa2   : > { %v963_v15 = vsel %vm947_vm7, %v940_v5, %v911_v6  ;;  %v772_v6 = vpack.c.b16 %v759_v27, %v758_v25  ;;  %v771_v44 = vpack.c.b16 %v757_v14, %v756_v7 }
  0xa3   : > { %v992_v51 = vunpack.c.l.b16 %v963_v15  ;;  %v993_v37 = vunpack.c.h.b16 %v963_v15 }
  0xa4   : > { %v839_v46 = vpop.permute.xlu2 %838 }
  0xa5   : > { %v1012_v56 = vpack.c.b16 %v992_v51, %v992_v51  ;;  %v1013_v57 = vpack.c.b16 %v993_v37, %v993_v37  ;;  %v937_v37 = vsel %vm916_vm6, %v772_v6, %v839_v46  ;;  %v3029_v6 = vld [vmem:[%s3258_s4] ss:$0 sm:$0xff] }
  0xa6   : > { %v2283_v3 = vld [vmem:[#allocation2 + $0x10] sm:$0xff] }
  0xa7   : > { %1053 = vst.msk [vmem:[#allocation2 + $0x38] sm:$0xf] %vm1038_vm8, %v1012_v56  ;;  %2243 = vmatmul.msk.bf16.vlgmr.msra.gmra.mxu2 %vm1193_vm9, %v2283_v3  ;;  %v2270_v41 = vld [vmem:[#allocation2 + $0x10] sm:$0xff] }
  0xa8   : > { %1054 = vst.msk [vmem:[#allocation2 + $0x3c] sm:$0xf] %vm1038_vm8, %v1013_v57  ;;  %v903_v22 = vpop.permute.xlu0 %902  ;;  %v2255_v26 = vld [vmem:[#allocation2] sm:$0xff]  ;;  %v843_v16 = vpop.permute.xlu1 %842 }
  0xa9   : > { %v955_v43 = vsel %vm947_vm7, %v928_v0, %v903_v22  ;;  %2167 = vmatmul.msk.bf16.vlgmr.msra.gmra.mxu1 %vm1193_vm9, %v2255_v26  ;;  %v943_v10 = vsel %vm916_vm6, %v774_v4, %v843_v16 }
  0xaa   : > { %v984_v60 = vunpack.c.l.b16 %v955_v43  ;;  %v985_v62 = vunpack.c.h.b16 %v955_v43  ;;  %v965_v23 = vsel %vm947_vm7, %v943_v10, %v913_v17  ;;  %v561_v43 = vrot.slane %v2747_v59, 7 }
  0xab   : > { %v994_v34 = vunpack.c.l.b16 %v965_v23  ;;  %v995_v36 = vunpack.c.h.b16 %v965_v23 }
  0xac   : > { %v1004_v31 = vpack.c.b16 %v984_v60, %v984_v60  ;;  %v1005_v33 = vpack.c.b16 %v985_v62, %v985_v62  ;;  %v907_v55 = vpop.permute.xlu2 %906  ;;  %v572_v16 = vsel %vm562_vm4, %v551_v42, %v561_v43  ;;  %v582_v18 = vsel %vm562_vm4, %v561_v43, %v551_v42 }
  0xad   : > { %v1014_v29 = vpack.c.b16 %v994_v34, %v994_v34  ;;  %v1015_v45 = vpack.c.b16 %v995_v36, %v995_v36  ;;  %v685_v19 = vpack.c.bf16 %v572_v16, %v572_v16 }
  0xae   : > { %1045 = vst.msk [vmem:[#allocation2 + $0x18] sm:$0xf] %vm1038_vm8, %v1004_v31 }
  0xaf   : > { %1046 = vst.msk [vmem:[#allocation2 + $0x1c] sm:$0xf] %vm1038_vm8, %v1005_v33  ;;  %v2275_v38 = vld [vmem:[#allocation2 + $0x38] sm:$0xff]  ;;  %v765_v59 = vunpack.c.l.b16 %v685_v19 }
  0xb0   : > { %1055 = vst.msk [vmem:[#allocation2 + $0x40] sm:$0xf] %vm1038_vm8, %v1014_v29  ;;  %v835_v48 = vpop.permute.xlu0 %834  ;;  %2109 = vmatmul.msk.bf16.vlgmr.msra.gmra.mxu3 %vm1193_vm9, %v2275_v38  ;;  %v905_v50 = vpop.permute.xlu1 %904  ;;  %2104 = vmatmul.msk.bf16.gmra.mxu0 %vm1193_vm9, %v2270_v41  ;;  %v2262_v25 = vld [vmem:[#allocation2 + $0x38] sm:$0xff] }
  0xb1   : > { %1056 = vst.msk [vmem:[#allocation2 + $0x44] sm:$0xf] %vm1038_vm8, %v1015_v45  ;;  %v931_v49 = vsel %vm916_vm6, %v770_v40, %v835_v48  ;;  %2356 = vmatpush.bf16.msra.mxu3 %v2815_v9  ;;  %v2288_v47 = vld [vmem:[#allocation2 + $0x38] sm:$0xff] }
  0xb2   : > { %v957_v5 = vsel %vm947_vm7, %v931_v49, %v905_v50 }
  0xb3   : > { %v986_v15 = vunpack.c.l.b16 %v957_v5  ;;  %v987_v54 = vunpack.c.h.b16 %v957_v5 }
  0xb5   : > { %v1006_v8 = vpack.c.b16 %v986_v15, %v986_v15  ;;  %v1007_v61 = vpack.c.b16 %v987_v54, %v987_v54  ;;  %2357 = vmatpush.bf16.msra.mxu3 %v2833_v13 }
  0xb6   : > { %v2284_v51 = vld [vmem:[#allocation2 + $0x18] sm:$0xff] }
  0xb7   : > { %1047 = vst.msk [vmem:[#allocation2 + $0x20] sm:$0xf] %vm1038_vm8, %v1006_v8  ;;  %2244 = vmatmul.msk.bf16.gmra.mxu2 %vm1193_vm9, %v2284_v51  ;;  %v2271_v12 = vld [vmem:[#allocation2 + $0x18] sm:$0xff] }
  0xb8   : > { %1048 = vst.msk [vmem:[#allocation2 + $0x24] sm:$0xf] %vm1038_vm8, %v1007_v61  ;;  %v909_v53 = vpop.permute.xlu0 %908  ;;  %v837_v56 = vpop.permute.xlu1 %836  ;;  %v2276_v11 = vld [vmem:[#allocation2 + $0x40] sm:$0xff]  ;;  %v2258_v40 = vld [vmem:[#allocation2 + $0x18] sm:$0xff] }
  0xb9   : > { %v961_v9 = vsel %vm947_vm7, %v937_v37, %v909_v53  ;;  %2168 = vmatmul.msk.bf16.gmra.mxu1 %vm1193_vm9, %v2256_v52  ;;  %v934_v0 = vsel %vm916_vm6, %v771_v44, %v837_v56  ;;  %2358 = vmatpush.bf16.msra.mxu3 %v2853_v28  ;;  %v2289_v46 = vld [vmem:[#allocation2 + $0x40] sm:$0xff] }
  0xba   : > { %v990_v57 = vunpack.c.l.b16 %v961_v9  ;;  %v991_v63 = vunpack.c.h.b16 %v961_v9  ;;  %v959_v13 = vsel %vm947_vm7, %v934_v0, %v907_v55 }
  0xbb   : > { %v988_v17 = vunpack.c.l.b16 %v959_v13  ;;  %v989_v21 = vunpack.c.h.b16 %v959_v13 }
  0xbc   : > { %v1010_v3 = vpack.c.b16 %v990_v57, %v990_v57  ;;  %v1011_v4 = vpack.c.b16 %v991_v63, %v991_v63 }
  0xbd   : > { %v1008_v22 = vpack.c.b16 %v988_v17, %v988_v17  ;;  %v1009_v26 = vpack.c.b16 %v989_v21, %v989_v21  ;;  %2359 = vmatpush.bf16.msra.mxu3 %v2867_v32  ;;  %v2257_v32 = vld [vmem:[#allocation2 + $0x10] sm:$0xff] }
  0xbe   : > { %1051 = vst.msk [vmem:[#allocation2 + $0x30] sm:$0xf] %vm1038_vm8, %v1010_v3 }
  0xbf   : > { %1052 = vst.msk [vmem:[#allocation2 + $0x34] sm:$0xf] %vm1038_vm8, %v1011_v4  ;;  %v2285_v28 = vld [vmem:[#allocation2 + $0x20] sm:$0xff] }
  0xc0   : > { %1049 = vst.msk [vmem:[#allocation2 + $0x28] sm:$0xf] %vm1038_vm8, %v1008_v22  ;;  %2110 = vmatmul.msk.bf16.gmra.mxu3 %vm1193_vm9, %v2276_v11  ;;  %2105 = vmatmul.msk.bf16.gmra.mxu0 %vm1193_vm9, %v2271_v12  ;;  %v2272_v62 = vld [vmem:[#allocation2 + $0x20] sm:$0xff]  ;;  %v915_v23 = vpop.permute.xlu1 %914 }
  0xc1   : > { %1050 = vst.msk [vmem:[#allocation2 + $0x2c] sm:$0xf] %vm1038_vm8, %v1009_v26  ;;  %2360 = vmatpush.bf16.msra.mxu3 %v2879_v35  ;;  %v601_v35 = vsel %vm540_vm5, 0.0, %v582_v18  ;;  %v2259_v45 = vld [vmem:[#allocation2 + $0x20] sm:$0xff] }
  0xc2   : > { %v684_v58 = vpack.c.bf16 %v601_v35, %v601_v35 }
  0xc4   : > { %v764_v60 = vunpack.c.l.b16 %v684_v58 }
  0xc5   : > { %2361 = vmatpush.bf16.msra.mxu3 %v2888_v39  ;;  %v845_v39 = vpop.permute.xlu0 %844 }
  0xc6   : > { %v2261_v20 = vld [vmem:[#allocation2 + $0x30] sm:$0xff]  ;;  %v775_v10 = vpack.c.b16 %v765_v59, %v764_v60 }
  0xc7   : > { %2245 = vmatmul.msk.bf16.gmra.mxu2 %vm1193_vm9, %v2285_v28  ;;  %v2287_v29 = vld [vmem:[#allocation2 + $0x30] sm:$0xff] }
  0xc8   : > { %v946_v24 = vsel %vm916_vm6, %v775_v10, %v845_v39  ;;  %v2286_v31 = vld [vmem:[#allocation2 + $0x28] sm:$0xff]  ;;  %v2274_v2 = vld [vmem:[#allocation2 + $0x30] sm:$0xff] }
  0xc9   : > { %2169 = vmatmul.msk.bf16.gmra.mxu1 %vm1193_vm9, %v2257_v32  ;;  %v967_v30 = vsel %vm947_vm7, %v946_v24, %v915_v23  ;;  %v2273_v27 = vld [vmem:[#allocation2 + $0x28] sm:$0xff] }
  0xca   : > { %v996_v1 = vunpack.c.l.b16 %v967_v30  ;;  %v997_v33 = vunpack.c.h.b16 %v967_v30  ;;  %v2260_v38 = vld [vmem:[#allocation2 + $0x28] sm:$0xff] }
  0xcc   : > { %v1016_v34 = vpack.c.b16 %v996_v1, %v996_v1  ;;  %v1017_v36 = vpack.c.b16 %v997_v33, %v997_v33 }
  0xce   : > { %1057 = vst.msk [vmem:[#allocation2 + $0x48] sm:$0xf] %vm1038_vm8, %v1016_v34 }
  0xcf   : > { %1058 = vst.msk [vmem:[#allocation2 + $0x4c] sm:$0xf] %vm1038_vm8, %v1017_v36 }
  0xd0   : > { %2173 = vmatmul.msk.bf16.vlgmr.msrb.gmra.mxu3 %vm1193_vm9, %v2261_v20  ;;  %2106 = vmatmul.msk.bf16.gmra.mxu0 %vm1193_vm9, %v2272_v62 }
  0xd6   : > { %v2290_v41 = vld [vmem:[#allocation2 + $0x48] sm:$0xff] }
  0xd7   : > { %2246 = vmatmul.msk.bf16.gmra.mxu2 %vm1193_vm9, %v2286_v31 }
  0xd9   : > { %2170 = vmatmul.msk.bf16.gmra.mxu1 %vm1193_vm9, %v2258_v40 }
  0xe0   : > { %2174 = vmatmul.msk.bf16.gmra.mxu3 %vm1193_vm9, %v2262_v25  ;;  %2107 = vmatmul.msk.bf16.gmra.mxu0 %vm1193_vm9, %v2273_v27 }
  0xe7   : > { %2247 = vmatmul.msk.bf16.gmra.mxu2 %vm1193_vm9, %v2287_v29 }
  0xe9   : > { %2171 = vmatmul.msk.bf16.gmra.mxu1 %vm1193_vm9, %v2259_v45 }
  0xf0   : > { %2249 = vmatmul.msk.bf16.vlgmr.msra.gmra.mxu3 %vm1193_vm9, %v2289_v46  ;;  %2108 = vmatmul.msk.bf16.gmra.mxu0 %vm1193_vm9, %v2274_v2 }
  0xf7   : > { %2248 = vmatmul.msk.bf16.gmra.mxu2 %vm1193_vm9, %v2288_v47 }
  0xf9   : > { %2172 = vmatmul.msk.bf16.gmra.mxu1 %vm1193_vm9, %v2260_v38 }
 0x100   : > { %2250 = vmatmul.msk.bf16.gmra.mxu3 %vm1193_vm9, %v2290_v41 }
 0x11d   : > { %v1227_v48 = vpop.f32.mrf.mxu0 }
 0x125   : > { %v1229_v49 = vpop.f32.mrf.mxu0 }
 0x126   : > { %v1376_v50 = vpop.f32.mrf.mxu1 }
 0x127   : > { %v1377_v5 = vadd.f32 %v1376_v50, %v1227_v48 }
 0x12a   : > { %v1555_v7 = vpop.f32.mrf.mxu2 }
 0x12b   : > { %v1595_v14 = vadd.f32 %v1555_v7, %v1377_v5 }
 0x12d   : > { %v3032_v15 = vadd.f32 %v3029_v6, %v1595_v14  ;;  %v1232_v54 = vpop.f32.mrf.mxu0 }
 0x12e   : > { %v1378_v8 = vpop.f32.mrf.mxu1 }
 0x12f   : > { %v1741_v61 = vpack.c.bf16 %v3032_v15, %v3032_v15  ;;  %v1379_v51 = vadd.f32 %v1378_v8, %v1229_v49 }
 0x131   : > { %1758 = vst.msk [vmem:[%s3039_s10] sm:$0xf] %vm1757_vm10, %v1741_v61 }
 0x132   : > { %v1557_v37 = vpop.f32.mrf.mxu2 }
 0x133   : > { %v1596_v44 = vadd.f32 %v1557_v37, %v1379_v51  ;;  %v3045_v52 = vpop.f32.mrf.mxu3 }
 0x135   : > { %v3048_v53 = vadd.f32 %v3029_v6, %v1596_v44  ;;  %v1234_v55 = vpop.f32.mrf.mxu0 }
 0x136   : > { %v1381_v9 = vpop.f32.mrf.mxu1 }
 0x137   : > { %v1742_v56 = vpack.c.bf16 %v3048_v53, %v3048_v53  ;;  %v1382_v57 = vadd.f32 %v1381_v9, %v1232_v54  ;;  %v1632_v37 = vsel %vm916_vm6, %v3048_v53, 0.0 }
 0x139   : > { %1759 = vst.msk [vmem:[%s3039_s10 + $0x4] sm:$0xf] %vm1757_vm10, %v1742_v56  ;;  %v1631_v56 = vsel %vm916_vm6, %v3032_v15, 0.0 }
 0x13a   : > { %v1560_v63 = vpop.f32.mrf.mxu2 }
 0x13b   : > { %v1597_v0 = vadd.f32 %v1560_v63, %v1382_v57  ;;  %v3054_v13 = vpop.f32.mrf.mxu3 }
 0x13d   : > { %v3057_v3 = vadd.f32 %v3029_v6, %v1597_v0  ;;  %v1237_v4 = vpop.f32.mrf.mxu0 }
 0x13e   : > { %v1383_v17 = vpop.f32.mrf.mxu1 }
 0x13f   : > { %v1743_v21 = vpack.c.bf16 %v3057_v3, %v3057_v3  ;;  %v1384_v11 = vadd.f32 %v1383_v17, %v1234_v55  ;;  %v1634_v57 = vsel %vm916_vm6, %v3057_v3, 0.0 }
 0x141   : > { %1760 = vst.msk [vmem:[%s3039_s10 + $0x8] sm:$0xf] %vm1757_vm10, %v1743_v21 }
 0x142   : > { %v1562_v22 = vpop.f32.mrf.mxu2 }
 0x143   : > { %v1598_v26 = vadd.f32 %v1562_v22, %v1384_v11  ;;  %v3063_v12 = vpop.f32.mrf.mxu3 }
 0x145   : > { %v3066_v28 = vadd.f32 %v3029_v6, %v1598_v26  ;;  %v1239_v42 = vpop.f32.mrf.mxu0 }
 0x146   : > { %v1386_v43 = vpop.f32.mrf.mxu1 }
 0x147   : > { %v1744_v32 = vpack.c.bf16 %v3066_v28, %v3066_v28  ;;  %v1387_v16 = vadd.f32 %v1386_v43, %v1237_v4  ;;  %v1633_v4 = vadd.f32 %v1632_v37, %v1631_v56  ;;  %v1636_v21 = vsel %vm916_vm6, %v3066_v28, 0.0 }
 0x149   : > { %1761 = vst.msk [vmem:[%s3039_s10 + $0xc] sm:$0xf] %vm1757_vm10, %v1744_v32 }
 0x14a   : > { %v1565_v18 = vpop.f32.mrf.mxu2 }
 0x14b   : > { %v1599_v35 = vadd.f32 %v1565_v18, %v1387_v16  ;;  %v3072_v19 = vpop.f32.mrf.mxu3 }
 0x14d   : > { %v3075_v58 = vadd.f32 %v3029_v6, %v1599_v35  ;;  %v1242_v20 = vpop.f32.mrf.mxu0 }
 0x14e   : > { %v1388_v59 = vpop.f32.mrf.mxu1 }
 0x14f   : > { %v1745_v60 = vpack.c.bf16 %v3075_v58, %v3075_v58  ;;  %v1389_v39 = vadd.f32 %v1388_v59, %v1239_v42  ;;  %v1638_v43 = vsel %vm916_vm6, %v3075_v58, 0.0 }
 0x151   : > { %1762 = vst.msk [vmem:[%s3039_s10 + $0x10] sm:$0xf] %vm1757_vm10, %v1745_v60 }
 0x152   : > { %v1567_v62 = vpop.f32.mrf.mxu2 }
 0x153   : > { %v1600_v10 = vadd.f32 %v1567_v62, %v1389_v39  ;;  %v1406_v23 = vpop.f32.mrf.mxu3 }
 0x154   : > { %v1407_v55 = vadd.f32 %v1406_v23, %v3045_v52  ;;  %v1635_v52 = vadd.f32 %v1634_v57, %v1633_v4 }
 0x155   : > { %v3082_v24 = vadd.f32 %v3029_v6, %v1600_v10  ;;  %v1244_v1 = vpop.f32.mrf.mxu0 }
 0x156   : > { %v1391_v30 = vpop.f32.mrf.mxu1  ;;  %v1637_v16 = vadd.f32 %v1636_v21, %v1635_v52 }
 0x157   : > { %v1746_v31 = vpack.c.bf16 %v3082_v24, %v3082_v24  ;;  %v1392_v33 = vadd.f32 %v1391_v30, %v1242_v20  ;;  %v1640_v35 = vsel %vm916_vm6, %v3082_v24, 0.0 }
 0x158   : > { %v1639_v59 = vadd.f32 %v1638_v43, %v1637_v16 }
 0x159   : > { %1763 = vst.msk [vmem:[%s3039_s10 + $0x14] sm:$0xf] %vm1757_vm10, %v1746_v31 }
 0x15a   : > { %v1570_v34 = vpop.f32.mrf.mxu2  ;;  %v1641_v30 = vadd.f32 %v1640_v35, %v1639_v59 }
 0x15b   : > { %v1601_v36 = vadd.f32 %v1570_v34, %v1392_v33  ;;  %v1408_v40 = vpop.f32.mrf.mxu3 }
 0x15c   : > { %v1409_v60 = vadd.f32 %v1408_v40, %v3054_v13 }
 0x15d   : > { %v3089_v25 = vadd.f32 %v3029_v6, %v1601_v36  ;;  %v1247_v46 = vpop.f32.mrf.mxu0 }
 0x15e   : > { %v1393_v27 = vpop.f32.mrf.mxu1 }
 0x15f   : > { %v1747_v29 = vpack.c.bf16 %v3089_v25, %v3089_v25  ;;  %v1394_v45 = vadd.f32 %v1393_v27, %v1244_v1  ;;  %v1642_v62 = vsel %vm916_vm6, %v3089_v25, 0.0 }
 0x160   : > { %v1643_v34 = vadd.f32 %v1642_v62, %v1641_v30 }
 0x161   : > { %1764 = vst.msk [vmem:[%s3039_s10 + $0x18] sm:$0xf] %vm1757_vm10, %v1747_v29 }
 0x162   : > { %v1572_v2 = vpop.f32.mrf.mxu2 }
 0x163   : > { %v1602_v47 = vadd.f32 %v1572_v2, %v1394_v45  ;;  %v1411_v38 = vpop.f32.mrf.mxu3 }
 0x165   : > { %v3096_v41 = vadd.f32 %v3029_v6, %v1602_v47  ;;  %v1249_v54 = vpop.f32.mrf.mxu0 }
 0x166   : > { %v1396_v48 = vpop.f32.mrf.mxu1 }
 0x167   : > { %v1748_v49 = vpack.c.bf16 %v3096_v41, %v3096_v41  ;;  %v1397_v50 = vadd.f32 %v1396_v48, %v1247_v46  ;;  %v1644_v1 = vsel %vm916_vm6, %v3096_v41, 0.0  ;;  %v1412_v48 = vadd.f32 %v1411_v38, %v3063_v12 }
 0x168   : > { %v1645_v29 = vadd.f32 %v1644_v1, %v1643_v34 }
 0x169   : > { %1765 = vst.msk [vmem:[%s3039_s10 + $0x1c] sm:$0xf] %vm1757_vm10, %v1748_v49 }
 0x16a   : > { %v1575_v5 = vpop.f32.mrf.mxu2 }
 0x16b   : > { %v1603_v7 = vadd.f32 %v1575_v5, %v1397_v50  ;;  %v3102_v14 = vpop.f32.mrf.mxu3 }
 0x16d   : > { %v3105_v8 = vadd.f32 %v3029_v6, %v1603_v7  ;;  %v1252_v22 = vpop.f32.mrf.mxu0 }
 0x16e   : > { %v1398_v61 = vpop.f32.mrf.mxu1 }
 0x16f   : > { %v1749_v51 = vpack.c.bf16 %v3105_v8, %v3105_v8  ;;  %v1399_v44 = vadd.f32 %v1398_v61, %v1249_v54  ;;  %v1646_v40 = vsel %vm916_vm6, %v3105_v8, 0.0 }
 0x170   : > { %v1647_v49 = vadd.f32 %v1646_v40, %v1645_v29 }
 0x171   : > { %1766 = vst.msk [vmem:[%s3039_s10 + $0x20] sm:$0xf] %vm1757_vm10, %v1749_v51 }
 0x172   : > { %v1577_v9 = vpop.f32.mrf.mxu2 }
 0x173   : > { %v1604_v63 = vadd.f32 %v1577_v9, %v1399_v44  ;;  %v1585_v0 = vpop.f32.mrf.mxu3 }
 0x174   : > { %v1607_v17 = vadd.f32 %v1585_v0, %v1407_v55 }
 0x175   : > { %v3121_v11 = vadd.f32 %v3029_v6, %v1604_v63  ;;  %v1254_v45 = vpop.f32.mrf.mxu0  ;;  %v1414_v63 = vadd.f32 %v3102_v14, %v3072_v19 }
 0x176   : > { %v3124_v26 = vadd.f32 %v3029_v6, %v1607_v17  ;;  %v1401_v42 = vpop.f32.mrf.mxu1 }
 0x177   : > { %v1750_v32 = vpack.c.bf16 %v3121_v11, %v3121_v11  ;;  %v1402_v20 = vadd.f32 %v1401_v42, %v1252_v22  ;;  %v1648_v2 = vsel %vm916_vm6, %v3121_v11, 0.0 }
 0x178   : > { %v1753_v18 = vpack.c.bf16 %v3124_v26, %v3124_v26  ;;  %v1649_v61 = vadd.f32 %v1648_v2, %v1647_v49  ;;  %v1654_v57 = vsel %vm916_vm6, %v3124_v26, 0.0 }
 0x179   : > { %1767 = vst.msk [vmem:[%s3039_s10 + $0x24] sm:$0xf] %vm1757_vm10, %v1750_v32 }
 0x17a   : > { %1770 = vst.msk [vmem:[%s3039_s10 + $0x30] sm:$0xf] %vm1757_vm10, %v1753_v18  ;;  %v1580_v39 = vpop.f32.mrf.mxu2 }
 0x17b   : > { %v1605_v10 = vadd.f32 %v1580_v39, %v1402_v20  ;;  %v1587_v23 = vpop.f32.mrf.mxu3 }
 0x17c   : > { %v1608_v31 = vadd.f32 %v1587_v23, %v1409_v60 }
 0x17d   : > { %v3144_v33 = vadd.f32 %v3029_v6, %v1605_v10 }
 0x17e   : > { %v3147_v13 = vadd.f32 %v3029_v6, %v1608_v31  ;;  %v1403_v36 = vpop.f32.mrf.mxu1 }
 0x17f   : > { %v1751_v27 = vpack.c.bf16 %v3144_v33, %v3144_v33  ;;  %v1404_v47 = vadd.f32 %v1403_v36, %v1254_v45  ;;  %v1650_v5 = vsel %vm916_vm6, %v3144_v33, 0.0 }
 0x180   : > { %v1754_v46 = vpack.c.bf16 %v3147_v13, %v3147_v13  ;;  %v1651_v44 = vadd.f32 %v1650_v5, %v1649_v61  ;;  %v1656_v4 = vsel %vm916_vm6, %v3147_v13, 0.0 }
 0x181   : > { %1768 = vst.msk [vmem:[%s3039_s10 + $0x28] sm:$0xf] %vm1757_vm10, %v1751_v27 }
 0x182   : > { %1771 = vst.msk [vmem:[%s3039_s10 + $0x34] sm:$0xf] %vm1757_vm10, %v1754_v46  ;;  %v1582_v50 = vpop.f32.mrf.mxu2 }
 0x183   : > { %v1606_v7 = vadd.f32 %v1582_v50, %v1404_v47  ;;  %v1590_v54 = vpop.f32.mrf.mxu3 }
 0x184   : > { %v1609_v51 = vadd.f32 %v1590_v54, %v1412_v48 }
 0x185   : > { %v3165_v37 = vadd.f32 %v3029_v6, %v1606_v7 }
 0x186   : > { %v3168_v55 = vadd.f32 %v3029_v6, %v1609_v51 }
 0x187   : > { %v1652_v12 = vsel %vm916_vm6, %v3165_v37, 0.0  ;;  %v1752_v38 = vpack.c.bf16 %v3165_v37, %v3165_v37 }
 0x188   : > { %v1653_v9 = vadd.f32 %v1652_v12, %v1651_v44  ;;  %v1755_v56 = vpack.c.bf16 %v3168_v55, %v3168_v55  ;;  %v1658_v22 = vsel %vm916_vm6, %v3168_v55, 0.0 }
 0x189   : > { %1769 = vst.msk [vmem:[%s3039_s10 + $0x2c] sm:$0xf] %vm1757_vm10, %v1752_v38 }
 0x18a   : > { %v1655_v0 = vadd.f32 %v1654_v57, %v1653_v9  ;;  %1772 = vst.msk [vmem:[%s3039_s10 + $0x38] sm:$0xf] %vm1757_vm10, %v1755_v56 }
 0x18b   : > { %v1592_v17 = vpop.f32.mrf.mxu3 }
 0x18c   : > { %v1657_v21 = vadd.f32 %v1656_v4, %v1655_v0  ;;  %v1610_v52 = vadd.f32 %v1592_v17, %v1414_v63 }
 0x18e   : > { %v1659_v42 = vadd.f32 %v1658_v22, %v1657_v21  ;;  %v3189_v43 = vadd.f32 %v3029_v6, %v1610_v52 }
 0x190   : > { %v1660_v19 = vsel %vm916_vm6, %v3189_v43, 0.0  ;;  %v1756_v14 = vpack.c.bf16 %v3189_v43, %v3189_v43 }
 0x191   : > { %v1661_v32 = vadd.f32 %v1660_v19, %v1659_v42 }
 0x192   : > { %1773 = vst.msk [vmem:[%s3039_s10 + $0x3c] sm:$0xf] %vm1757_vm10, %v1756_v14 }
 0x193   : > { %v1662_v16 = vrot.slane %v1661_v32, 4 }
 0x195   : > { %v1663_v18 = vadd.f32 %v1662_v16, %v1661_v32 }
 0x197   : > { %v1664_v35 = vrot.slane %v1663_v18, 2 }
 0x199   : > { %v1665_v20 = vadd.f32 %v1664_v35, %v1663_v18 }
 0x19b   : > { %v1666_v59 = vrot.slane %v1665_v20, 1 }
 0x19d   : > { %v1667_v6 = vadd.f32 %v1666_v59, %v1665_v20 }
 0x19f   : > { %v1668_v60 = vmul.f32 0.0078125, %v1667_v6  ;;  %1686 = vst.msk [vmem:[%s476_s21] sm:$0x1] %vm1685_vm11, %v1667_v6 }
 0x1a1   : > { %v1669_v39 = vsub.f32 %v3032_v15, %v1668_v60  ;;  %v1670_v62 = vsub.f32 %v3048_v53, %v1668_v60  ;;  %v1671_v10 = vsub.f32 %v3057_v3, %v1668_v60  ;;  %v1672_v23 = vsub.f32 %v3066_v28, %v1668_v60 }
 0x1a2   : > { %v1673_v1 = vsub.f32 %v3075_v58, %v1668_v60  ;;  %v1674_v36 = vsub.f32 %v3082_v24, %v1668_v60  ;;  %v1675_v15 = vsub.f32 %v3089_v25, %v1668_v60  ;;  %v1676_v28 = vsub.f32 %v3096_v41, %v1668_v60 }
 0x1a3   : > { %v1687_v30 = vmul.f32 %v1669_v39, %v1669_v39  ;;  %v1688_v31 = vmul.f32 %v1670_v62, %v1670_v62  ;;  %v1689_v34 = vmul.f32 %v1671_v10, %v1671_v10  ;;  %v1690_v40 = vmul.f32 %v1672_v23, %v1672_v23 }
 0x1a4   : > { %v1691_v53 = vmul.f32 %v1673_v1, %v1673_v1  ;;  %v1692_v2 = vmul.f32 %v1674_v36, %v1674_v36  ;;  %v1677_v24 = vsub.f32 %v3105_v8, %v1668_v60  ;;  %v1693_v48 = vmul.f32 %v1675_v15, %v1675_v15 }
 0x1a5   : > { %v1703_v27 = vsel %vm916_vm6, %v1687_v30, 0.0  ;;  %v1704_v29 = vsel %vm916_vm6, %v1688_v31, 0.0  ;;  %v1706_v3 = vsel %vm916_vm6, %v1689_v34, 0.0  ;;  %v1708_v58 = vsel %vm916_vm6, %v1690_v40, 0.0 }
 0x1a6   : > { %v1705_v45 = vadd.f32 %v1704_v29, %v1703_v27  ;;  %v1710_v49 = vsel %vm916_vm6, %v1691_v53, 0.0  ;;  %v1678_v5 = vsub.f32 %v3121_v11, %v1668_v60  ;;  %v1694_v7 = vmul.f32 %v1676_v28, %v1676_v28 }
 0x1a7   : > { %v1712_v25 = vsel %vm916_vm6, %v1692_v2, 0.0  ;;  %v1679_v61 = vsub.f32 %v3144_v33, %v1668_v60  ;;  %v1695_v51 = vmul.f32 %v1677_v24, %v1677_v24  ;;  %v1714_v41 = vsel %vm916_vm6, %v1693_v48, 0.0 }
 0x1a8   : > { %v1707_v46 = vadd.f32 %v1706_v3, %v1705_v45  ;;  %v1680_v12 = vsub.f32 %v3165_v37, %v1668_v60  ;;  %v1696_v38 = vmul.f32 %v1678_v5, %v1678_v5  ;;  %v1716_v8 = vsel %vm916_vm6, %v1694_v7, 0.0 }
 0x1a9   : > { %v1681_v56 = vsub.f32 %v3124_v26, %v1668_v60  ;;  %v1697_v57 = vmul.f32 %v1679_v61, %v1679_v61  ;;  %v1718_v11 = vsel %vm916_vm6, %v1695_v51, 0.0  ;;  %v1682_v0 = vsub.f32 %v3147_v13, %v1668_v60 }
 0x1aa   : > { %v1709_v47 = vadd.f32 %v1708_v58, %v1707_v46  ;;  %v1698_v4 = vmul.f32 %v1680_v12, %v1680_v12  ;;  %v1720_v33 = vsel %vm916_vm6, %v1696_v38, 0.0  ;;  %v1683_v21 = vsub.f32 %v3168_v55, %v1668_v60 }
 0x1ab   : > { %v1699_v52 = vmul.f32 %v1681_v56, %v1681_v56  ;;  %v1722_v37 = vsel %vm916_vm6, %v1697_v57, 0.0  ;;  %v1684_v42 = vsub.f32 %v3189_v43, %v1668_v60  ;;  %v1700_v19 = vmul.f32 %v1682_v0, %v1682_v0 }
 0x1ac   : > { %v1711_v50 = vadd.f32 %v1710_v49, %v1709_v47  ;;  %v1724_v26 = vsel %vm916_vm6, %v1698_v4, 0.0  ;;  %v1701_v32 = vmul.f32 %v1683_v21, %v1683_v21 }
 0x1ad   : > { %v1726_v13 = vsel %vm916_vm6, %v1699_v52, 0.0  ;;  %v1702_v18 = vmul.f32 %v1684_v42, %v1684_v42  ;;  %v1728_v35 = vsel %vm916_vm6, %v1700_v19, 0.0 }
 0x1ae   : > { %v1713_v54 = vadd.f32 %v1712_v25, %v1711_v50  ;;  %v1730_v55 = vsel %vm916_vm6, %v1701_v32, 0.0 }
 0x1af   : > { %v1732_v6 = vsel %vm916_vm6, %v1702_v18, 0.0 }
 0x1b0   : > { %v1715_v44 = vadd.f32 %v1714_v41, %v1713_v54 }
 0x1b2   : > { %v1717_v9 = vadd.f32 %v1716_v8, %v1715_v44 }
 0x1b4   : > { %v1719_v63 = vadd.f32 %v1718_v11, %v1717_v9 }
 0x1b6   : > { %v1721_v17 = vadd.f32 %v1720_v33, %v1719_v63 }
 0x1b8   : > { %v1723_v22 = vadd.f32 %v1722_v37, %v1721_v17 }
 0x1ba   : > { %v1725_v14 = vadd.f32 %v1724_v26, %v1723_v22 }
 0x1bc   : > { %v1727_v16 = vadd.f32 %v1726_v13, %v1725_v14 }
 0x1be   : > { %v1729_v20 = vadd.f32 %v1728_v35, %v1727_v16 }
 0x1c0   : > { %v1731_v59 = vadd.f32 %v1730_v55, %v1729_v20 }
 0x1c2   : > { %v1733_v39 = vadd.f32 %v1732_v6, %v1731_v59 }
 0x1c4   : > { %v1734_v43 = vrot.slane %v1733_v39, 4 }
 0x1c6   : > { %v1735_v60 = vadd.f32 %v1734_v43, %v1733_v39 }
 0x1c8   : > { %v1736_v62 = vrot.slane %v1735_v60, 2 }
 0x1ca   : > { %v1737_v10 = vadd.f32 %v1736_v62, %v1735_v60 }
 0x1cc   : > { %v1738_v23 = vrot.slane %v1737_v10, 1 }
 0x1ce   : > { %v1739_v30 = vadd.f32 %v1738_v23, %v1737_v10 }
 0x1d0   : > { %1740 = vst.msk [vmem:[%s483_s17] sm:$0x1] %vm1685_vm11, %v1739_v30 }
 0x1d1 PF: > { %s18_s28 = sadd.s32 1, %s2443_s28   ;;  %s3265_s24 = smov %s2435_s26 }
 0x1d2   : > { %p15_p12 = scmp.ge.s32.totalorder %s18_s28, 6   ;;  %s3266_s25 = smov %s2439_s27 }
 0x1d3   : > { %s3267_s26 = smov %s3270_s29  ;;  %s3268_s27 = smov %s3274_s30 }
 0x1d4   :  { %17 = sbr.rel (!%p15_p12) target bundleno = 3 (0x3), region = 104 }

// kernel: dncnn_forward.7
= control target key start
LH: loop header
LB: loop body
LE: loop exit
PB: predicated region body
PF: predicated region fallthrough
CT: control target
= control target key end

     0   :  { %s2621_s30 = smov 0   ;;  %s2623_s10 = smov 0   ;;  %s3448_s0 = inlined_call_operand.vmem [shape: f32[1,32], index: 0, kind: input, shape index: {}]   ;;  %s3449_s1 = inlined_call_operand.vmem [shape: f32[1,32], index: 1, kind: input, shape index: {}]   ;;  %s3450_s2 = inlined_call_operand.vmem [shape: bf16[2,16,16,32], index: 2, kind: input, shape index: {}, may-alias: {2,3,4}]   ;;  %s3451_s3 = inlined_call_operand.vmem [shape: bf16[2,16,16,32], index: 3, kind: input, shape index: {}, may-alias: {2,3,4}]   ;;  %s3452_s4 = inlined_call_operand.vmem [shape: bf16[2,16,16,32], index: 4, kind: input, shape index: {}, may-alias: {2,3,4}]   ;;  %s3453_s5 = inlined_call_operand.vmem [shape: bf16[3,96,32], index: 5, kind: input, shape index: {}]   ;;  %s3454_s6 = inlined_call_operand.vmem [shape: f32[1,32], index: 6, kind: input, shape index: {}]   ;;  %s3455_s7 = inlined_call_operand.vmem [shape: bf16[2,16,16,32], index: 7, kind: output, shape index: {0}]   ;;  %s3456_s8 = inlined_call_operand.vmem [shape: f32[2,2,1,32], index: 8, kind: output, shape index: {1}]   ;;  %s3457_s9 = inlined_call_operand.vmem [shape: f32[2,2,1,32], index: 9, kind: output, shape index: {2}]  }
   0x1   :  { %s2625_s11 = smov 0   ;;  %s2627_s12 = smov 0  }
   0x2   :  { %s2629_s13 = smov 0  }
   0x3 LB: > { %s29_s14 = sadd.s32 1, %s2559_s11  ;;  %s32_s15 = sadd.s32 1, %s2563_s12  ;;  %s2567_s13 = sphi %s2629_s13, %s20_s13   ;;  %s2563_s12 = sphi %s2627_s12, %s3464_s12   ;;  %s2559_s11 = sphi %s2625_s11, %s3463_s11   ;;  %s2555_s10 = sphi %s2623_s10, %s3462_s10   ;;  %s2551_s30 = sphi %s2621_s30, %s3461_s30  }
   0x4   : > { %p30_p0 = scmp.ge.s32.totalorder %s29_s14, 2  ;;  %p2129_p1 = scmp.ge.s32.totalorder %s2567_s13, 1 }
   0x5   : > { %p382_p2 = scmp.lt.s32.totalorder %s2567_s13, 5 }
   0x6   : > { %s3466_s14 = smov (%p30_p0, %s29_s14), 0  ;;  %s3468_s15 = smov (!%p30_p0, %s32_s15), %s2563_s12 }
   0x7   : > { %p383_p3 = pnand %p2129_p1, %p382_p2  ;;  %p34_p4 = scmp.ge.s32.totalorder %s3468_s15, 2 }
   0x8   : > { %s2654_s16 = sshll.u32 (!%p383_p3), %s2551_s30, 3  ;;  %p469_p5 = scmp.lt.s32.totalorder (!%p383_p3), %s2555_s10, 1 }
   0x9   : > { %s3470_s15 = smov (%p34_p4, %s3468_s15), 0  ;;  %386 = sbr.rel (%p383_p3) target bundleno = 473 (0x1d9), region = 48 }
   0xa   : > { %p471_p6 = scmp.lt.s32.totalorder (!%p383_p3), %s2654_s16, 15  ;;  %s2135_s20 = sadd.s32 (!%p383_p3), 4294967295, %s2654_s16 }
   0xb   : > { %p481_p7 = scmp.gt.s32.totalorder (!%p383_p3), %s2135_s20, 0  ;;  %p2136_p8 = scmp.lt.s32.totalorder (!%p383_p3), %s2135_s20, 15 }
   0xc   : > { %p627_p9 = scmp.gt.s32.totalorder (!%p383_p3), %s2551_s30, 0  ;;  %p526_p10 = scmp.lt.s32.totalorder (!%p383_p3), %s2551_s30, 1 }
   0xe   : > { %s3472_s10 = smov (!%p469_p5, %s2555_s10), 1  ;;  %v659_v0 = vlaneseq  ;;  %v2680_v2 = vld [vmem:[%s3448_s0] ss:$0 sm:$0xff]  ;;  %vm1038_vm6 = vcmask 261120   ;;  %vm1069_vm7 = vcmask 523264   ;;  %vm1160_vm8 = vcmask 781312  }
   0xf   : > { %s472_s17 = scalar_select %p471_p6, %s2654_s16, 15  ;;  %v2688_v8 = vld [vmem:[%s3449_s1] ss:$0 sm:$0xff]  ;;  %vm1315_vm9 = vcmask 785408   ;;  %vm1879_vm10 = vcmask 257024   ;;  %vm1807_vm11 = vcmask 253952  }
  0x10   : > { %s2661_s18 = sshll.u32 %s3472_s10, 5  ;;  %v2668_v1 = vshrl.u32 %v659_v0, 7  ;;  %s2155_s29 = sshll.u32 %s3472_s10, 1 }
  0x11   : > { %s2131_s19 = sshll.u32 %s472_s17, 1 }
  0x12   : > { %s2665_s21 = sadd.s32 %s2661_s18, %s2131_s19  ;;  %v2693_v12 = vadd.s32 8, %v2668_v1  ;;  %vm747_vm1 = vcmp.lt.s32.totalorder %v2668_v1, 7  ;;  %vm684_vm4 = vcmp.lt.s32.totalorder %v2668_v1, 1  ;;  %vm662_vm5 = vcmp.eq.s32.totalorder %v2668_v1, 0 }
  0x13   : > { %s2133_s22 = sshll.u32 %s2665_s21, 2 }
  0x14   : > { %s2675_s25 = scalar_lea.vmem %s3450_s2, %s2133_s22  ;;  %vm726_vm0 = vcmp.eq.s32.totalorder %v2693_v12, 15 }
  0x15   : > { %v2459_v3 = vld [vmem:[%s2675_s25 + $0x8] sm:$0xff]   ;;  %v2420_v4 = vld [vmem:[%s2675_s25] sm:$0xff]   ;;  %s482_s28 = scalar_select %p481_p7, %s2135_s20, 0  ;;  %v2464_v5 = vld [vmem:[%s2675_s25 + $0x30] sm:$0xff]  }
  0x16   : > { %v2425_v6 = vunpack.c.l.bf16 %v2459_v3  ;;  %v2426_v7 = vunpack.c.h.bf16 %v2459_v3  ;;  %v2421_v9 = vunpack.c.l.bf16 %v2420_v4  ;;  %v2422_v10 = vunpack.c.h.bf16 %v2420_v4  ;;  %v2460_v11 = vld [vmem:[%s2675_s25 + $0x10] sm:$0xff]   ;;  %s638_s19 = scalar_select %p627_p9, 1, 0 }
  0x17   : > { %s3474_s28 = smov (!%p2136_p8, %s482_s28), 15  ;;  %v2445_v13 = vunpack.c.l.bf16 %v2464_v5  ;;  %v2446_v14 = vunpack.c.h.bf16 %v2464_v5  ;;  %v2429_v15 = vunpack.c.l.bf16 %v2460_v11  ;;  %v2430_v22 = vunpack.c.h.bf16 %v2460_v11 }
  0x18   : > { %v578_v16 = vmul.f32 %v2680_v2, %v2425_v6  ;;  %v579_v17 = vmul.f32 %v2680_v2, %v2426_v7  ;;  %v576_v18 = vmul.f32 %v2680_v2, %v2421_v9  ;;  %v577_v19 = vmul.f32 %v2680_v2, %v2422_v10  ;;  %s2141_s23 = sshll.u32 %s3474_s28, 1 }
  0x19   : > { %v588_v20 = vmul.f32 %v2680_v2, %v2445_v13  ;;  %v589_v21 = vmul.f32 %v2680_v2, %v2446_v14  ;;  %v580_v23 = vmul.f32 %v2680_v2, %v2429_v15  ;;  %s489_s20 = sadd.s32 %s2141_s23, %s2661_s18  ;;  %v639_v28 = vstv %s638_s19  ;;  %s2569_s19 = smov 32  }
  0x1a   : > { %v597_v24 = vadd.f32 %v2688_v8, %v578_v16  ;;  %v598_v25 = vadd.f32 %v2688_v8, %v579_v17  ;;  %v595_v26 = vadd.f32 %v2688_v8, %v576_v18  ;;  %v596_v27 = vadd.f32 %v2688_v8, %v577_v19  ;;  %s2143_s24 = sshll.u32 %s489_s20, 2  ;;  %s497_s23 = sadd.s32 8, %s2654_s16 }
  0x1b   : > { %v607_v29 = vadd.f32 %v2688_v8, %v588_v20  ;;  %v608_v30 = vadd.f32 %v2688_v8, %v589_v21  ;;  %s491_s28 = scalar_lea.vmem %s3451_s3, %s2143_s24  ;;  %v581_v35 = vmul.f32 %v2680_v2, %v2430_v22  ;;  %vm2730_vm2 = vcmp.eq.s32.totalorder %v639_v28, 1  ;;  %p2799_p11 = scmp.lt.s32.totalorder %s497_s23, 15 }
  0x1c   : > { %v2710_v31 = vmax.f32 %v597_v24, 0.0  ;;  %v2712_v32 = vmax.f32 %v598_v25, 0.0  ;;  %v2714_v33 = vmax.f32 %v595_v26, 0.0  ;;  %v2716_v34 = vmax.f32 %v596_v27, 0.0  ;;  %v2452_v38 = vld [vmem:[%s491_s28] sm:$0xff]   ;;  %s527_s17 = scalar_select %p526_p10, %s2551_s30, 1 }
  0x1d   : > { %v599_v40 = vadd.f32 %v2688_v8, %v580_v23  ;;  %v2742_v43 = vmax.f32 %v607_v29, 0.0  ;;  %v2744_v44 = vmax.f32 %v608_v30, 0.0  ;;  %v2453_v51 = vunpack.c.l.bf16 %v2452_v38  ;;  %s2570_s24 = smov 64   ;;  %s3476_s23 = smov (!%p2799_p11, %s497_s23), 15 }
  0x1e   : > { %v812_v36 = vpack.c.bf16 %v2710_v31, %v2710_v31  ;;  %v813_v37 = vpack.c.bf16 %v2712_v32, %v2712_v32  ;;  %v810_v41 = vpack.c.bf16 %v2714_v33, %v2714_v33  ;;  %v811_v42 = vpack.c.bf16 %v2716_v34, %v2716_v34  ;;  %s2748_s10 = sadd.s32 %s2155_s29, %s527_s17  ;;  %s3478_s23 = smov (!%p2799_p11, %s3476_s23), 15 }
  0x1f   : > { %v729_v47 = vrot.slane %v2710_v31, 1  ;;  %v739_v48 = vrot.slane %v2712_v32, 1  ;;  %v2454_v52 = vunpack.c.h.bf16 %v2452_v38  ;;  %v822_v56 = vpack.c.bf16 %v2742_v43, %v2742_v43  ;;  %s2856_s16 = sshll.u32 %s3478_s23, 1  ;;  %s3233_s17 = scalar_lea.vmem %s3455_s7, %s2133_s22 }
  0x20   : > { %v922_v45 = vunpack.c.l.b16 %v812_v36  ;;  %v923_v46 = vunpack.c.l.b16 %v813_v37  ;;  %v920_v49 = vunpack.c.l.b16 %v810_v41  ;;  %v921_v50 = vunpack.c.l.b16 %v811_v42  ;;  %s654_s29 = scalar_select %p526_p10, 1, 0 }
  0x21   : > { %v750_v54 = vsel %vm747_vm1, %v729_v47, %v739_v48  ;;  %v760_v55 = vsel %vm747_vm1, %v739_v48, %v729_v47  ;;  %v632_v60 = vmul.f32 %v2680_v2, %v2453_v51  ;;  %v633_v62 = vmul.f32 %v2680_v2, %v2454_v52 }
  0x22   : > { %v940_v53 = vpack.c.b16 %v923_v46, %v922_v45  ;;  %v939_v57 = vpack.c.b16 %v921_v50, %v920_v49  ;;  %v773_v58 = vsel %vm726_vm0, 0.0, %v760_v55  ;;  %v832_v59 = vpack.c.bf16 %v750_v54, %v750_v54  ;;  %v2465_v54 = vld [vmem:[%s2675_s25 + $0x38] sm:$0xff]  }
  0x23   : > { %v833_v61 = vpack.c.bf16 %v773_v58, %v773_v58  ;;  %v823_v63 = vpack.c.bf16 %v2744_v44, %v2744_v44  ;;  %v600_v0 = vadd.f32 %v2688_v8, %v581_v35  ;;  %v634_v4 = vadd.f32 %v2688_v8, %v632_v60 }
  0x24   : > { %952 = vrot.lane.b32.xlu0 %v940_v53, %s2569_s19  ;;  %950 = vrot.lane.b32.xlu1 %v939_v57, %s2569_s19  ;;  %v992_v3 = vunpack.c.l.b16 %v832_v59  ;;  %v734_v5 = vrot.slane %v2742_v43, 1  ;;  %v744_v6 = vrot.slane %v2744_v44, 1  ;;  %v635_v9 = vadd.f32 %v2688_v8, %v633_v62  ;;  %v2461_v59 = vld [vmem:[%s2675_s25 + $0x18] sm:$0xff]  }
  0x25   : > { %v993_v7 = vunpack.c.l.b16 %v833_v61  ;;  %v932_v10 = vunpack.c.l.b16 %v822_v56  ;;  %v2769_v11 = vmax.f32 %v599_v40, 0.0  ;;  %v636_v13 = vmax.f32 %v634_v4, 0.0 }
  0x26   : > { %v933_v14 = vunpack.c.l.b16 %v823_v63  ;;  %v755_v15 = vsel %vm747_vm1, %v734_v5, %v744_v6  ;;  %v765_v16 = vsel %vm747_vm1, %v744_v6, %v734_v5  ;;  %v637_v18 = vmax.f32 %v635_v9, 0.0 }
  0x27   : > { %v1010_v17 = vpack.c.b16 %v993_v7, %v992_v3  ;;  %v783_v19 = vsel %vm726_vm0, 0.0, %v765_v16  ;;  %v2777_v20 = vmax.f32 %v600_v0, 0.0  ;;  %v2782_v21 = vsel %vm2730_vm2, %v636_v13, 0.0 }
  0x28   : > { %v842_v22 = vpack.c.bf16 %v755_v15, %v755_v15  ;;  %v843_v23 = vpack.c.bf16 %v783_v19, %v783_v19  ;;  %v2786_v24 = vsel %vm2730_vm2, %v637_v18, 0.0  ;;  %v808_v25 = vpack.c.bf16 %v2782_v21, %v2782_v21 }
  0x29   : > { %v727_v26 = vrot.slane %v2782_v21, 1  ;;  %v730_v27 = vrot.slane %v2769_v11, 1  ;;  %v809_v28 = vpack.c.bf16 %v2786_v24, %v2786_v24  ;;  %v945_v29 = vpack.c.b16 %v933_v14, %v932_v10 }
  0x2a   : > { %v737_v30 = vrot.slane %v2786_v24, 1  ;;  %v2795_v35 = vunpack.c.l.b16 %v842_v22  ;;  %v918_v36 = vunpack.c.l.b16 %v808_v25  ;;  %v1003_v37 = vunpack.c.l.b16 %v843_v23 }
  0x2b   : > { %v740_v38 = vrot.slane %v2777_v20, 1  ;;  %v728_v39 = vrot.slane %v2714_v33, 1  ;;  %v919_v40 = vunpack.c.l.b16 %v809_v28  ;;  %v738_v45 = vrot.slane %v2716_v34, 1 }
  0x2c   : > { %1022 = vrot.lane.b32.xlu0 %v1010_v17, %s2570_s24  ;;  %v748_v41 = vsel %vm747_vm1, %v727_v26, %v737_v30  ;;  %v758_v42 = vsel %vm747_vm1, %v737_v30, %v727_v26  ;;  %v1015_v48 = vpack.c.b16 %v1003_v37, %v2795_v35  ;;  %v2449_v4 = vunpack.c.l.bf16 %v2465_v54  ;;  %v2463_v17 = vld [vmem:[%s2675_s25 + $0x28] sm:$0xff]  }
  0x2d   : > { %v769_v46 = vsel %vm726_vm0, 0.0, %v758_v42  ;;  %v828_v47 = vpack.c.bf16 %v748_v41, %v748_v41  ;;  %v751_v49 = vsel %vm747_vm1, %v730_v27, %v740_v38  ;;  %v938_v50 = vpack.c.b16 %v919_v40, %v918_v36 }
  0x2e   : > { %v829_v51 = vpack.c.bf16 %v769_v46, %v769_v46  ;;  %v761_v52 = vsel %vm747_vm1, %v740_v38, %v730_v27  ;;  %v834_v53 = vpack.c.bf16 %v751_v49, %v751_v49  ;;  %v749_v57 = vsel %vm747_vm1, %v728_v39, %v738_v45 }
  0x2f   : > { %v988_v55 = vunpack.c.l.b16 %v828_v47  ;;  %v775_v56 = vsel %vm726_vm0, 0.0, %v761_v52  ;;  %v759_v58 = vsel %vm747_vm1, %v738_v45, %v728_v39  ;;  %948 = vrot.lane.b32.xlu1 %v938_v50, %s2569_s19  ;;  %v830_v0 = vpack.c.bf16 %v749_v57, %v749_v57 }
  0x30   : > { %v989_v60 = vunpack.c.l.b16 %v829_v51  ;;  %v835_v61 = vpack.c.bf16 %v775_v56, %v775_v56  ;;  %v994_v62 = vunpack.c.l.b16 %v834_v53  ;;  %v771_v63 = vsel %vm726_vm0, 0.0, %v759_v58 }
  0x31   : > { %v831_v3 = vpack.c.bf16 %v771_v63, %v771_v63  ;;  %v2450_v5 = vunpack.c.h.bf16 %v2465_v54  ;;  %v2433_v9 = vunpack.c.l.bf16 %v2461_v59  ;;  %v2434_v10 = vunpack.c.h.bf16 %v2461_v59 }
  0x32   : > { %v1008_v6 = vpack.c.b16 %v989_v60, %v988_v55  ;;  %v995_v7 = vunpack.c.l.b16 %v835_v61  ;;  %v990_v13 = vunpack.c.l.b16 %v830_v0  ;;  %v590_v15 = vmul.f32 %v2680_v2, %v2449_v4 }
  0x33   : > { %v991_v14 = vunpack.c.l.b16 %v831_v3  ;;  %v591_v16 = vmul.f32 %v2680_v2, %v2450_v5  ;;  %v582_v19 = vmul.f32 %v2680_v2, %v2433_v9  ;;  %v583_v22 = vmul.f32 %v2680_v2, %v2434_v10 }
  0x34   : > { %962 = vrot.lane.b32.xlu0 %v945_v29, %s2569_s19  ;;  %1018 = vrot.lane.b32.xlu2 %v1008_v6, %s2570_s24  ;;  %v1011_v18 = vpack.c.b16 %v995_v7, %v994_v62  ;;  %v814_v23 = vpack.c.bf16 %v2769_v11, %v2769_v11  ;;  %v609_v26 = vadd.f32 %v2688_v8, %v590_v15  ;;  %v2462_v29 = vld [vmem:[%s2675_s25 + $0x20] sm:$0xff]   ;;  %v2441_v37 = vunpack.c.l.bf16 %v2463_v17  ;;  %s506_s25 = sadd.s32 %s2856_s16, %s2661_s18 }
  0x35   : > { %v1009_v25 = vpack.c.b16 %v991_v14, %v990_v13  ;;  %v610_v27 = vadd.f32 %v2688_v8, %v591_v16  ;;  %v815_v28 = vpack.c.bf16 %v2777_v20, %v2777_v20  ;;  %v601_v30 = vadd.f32 %v2688_v8, %v582_v19  ;;  %s2150_s18 = sshll.u32 %s506_s25, 2 }
  0x36   : > { %v602_v35 = vadd.f32 %v2688_v8, %v583_v22  ;;  %v2854_v36 = vunpack.c.l.b16 %v814_v23  ;;  %v2858_v38 = vmax.f32 %v609_v26, 0.0  ;;  %v2442_v41 = vunpack.c.h.bf16 %v2463_v17  ;;  %s508_s28 = scalar_lea.vmem %s3452_s4, %s2150_s18 }
  0x37   : > { %v2860_v39 = vmax.f32 %v610_v27, 0.0  ;;  %v925_v40 = vunpack.c.l.b16 %v815_v28  ;;  %1032 = vrot.lane.b32.xlu1 %v1015_v48, %s2570_s24  ;;  %v2863_v42 = vmax.f32 %v601_v30, 0.0  ;;  %v586_v46 = vmul.f32 %v2680_v2, %v2441_v37  ;;  %v2456_v30 = vld [vmem:[%s508_s28] sm:$0xff]  }
  0x38   : > { %v2865_v45 = vmax.f32 %v602_v35, 0.0  ;;  %v2437_v47 = vunpack.c.l.bf16 %v2462_v29  ;;  %v824_v49 = vpack.c.bf16 %v2858_v38, %v2858_v38  ;;  %v587_v52 = vmul.f32 %v2680_v2, %v2442_v41 }
  0x39   : > { %v825_v50 = vpack.c.bf16 %v2860_v39, %v2860_v39  ;;  %v941_v51 = vpack.c.b16 %v925_v40, %v2854_v36  ;;  %v816_v48 = vpack.c.bf16 %v2863_v42, %v2863_v42  ;;  %v731_v54 = vrot.slane %v2863_v42, 1 }
  0x3a   : > { %v817_v53 = vpack.c.bf16 %v2865_v45, %v2865_v45  ;;  %v741_v55 = vrot.slane %v2865_v45, 1  ;;  %v934_v56 = vunpack.c.l.b16 %v824_v49  ;;  %v605_v58 = vadd.f32 %v2688_v8, %v586_v46 }
  0x3b   : > { %v935_v57 = vunpack.c.l.b16 %v825_v50  ;;  %v606_v59 = vadd.f32 %v2688_v8, %v587_v52  ;;  %v926_v60 = vunpack.c.l.b16 %v816_v48  ;;  %v2438_v10 = vunpack.c.h.bf16 %v2462_v29 }
  0x3c   : > { %1024 = vrot.lane.b32.xlu0 %v1011_v18, %s2570_s24  ;;  %1020 = vrot.lane.b32.xlu2 %v1009_v25, %s2570_s24  ;;  %v927_v61 = vunpack.c.l.b16 %v817_v53  ;;  %v752_v62 = vsel %vm747_vm1, %v731_v54, %v741_v55  ;;  %v762_v63 = vsel %vm747_vm1, %v741_v55, %v731_v54  ;;  %v2892_v5 = vmax.f32 %v605_v58, 0.0 }
  0x3d   : > { %v946_v0 = vpack.c.b16 %v935_v57, %v934_v56  ;;  %v777_v3 = vsel %vm726_vm0, 0.0, %v762_v63  ;;  %v836_v4 = vpack.c.bf16 %v752_v62, %v752_v62  ;;  %v2894_v9 = vmax.f32 %v606_v59, 0.0 }
  0x3e   : > { %v942_v6 = vpack.c.b16 %v927_v61, %v926_v60  ;;  %v837_v7 = vpack.c.bf16 %v777_v3, %v777_v3  ;;  %v733_v14 = vrot.slane %v2892_v5, 1  ;;  %v584_v15 = vmul.f32 %v2680_v2, %v2437_v47 }
  0x3f   : > { %v996_v13 = vunpack.c.l.b16 %v836_v4  ;;  %v735_v16 = vrot.slane %v2858_v38, 1  ;;  %964 = vrot.lane.b32.xlu1 %v946_v0, %s2569_s19  ;;  %v743_v18 = vrot.slane %v2894_v9, 1  ;;  %v585_v19 = vmul.f32 %v2680_v2, %v2438_v10 }
  0x40   : > { %v997_v17 = vunpack.c.l.b16 %v837_v7  ;;  %v745_v22 = vrot.slane %v2860_v39, 1  ;;  %v603_v23 = vadd.f32 %v2688_v8, %v584_v15  ;;  %v820_v25 = vpack.c.bf16 %v2892_v5, %v2892_v5 }
  0x41   : > { %v754_v27 = vsel %vm747_vm1, %v733_v14, %v743_v18  ;;  %v764_v28 = vsel %vm747_vm1, %v743_v18, %v733_v14  ;;  %v604_v29 = vadd.f32 %v2688_v8, %v585_v19  ;;  %v2457_v53 = vunpack.c.l.bf16 %v2456_v30 }
  0x42   : > { %v1012_v26 = vpack.c.b16 %v997_v17, %v996_v13  ;;  %v781_v35 = vsel %vm726_vm0, 0.0, %v764_v28  ;;  %v840_v36 = vpack.c.bf16 %v754_v27, %v754_v27  ;;  %v2917_v37 = vmax.f32 %v603_v23, 0.0 }
  0x43   : > { %v756_v40 = vsel %vm747_vm1, %v735_v16, %v745_v22  ;;  %v841_v41 = vpack.c.bf16 %v781_v35, %v781_v35  ;;  %v2922_v46 = vmax.f32 %v604_v29, 0.0  ;;  %v766_v47 = vsel %vm747_vm1, %v745_v22, %v735_v16 }
  0x44   : > { %956 = vrot.lane.b32.xlu0 %v942_v6, %s2569_s19  ;;  %954 = vrot.lane.b32.xlu2 %v941_v51, %s2569_s19  ;;  %v844_v49 = vpack.c.bf16 %v756_v40, %v756_v40  ;;  %v1000_v50 = vunpack.c.l.b16 %v840_v36  ;;  %v818_v52 = vpack.c.bf16 %v2917_v37, %v2917_v37  ;;  %v785_v48 = vsel %vm726_vm0, 0.0, %v766_v47 }
  0x45   : > { %v1001_v54 = vunpack.c.l.b16 %v841_v41  ;;  %v819_v51 = vpack.c.bf16 %v2922_v46, %v2922_v46  ;;  %v845_v55 = vpack.c.bf16 %v785_v48, %v785_v48  ;;  %v821_v58 = vpack.c.bf16 %v2894_v9, %v2894_v9 }
  0x46   : > { %v1004_v56 = vunpack.c.l.b16 %v844_v49  ;;  %v928_v57 = vunpack.c.l.b16 %v818_v52  ;;  %v732_v59 = vrot.slane %v2917_v37, 1  ;;  %v742_v60 = vrot.slane %v2922_v46, 1 }
  0x47   : > { %1026 = vrot.lane.b32.xlu1 %v1012_v26, %s2570_s24  ;;  %v1014_v61 = vpack.c.b16 %v1001_v54, %v1000_v50  ;;  %v929_v62 = vunpack.c.l.b16 %v819_v51  ;;  %v1005_v63 = vunpack.c.l.b16 %v845_v55  ;;  %v2458_v0 = vunpack.c.h.bf16 %v2456_v30 }
  0x48   : > { %v648_v3 = vmul.f32 %v2680_v2, %v2457_v53  ;;  %v763_v6 = vsel %vm747_vm1, %v742_v60, %v732_v59  ;;  %v930_v7 = vunpack.c.l.b16 %v820_v25  ;;  %v655_v14 = vstv %s654_s29 }
  0x49   : > { %v1016_v4 = vpack.c.b16 %v1005_v63, %v1004_v56  ;;  %v649_v10 = vmul.f32 %v2680_v2, %v2458_v0  ;;  %v943_v15 = vpack.c.b16 %v929_v62, %v928_v57  ;;  %v931_v16 = vunpack.c.l.b16 %v821_v58  ;;  %v2404_v58 = vld [vmem:[%s3453_s5 + $0x58] sm:$0xff]  ;;  %v2403_v62 = vld [vmem:[%s3453_s5 + $0x50] sm:$0xff] }
  0x4a   : > { %v650_v13 = vadd.f32 %v2688_v8, %v648_v3  ;;  %v753_v17 = vsel %vm747_vm1, %v732_v59, %v742_v60  ;;  %vm656_vm3 = vcmp.eq.s32.totalorder %v655_v14, 1  ;;  %v779_v18 = vsel %vm726_vm0, 0.0, %v763_v6  ;;  %1342 = vmatpush.bf16.msra.mxu0 %v2404_v58  ;;  %2466 = vmatpush.bf16.msra.mxu3 %v2404_v58 }
  0x4b   : > { %v651_v19 = vadd.f32 %v2688_v8, %v649_v10  ;;  %v838_v23 = vpack.c.bf16 %v753_v17, %v753_v17  ;;  %v944_v26 = vpack.c.b16 %v931_v16, %v930_v7  ;;  %v839_v27 = vpack.c.bf16 %v779_v18, %v779_v18  ;;  %v3009_v18 = vld [vmem:[%s3453_s5 + $0x88] sm:$0xff] }
  0x4c   : > { %1030 = vrot.lane.b32.xlu0 %v1014_v61, %s2570_s24  ;;  %1034 = vrot.lane.b32.xlu2 %v1016_v4, %s2570_s24  ;;  %v652_v22 = vmax.f32 %v650_v13, 0.0  ;;  %v676_v12 = vrot.slane %v2712_v32, 7  ;;  %v666_v59 = vrot.slane %v2710_v31, 7  ;;  %v675_v60 = vrot.slane %v2716_v34, 7 }
  0x4d   : > { %v653_v25 = vmax.f32 %v651_v19, 0.0  ;;  %v998_v40 = vunpack.c.l.b16 %v838_v23  ;;  %v999_v41 = vunpack.c.l.b16 %v839_v27  ;;  %v665_v61 = vrot.slane %v2714_v33, 7  ;;  %1670 = vmatpush.bf16.msra.mxu2 %v3009_v18 }
  0x4e   : > { %v2951_v2 = vsel %vm656_vm3, %v652_v22, 0.0  ;;  %v697_v63 = vsel %vm684_vm4, %v676_v12, %v666_v59  ;;  %1343 = vmatpush.bf16.msra.mxu0 %v2403_v62  ;;  %v687_v32 = vsel %vm684_vm4, %v666_v59, %v676_v12  ;;  %2467 = vmatpush.bf16.msra.mxu3 %v2403_v62  ;;  %v664_v10 = vrot.slane %v2782_v21, 7  ;;  %v2390_v22 = vld [vmem:[%s3453_s5 + $0x28] sm:$0xff] }
  0x4f   : > { %958 = vrot.lane.b32.xlu1 %v943_v15, %s2569_s19  ;;  %v736_v28 = vrot.slane %v2951_v2, 1  ;;  %v826_v29 = vpack.c.bf16 %v2951_v2, %v2951_v2  ;;  %v2957_v30 = vsel %vm656_vm3, %v653_v25, 0.0  ;;  %v1013_v55 = vpack.c.b16 %v999_v41, %v998_v40  ;;  %1491 = vmatpush.bf16.msra.mxu1 %v2390_v22  ;;  %v3027_v25 = vld [vmem:[%s3453_s5 + $0x80] sm:$0xff] }
  0x50   : > { %v746_v35 = vrot.slane %v2957_v30, 1  ;;  %v827_v8 = vpack.c.bf16 %v2957_v30, %v2957_v30  ;;  %v696_v31 = vsel %vm684_vm4, %v675_v60, %v665_v61  ;;  %v709_v33 = vsel %vm662_vm5, 0.0, %v697_v63 }
  0x51   : > { %v936_v36 = vunpack.c.l.b16 %v826_v29  ;;  %v686_v34 = vsel %vm684_vm4, %v665_v61, %v675_v60  ;;  %v707_v0 = vsel %vm662_vm5, 0.0, %v696_v31  ;;  %v792_v3 = vpack.c.bf16 %v709_v33, %v709_v33  ;;  %v2389_v29 = vld [vmem:[%s3453_s5 + $0x20] sm:$0xff]  ;;  %1671 = vmatpush.bf16.msra.mxu2 %v3027_v25 }
  0x52   : > { %v937_v47 = vunpack.c.l.b16 %v827_v8  ;;  %v757_v49 = vsel %vm747_vm1, %v736_v28, %v746_v35  ;;  %v767_v50 = vsel %vm747_vm1, %v746_v35, %v736_v28  ;;  %v793_v4 = vpack.c.bf16 %v687_v32, %v687_v32  ;;  %v2401_v28 = vld [vmem:[%s3453_s5 + $0x40] sm:$0xff] }
  0x53   : > { %v787_v52 = vsel %vm726_vm0, 0.0, %v767_v50  ;;  %v846_v48 = vpack.c.bf16 %v757_v49, %v757_v49  ;;  %v790_v6 = vpack.c.bf16 %v707_v0, %v707_v0  ;;  %v791_v7 = vpack.c.bf16 %v686_v34, %v686_v34  ;;  %1492 = vmatpush.bf16.msra.mxu1 %v2389_v29  ;;  %v2400_v49 = vld [vmem:[%s3453_s5 + $0x38] sm:$0xff] }
  0x54   : > { %960 = vrot.lane.b32.xlu2 %v944_v26, %s2569_s19  ;;  %v947_v53 = vpack.c.b16 %v937_v47, %v936_v36  ;;  %v847_v54 = vpack.c.bf16 %v787_v52, %v787_v52  ;;  %v674_v13 = vrot.slane %v2786_v24, 7  ;;  %v2998_v14 = vunpack.c.l.b16 %v792_v3  ;;  %v2402_v24 = vld [vmem:[%s3453_s5 + $0x48] sm:$0xff]  ;;  %v3049_v47 = vld [vmem:[%s3453_s5 + $0x78] sm:$0xff]  ;;  %v3061_v52 = vld [vmem:[%s3453_s5 + $0x70] sm:$0xff] }
  0x55   : > { %v1006_v51 = vunpack.c.l.b16 %v846_v48  ;;  %v3000_v15 = vunpack.c.l.b16 %v793_v4  ;;  %v3002_v16 = vunpack.c.l.b16 %v790_v6  ;;  %v3004_v17 = vunpack.c.l.b16 %v791_v7  ;;  %1344 = vmatpush.bf16.msra.mxu0 %v2402_v24  ;;  %2468 = vmatpush.bf16.msra.mxu3 %v2402_v24  ;;  %v2388_v50 = vld [vmem:[%s3453_s5 + $0x18] sm:$0xff]  ;;  %v2399_v48 = vld [vmem:[%s3453_s5 + $0x30] sm:$0xff] }
  0x56   : > { %966 = vrot.lane.b32.xlu0 %v947_v53, %s2569_s19  ;;  %v1007_v56 = vunpack.c.l.b16 %v847_v54  ;;  %v695_v23 = vsel %vm684_vm4, %v674_v13, %v664_v10  ;;  %v685_v26 = vsel %vm684_vm4, %v664_v10, %v674_v13  ;;  %1672 = vmatpush.bf16.msra.mxu2 %v3049_v47  ;;  %v2387_v53 = vld [vmem:[%s3453_s5 + $0x10] sm:$0xff]  ;;  %v3073_v54 = vld [vmem:[%s3453_s5 + $0x68] sm:$0xff]  ;;  %v671_v58 = vrot.slane %v2742_v43, 7  ;;  %s530_s19 = scalar_lea.vmem %s3456_s8, %s2748_s10 }
  0x57   : > { %v890_v19 = vpack.c.b16 %v3000_v15, %v2998_v14  ;;  %v889_v21 = vpack.c.b16 %v3004_v17, %v3002_v16  ;;  %v705_v27 = vsel %vm662_vm5, 0.0, %v695_v23  ;;  %v789_v8 = vpack.c.bf16 %v685_v26, %v685_v26  ;;  %1493 = vmatpush.bf16.msra.mxu1 %v2388_v50 }
  0x58   : > { %v1017_v57 = vpack.c.b16 %v1007_v56, %v1006_v51  ;;  %v788_v35 = vpack.c.bf16 %v705_v27, %v705_v27  ;;  %v2386_v51 = vld [vmem:[%s3453_s5 + $0x8] sm:$0xff]  ;;  %v681_v12 = vrot.slane %v2744_v44, 7  ;;  %v667_v61 = vrot.slane %v2769_v11, 7 }
  0x59   : > { %1345 = vmatpush.bf16.msra.mxu0 %v2401_v28  ;;  %v3042_v40 = vunpack.c.l.b16 %v789_v8  ;;  %2469 = vmatpush.bf16.msra.mxu3 %v2401_v28  ;;  %v677_v62 = vrot.slane %v2777_v20, 7  ;;  %v672_v17 = vrot.slane %v2858_v38, 7  ;;  %v678_v8 = vrot.slane %v2865_v45, 7 }
  0x5a   : > { %1036 = vrot.lane.b32.xlu1 %v1017_v57, %s2570_s24  ;;  %v3040_v36 = vunpack.c.l.b16 %v788_v35  ;;  %1673 = vmatpush.bf16.msra.mxu2 %v3061_v52  ;;  %v2385_v57 = vld [vmem:[%s3453_s5] sm:$0xff]  ;;  %v702_v59 = vsel %vm684_vm4, %v681_v12, %v671_v58  ;;  %v692_v43 = vsel %vm684_vm4, %v671_v58, %v681_v12  ;;  %v670_v45 = vrot.slane %v2892_v5, 7 }
  0x5b   : > { %1494 = vmatpush.bf16.msra.mxu1 %v2387_v53  ;;  %v719_v44 = vsel %vm662_vm5, 0.0, %v702_v59  ;;  %v698_v11 = vsel %vm684_vm4, %v677_v62, %v667_v61  ;;  %v803_v3 = vpack.c.bf16 %v692_v43, %v692_v43  ;;  %v688_v7 = vsel %vm684_vm4, %v667_v61, %v677_v62 }
  0x5c   : > { %1028 = vrot.lane.b32.xlu2 %v1013_v55, %s2570_s24  ;;  %v888_v41 = vpack.c.b16 %v3042_v40, %v3040_v36  ;;  %v3082_v55 = vld [vmem:[%s3453_s5 + $0x60] sm:$0xff]  ;;  %v802_v20 = vpack.c.bf16 %v719_v44, %v719_v44  ;;  %v711_v10 = vsel %vm662_vm5, 0.0, %v698_v11  ;;  %v795_v14 = vpack.c.bf16 %v688_v7, %v688_v7  ;;  %s537_s24 = scalar_lea.vmem %s3457_s9, %s2748_s10 }
  0x5d   : > { %1346 = vmatpush.bf16.msra.mxu0 %v2400_v49  ;;  %2470 = vmatpush.bf16.msra.mxu3 %v2400_v49  ;;  %v883_v23 = vunpack.c.l.b16 %v803_v3  ;;  %v794_v28 = vpack.c.bf16 %v711_v10, %v711_v10 }
  0x5e   : > { %1674 = vmatpush.bf16.msra.mxu2 %v3073_v54 }
  0x5f   : > { %1495 = vmatpush.bf16.msra.mxu1 %v2386_v51 }
  0x61   : > { %1347 = vmatpush.bf16.msra.mxu0 %v2399_v48  ;;  %2471 = vmatpush.bf16.msra.mxu3 %v2399_v48  ;;  %v875_v48 = vunpack.c.l.b16 %v795_v14 }
  0x62   : > { %1675 = vmatpush.bf16.msra.mxu2 %v3082_v55 }
  0x63   : > { %1496 = vmatpush.bf16.msra.mxu1 %v2385_v57 }
  0x65   : > { %2472 = vmatpush.bf16.msrb.mxu3 %v2390_v22  ;;  %v882_v22 = vunpack.c.l.b16 %v802_v20 }
  0x67   : > { %v895_v38 = vpack.c.b16 %v883_v23, %v882_v22 }
  0x69   : > { %2473 = vmatpush.bf16.msrb.mxu3 %v2389_v29 }
  0x6d   : > { %2474 = vmatpush.bf16.msrb.mxu3 %v2388_v50  ;;  %v874_v50 = vunpack.c.l.b16 %v794_v28 }
  0x71   : > { %2475 = vmatpush.bf16.msrb.mxu3 %v2387_v53 }
  0x75   : > { %2476 = vmatpush.bf16.msrb.mxu3 %v2386_v51 }
  0x79   : > { %2477 = vmatpush.bf16.msrb.mxu3 %v2385_v57  ;;  %v680_v57 = vrot.slane %v2894_v9, 7 }
  0x7b   : > { %v701_v5 = vsel %vm684_vm4, %v680_v57, %v670_v45 }
  0x7c   : > { %v717_v3 = vsel %vm662_vm5, 0.0, %v701_v5 }
  0x8e   : > { %v1019_v56 = vpop.permute.xlu2 %1018 }
  0x96   : > { %v953_v60 = vpop.permute.xlu0 %952  ;;  %v951_v63 = vpop.permute.xlu1 %950 }
  0x97   : > { %v1021_v31 = vpop.permute.xlu2 %1020  ;;  %v1044_v32 = vsel %vm1038_vm6, %v889_v21, %v951_v63  ;;  %v1047_v13 = vsel %vm1038_vm6, %v890_v19, %v953_v60  ;;  %v682_v21 = vrot.slane %v2860_v39, 7  ;;  %v668_v39 = vrot.slane %v2863_v42, 7 }
  0x98   : > { %v1073_v33 = vsel %vm1069_vm7, %v1044_v32, %v1021_v31 }
  0x99   : > { %v1102_v34 = vunpack.c.l.b16 %v1073_v33  ;;  %v1103_v0 = vunpack.c.h.b16 %v1073_v33  ;;  %v703_v29 = vsel %vm684_vm4, %v682_v21, %v672_v17  ;;  %v693_v53 = vsel %vm684_vm4, %v672_v17, %v682_v21 }
  0x9a   : > { %v721_v42 = vsel %vm662_vm5, 0.0, %v703_v29  ;;  %v805_v12 = vpack.c.bf16 %v693_v53, %v693_v53  ;;  %v699_v59 = vsel %vm684_vm4, %v678_v8, %v668_v39  ;;  %v689_v9 = vsel %vm684_vm4, %v668_v39, %v678_v8 }
  0x9b   : > { %v1122_v4 = vpack.c.b16 %v1102_v34, %v1102_v34  ;;  %v1123_v6 = vpack.c.b16 %v1103_v0, %v1103_v0  ;;  %v804_v63 = vpack.c.bf16 %v721_v42, %v721_v42  ;;  %v713_v32 = vsel %vm662_vm5, 0.0, %v699_v59 }
  0x9c   : > { %v885_v44 = vunpack.c.l.b16 %v805_v12  ;;  %v691_v33 = vsel %vm684_vm4, %v670_v45, %v680_v57  ;;  %v796_v7 = vpack.c.bf16 %v713_v32, %v713_v32  ;;  %v797_v10 = vpack.c.bf16 %v689_v9, %v689_v9 }
  0x9d   : > { %1163 = vst.msk [vmem:[#allocation2 + $0x8] sm:$0xf] %vm1160_vm8, %v1122_v4  ;;  %v884_v20 = vunpack.c.l.b16 %v804_v63  ;;  %v669_v17 = vrot.slane %v2917_v37, 7  ;;  %v679_v21 = vrot.slane %v2922_v46, 7 }
  0x9e   : > { %v1023_v16 = vpop.permute.xlu0 %1022  ;;  %1164 = vst.msk [vmem:[#allocation2 + $0xc] sm:$0xf] %vm1160_vm8, %v1123_v6  ;;  %v877_v29 = vunpack.c.l.b16 %v797_v10 }
  0x9f   : > { %v1075_v24 = vsel %vm1069_vm7, %v1047_v13, %v1023_v16  ;;  %v955_v62 = vpop.permute.xlu2 %954  ;;  %v801_v16 = vpack.c.bf16 %v691_v33, %v691_v33  ;;  %v896_v14 = vpack.c.b16 %v885_v44, %v884_v20  ;;  %v700_v46 = vsel %vm684_vm4, %v679_v21, %v669_v17 }
  0xa0   : > { %v1104_v26 = vunpack.c.l.b16 %v1075_v24  ;;  %v1105_v27 = vunpack.c.h.b16 %v1075_v24  ;;  %v715_v42 = vsel %vm662_vm5, 0.0, %v700_v46 }
  0xa1   : > { %v949_v35 = vpop.permute.xlu1 %948 }
  0xa2   : > { %v1124_v15 = vpack.c.b16 %v1104_v26, %v1104_v26  ;;  %v1125_v19 = vpack.c.b16 %v1105_v27, %v1105_v27  ;;  %v1041_v49 = vsel %vm1038_vm6, %v888_v41, %v949_v35  ;;  %v800_v26 = vpack.c.bf16 %v717_v3, %v717_v3 }
  0xa3   : > { %v1071_v51 = vsel %vm1069_vm7, %v1041_v49, %v1019_v56  ;;  %v891_v56 = vpack.c.b16 %v875_v48, %v874_v50  ;;  %v881_v49 = vunpack.c.l.b16 %v801_v16 }
  0xa4   : > { %1165 = vst.msk [vmem:[#allocation2 + $0x10] sm:$0xf] %vm1160_vm8, %v1124_v15  ;;  %v1100_v58 = vunpack.c.l.b16 %v1071_v51  ;;  %v1101_v36 = vunpack.c.h.b16 %v1071_v51  ;;  %v880_v8 = vunpack.c.l.b16 %v800_v26  ;;  %v690_v51 = vsel %vm684_vm4, %v669_v17, %v679_v21 }
  0xa5   : > { %1166 = vst.msk [vmem:[#allocation2 + $0x14] sm:$0xf] %vm1160_vm8, %v1125_v19  ;;  %v2391_v41 = vld [vmem:[#allocation2 + $0x8] sm:$0xff]  ;;  %v1050_v0 = vsel %vm1038_vm6, %v891_v56, %v955_v62  ;;  %v876_v19 = vunpack.c.l.b16 %v796_v7 }
  0xa6   : > { %v963_v40 = vpop.permute.xlu0 %962  ;;  %v1120_v60 = vpack.c.b16 %v1100_v58, %v1100_v58  ;;  %v1121_v61 = vpack.c.b16 %v1101_v36, %v1101_v36  ;;  %2225 = vmatmul.msk.bf16.vlgmr.msra.gmra.mxu0 %vm1315_vm9, %v2391_v41  ;;  %v2378_v7 = vld [vmem:[#allocation2 + $0x8] sm:$0xff] }
  0xa7   : > { %v1062_v31 = vsel %vm1038_vm6, %v895_v38, %v963_v40  ;;  %v1035_v15 = vpop.permute.xlu2 %1034  ;;  %v892_v53 = vpack.c.b16 %v877_v29, %v876_v19  ;;  %v894_v40 = vpack.c.b16 %v881_v49, %v880_v8 }
  0xa8   : > { %1161 = vst.msk [vmem:[#allocation2] sm:$0xf] %vm1160_vm8, %v1120_v60  ;;  %v798_v60 = vpack.c.bf16 %v715_v42, %v715_v42 }
  0xa9   : > { %1162 = vst.msk [vmem:[#allocation2 + $0x4] sm:$0xf] %vm1160_vm8, %v1121_v61  ;;  %v1033_v43 = vpop.permute.xlu1 %1032  ;;  %v799_v61 = vpack.c.bf16 %v690_v51, %v690_v51 }
  0xaa   : > { %v1085_v34 = vsel %vm1069_vm7, %v1062_v31, %v1033_v43  ;;  %v878_v32 = vunpack.c.l.b16 %v798_v60 }
  0xab   : > { %v1114_v4 = vunpack.c.l.b16 %v1085_v34  ;;  %v1115_v6 = vunpack.c.h.b16 %v1085_v34  ;;  %v879_v43 = vunpack.c.l.b16 %v799_v61 }
  0xac   : > { %v2405_v11 = vld [vmem:[#allocation2 + $0x10] sm:$0xff] }
  0xad   : > { %2365 = vmatmul.msk.bf16.vlgmr.msra.gmra.mxu2 %vm1315_vm9, %v2405_v11  ;;  %v1134_v24 = vpack.c.b16 %v1114_v4, %v1114_v4  ;;  %v1135_v22 = vpack.c.b16 %v1115_v6, %v1115_v6  ;;  %v2392_v58 = vld [vmem:[#allocation2 + $0x10] sm:$0xff]  ;;  %v893_v6 = vpack.c.b16 %v879_v43, %v878_v32 }
  0xae   : > { %v1025_v13 = vpop.permute.xlu0 %1024 }
  0xaf   : > { %v1077_v23 = vsel %vm1069_vm7, %v1050_v0, %v1025_v13  ;;  %1175 = vst.msk [vmem:[#allocation2 + $0x38] sm:$0xf] %vm1160_vm8, %v1134_v24  ;;  %v961_v59 = vpop.permute.xlu2 %960 }
  0xb0   : > { %v1106_v27 = vunpack.c.l.b16 %v1077_v23  ;;  %v1107_v28 = vunpack.c.h.b16 %v1077_v23  ;;  %1176 = vst.msk [vmem:[#allocation2 + $0x3c] sm:$0xf] %vm1160_vm8, %v1135_v22  ;;  %v2377_v37 = vld [vmem:[#allocation2] sm:$0xff]  ;;  %v1059_v9 = vsel %vm1038_vm6, %v894_v40, %v961_v59 }
  0xb1   : > { %v965_v39 = vpop.permute.xlu1 %964  ;;  %2289 = vmatmul.msk.bf16.vlgmr.msra.gmra.mxu1 %vm1315_vm9, %v2377_v37 }
  0xb2   : > { %v1126_v35 = vpack.c.b16 %v1106_v27, %v1106_v27  ;;  %v1127_v38 = vpack.c.b16 %v1107_v28, %v1107_v28  ;;  %v1065_v50 = vsel %vm1038_vm6, %v896_v14, %v965_v39  ;;  %v683_v14 = vrot.slane %v2957_v30, 7 }
  0xb3   : > { %v1087_v48 = vsel %vm1069_vm7, %v1065_v50, %v1035_v15  ;;  %v2379_v15 = vld [vmem:[#allocation2 + $0x10] sm:$0xff] }
  0xb4   : > { %1167 = vst.msk [vmem:[#allocation2 + $0x18] sm:$0xf] %vm1160_vm8, %v1126_v35  ;;  %v1116_v45 = vunpack.c.l.b16 %v1087_v48  ;;  %v1117_v57 = vunpack.c.h.b16 %v1087_v48 }
  0xb5   : > { %1168 = vst.msk [vmem:[#allocation2 + $0x1c] sm:$0xf] %vm1160_vm8, %v1127_v38 }
  0xb6   : > { %v957_v36 = vpop.permute.xlu0 %956  ;;  %v1136_v41 = vpack.c.b16 %v1116_v45, %v1116_v45  ;;  %v1137_v12 = vpack.c.b16 %v1117_v57, %v1117_v57  ;;  %2226 = vmatmul.msk.bf16.gmra.mxu0 %vm1315_vm9, %v2392_v58 }
  0xb7   : > { %v2397_v56 = vld [vmem:[#allocation2 + $0x38] sm:$0xff]  ;;  %v1053_v62 = vsel %vm1038_vm6, %v892_v53, %v957_v36  ;;  %v1029_v13 = vpop.permute.xlu2 %1028 }
  0xb8   : > { %1177 = vst.msk [vmem:[#allocation2 + $0x40] sm:$0xf] %vm1160_vm8, %v1136_v41  ;;  %2231 = vmatmul.msk.bf16.vlgmr.msra.gmra.mxu3 %vm1315_vm9, %v2397_v56  ;;  %v2384_v57 = vld [vmem:[#allocation2 + $0x38] sm:$0xff] }
  0xb9   : > { %1178 = vst.msk [vmem:[#allocation2 + $0x44] sm:$0xf] %vm1160_vm8, %v1137_v12  ;;  %v1027_v63 = vpop.permute.xlu1 %1026  ;;  %2478 = vmatpush.bf16.msra.mxu3 %v3009_v18  ;;  %v2410_v12 = vld [vmem:[#allocation2 + $0x38] sm:$0xff] }
  0xba   : > { %v1079_v31 = vsel %vm1069_vm7, %v1053_v62, %v1027_v63 }
  0xbb   : > { %v1108_v44 = vunpack.c.l.b16 %v1079_v31  ;;  %v1109_v33 = vunpack.c.h.b16 %v1079_v31 }
  0xbc   : > { %v2406_v5 = vld [vmem:[#allocation2 + $0x18] sm:$0xff] }
  0xbd   : > { %2366 = vmatmul.msk.bf16.gmra.mxu2 %vm1315_vm9, %v2406_v5  ;;  %v1128_v0 = vpack.c.b16 %v1108_v44, %v1108_v44  ;;  %v1129_v11 = vpack.c.b16 %v1109_v33, %v1109_v33  ;;  %2479 = vmatpush.bf16.msra.mxu3 %v3027_v25  ;;  %v2393_v21 = vld [vmem:[#allocation2 + $0x18] sm:$0xff]  ;;  %v3223_v5 = vld [vmem:[%s3454_s6] ss:$0 sm:$0xff] }
  0xbe   : > { %v1031_v34 = vpop.permute.xlu0 %1030  ;;  %v2380_v42 = vld [vmem:[#allocation2 + $0x18] sm:$0xff] }
  0xbf   : > { %v1083_v20 = vsel %vm1069_vm7, %v1059_v9, %v1031_v34  ;;  %1169 = vst.msk [vmem:[#allocation2 + $0x20] sm:$0xf] %vm1160_vm8, %v1128_v0 }
  0xc0   : > { %v1112_v3 = vunpack.c.l.b16 %v1083_v20  ;;  %v1113_v4 = vunpack.c.h.b16 %v1083_v20  ;;  %1170 = vst.msk [vmem:[#allocation2 + $0x24] sm:$0xf] %vm1160_vm8, %v1129_v11  ;;  %v2398_v23 = vld [vmem:[#allocation2 + $0x40] sm:$0xff] }
  0xc1   : > { %v959_v16 = vpop.permute.xlu1 %958  ;;  %2290 = vmatmul.msk.bf16.gmra.mxu1 %vm1315_vm9, %v2378_v7  ;;  %2480 = vmatpush.bf16.msra.mxu3 %v3049_v47  ;;  %v673_v47 = vrot.slane %v2951_v2, 7  ;;  %v2411_v41 = vld [vmem:[#allocation2 + $0x40] sm:$0xff] }
  0xc2   : > { %v1132_v18 = vpack.c.b16 %v1112_v3, %v1112_v3  ;;  %v1133_v10 = vpack.c.b16 %v1113_v4, %v1113_v4  ;;  %v1056_v17 = vsel %vm1038_vm6, %v893_v6, %v959_v16 }
  0xc3   : > { %v1081_v25 = vsel %vm1069_vm7, %v1056_v17, %v1029_v13  ;;  %v704_v19 = vsel %vm684_vm4, %v683_v14, %v673_v47 }
  0xc4   : > { %1173 = vst.msk [vmem:[#allocation2 + $0x30] sm:$0xf] %vm1160_vm8, %v1132_v18  ;;  %v1110_v24 = vunpack.c.l.b16 %v1081_v25  ;;  %v1111_v22 = vunpack.c.h.b16 %v1081_v25 }
  0xc5   : > { %1174 = vst.msk [vmem:[#allocation2 + $0x34] sm:$0xf] %vm1160_vm8, %v1133_v10  ;;  %2481 = vmatpush.bf16.msra.mxu3 %v3061_v52  ;;  %v694_v52 = vsel %vm684_vm4, %v673_v47, %v683_v14 }
  0xc6   : > { %2227 = vmatmul.msk.bf16.gmra.mxu0 %vm1315_vm9, %v2393_v21  ;;  %v1130_v26 = vpack.c.b16 %v1110_v24, %v1110_v24  ;;  %v1131_v27 = vpack.c.b16 %v1111_v22, %v1111_v22  ;;  %v807_v29 = vpack.c.bf16 %v694_v52, %v694_v52 }
  0xc7   : > { %v2407_v28 = vld [vmem:[#allocation2 + $0x20] sm:$0xff] }
  0xc8   : > { %1171 = vst.msk [vmem:[#allocation2 + $0x28] sm:$0xf] %vm1160_vm8, %v1130_v26  ;;  %2232 = vmatmul.msk.bf16.gmra.mxu3 %vm1315_vm9, %v2398_v23  ;;  %v2394_v35 = vld [vmem:[#allocation2 + $0x20] sm:$0xff]  ;;  %v887_v37 = vunpack.c.l.b16 %v807_v29 }
  0xc9   : > { %1172 = vst.msk [vmem:[#allocation2 + $0x2c] sm:$0xf] %vm1160_vm8, %v1131_v27  ;;  %2482 = vmatpush.bf16.msra.mxu3 %v3073_v54  ;;  %v723_v54 = vsel %vm662_vm5, 0.0, %v704_v19  ;;  %v2381_v36 = vld [vmem:[#allocation2 + $0x20] sm:$0xff] }
  0xca   : > { %v806_v38 = vpack.c.bf16 %v723_v54, %v723_v54 }
  0xcc   : > { %v2383_v2 = vld [vmem:[#allocation2 + $0x30] sm:$0xff]  ;;  %v886_v30 = vunpack.c.l.b16 %v806_v38  ;;  %v1037_v8 = vpop.permute.xlu1 %1036 }
  0xcd   : > { %2367 = vmatmul.msk.bf16.gmra.mxu2 %vm1315_vm9, %v2407_v28  ;;  %2483 = vmatpush.bf16.msra.mxu3 %v3082_v55  ;;  %v967_v55 = vpop.permute.xlu0 %966  ;;  %v2409_v58 = vld [vmem:[#allocation2 + $0x30] sm:$0xff] }
  0xce   : > { %v897_v39 = vpack.c.b16 %v887_v37, %v886_v30  ;;  %v2396_v40 = vld [vmem:[#allocation2 + $0x30] sm:$0xff] }
  0xd0   : > { %v2408_v46 = vld [vmem:[#allocation2 + $0x28] sm:$0xff]  ;;  %v1068_v49 = vsel %vm1038_vm6, %v897_v39, %v967_v55 }
  0xd1   : > { %2291 = vmatmul.msk.bf16.gmra.mxu1 %vm1315_vm9, %v2379_v15  ;;  %v1089_v50 = vsel %vm1069_vm7, %v1068_v49, %v1037_v8  ;;  %v2395_v45 = vld [vmem:[#allocation2 + $0x28] sm:$0xff] }
  0xd2   : > { %v1118_v1 = vunpack.c.l.b16 %v1089_v50  ;;  %v1119_v48 = vunpack.c.h.b16 %v1089_v50  ;;  %v2382_v59 = vld [vmem:[#allocation2 + $0x28] sm:$0xff] }
  0xd4   : > { %v1138_v53 = vpack.c.b16 %v1118_v1, %v1118_v1  ;;  %v1139_v51 = vpack.c.b16 %v1119_v48, %v1119_v48 }
  0xd6   : > { %2228 = vmatmul.msk.bf16.gmra.mxu0 %vm1315_vm9, %v2394_v35  ;;  %1179 = vst.msk [vmem:[#allocation2 + $0x48] sm:$0xf] %vm1160_vm8, %v1138_v53 }
  0xd7   : > { %1180 = vst.msk [vmem:[#allocation2 + $0x4c] sm:$0xf] %vm1160_vm8, %v1139_v51 }
  0xd8   : > { %2295 = vmatmul.msk.bf16.vlgmr.msrb.gmra.mxu3 %vm1315_vm9, %v2383_v2 }
  0xdd   : > { %2368 = vmatmul.msk.bf16.gmra.mxu2 %vm1315_vm9, %v2408_v46 }
  0xde   : > { %v2412_v60 = vld [vmem:[#allocation2 + $0x48] sm:$0xff] }
  0xe1   : > { %2292 = vmatmul.msk.bf16.gmra.mxu1 %vm1315_vm9, %v2380_v42 }
  0xe6   : > { %2229 = vmatmul.msk.bf16.gmra.mxu0 %vm1315_vm9, %v2395_v45 }
  0xe8   : > { %2296 = vmatmul.msk.bf16.gmra.mxu3 %vm1315_vm9, %v2384_v57 }
  0xed   : > { %2369 = vmatmul.msk.bf16.gmra.mxu2 %vm1315_vm9, %v2409_v58 }
  0xf1   : > { %2293 = vmatmul.msk.bf16.gmra.mxu1 %vm1315_vm9, %v2381_v36 }
  0xf6   : > { %2230 = vmatmul.msk.bf16.gmra.mxu0 %vm1315_vm9, %v2396_v40 }
  0xf8   : > { %2371 = vmatmul.msk.bf16.vlgmr.msra.gmra.mxu3 %vm1315_vm9, %v2411_v41 }
  0xfd   : > { %2370 = vmatmul.msk.bf16.gmra.mxu2 %vm1315_vm9, %v2410_v12 }
 0x101   : > { %2294 = vmatmul.msk.bf16.gmra.mxu1 %vm1315_vm9, %v2382_v59 }
 0x108   : > { %2372 = vmatmul.msk.bf16.gmra.mxu3 %vm1315_vm9, %v2412_v60 }
 0x123   : > { %v1349_v61 = vpop.f32.mrf.mxu0 }
 0x12b   : > { %v1351_v56 = vpop.f32.mrf.mxu0 }
 0x12e   : > { %v1498_v62 = vpop.f32.mrf.mxu1 }
 0x12f   : > { %v1499_v31 = vadd.f32 %v1498_v62, %v1349_v61 }
 0x130   : > { %v1677_v63 = vpop.f32.mrf.mxu2 }
 0x131   : > { %v1717_v9 = vadd.f32 %v1677_v63, %v1499_v31 }
 0x133   : > { %v1354_v32 = vpop.f32.mrf.mxu0  ;;  %v3226_v43 = vadd.f32 %v3223_v5, %v1717_v9 }
 0x135   : > { %v1863_v44 = vpack.c.bf16 %v3226_v43, %v3226_v43 }
 0x136   : > { %v1500_v33 = vpop.f32.mrf.mxu1 }
 0x137   : > { %1880 = vst.msk [vmem:[%s3233_s17] sm:$0xf] %vm1879_vm10, %v1863_v44  ;;  %v1501_v0 = vadd.f32 %v1500_v33, %v1351_v56 }
 0x138   : > { %v1679_v34 = vpop.f32.mrf.mxu2 }
 0x139   : > { %v1718_v11 = vadd.f32 %v1679_v34, %v1501_v0 }
 0x13b   : > { %v1356_v20 = vpop.f32.mrf.mxu0  ;;  %v3240_v3 = vadd.f32 %v3223_v5, %v1718_v11  ;;  %v3242_v4 = vpop.f32.mrf.mxu3 }
 0x13d   : > { %v1864_v6 = vpack.c.bf16 %v3240_v3, %v3240_v3  ;;  %v1754_v11 = vsel %vm1038_vm6, %v3240_v3, 0.0 }
 0x13e   : > { %v1503_v7 = vpop.f32.mrf.mxu1 }
 0x13f   : > { %1881 = vst.msk [vmem:[%s3233_s17 + $0x4] sm:$0xf] %vm1879_vm10, %v1864_v6  ;;  %v1504_v10 = vadd.f32 %v1503_v7, %v1354_v32  ;;  %v1753_v6 = vsel %vm1038_vm6, %v3226_v43, 0.0 }
 0x140   : > { %v1682_v18 = vpop.f32.mrf.mxu2 }
 0x141   : > { %v1719_v13 = vadd.f32 %v1682_v18, %v1504_v10  ;;  %v1755_v10 = vadd.f32 %v1754_v11, %v1753_v6 }
 0x143   : > { %v1359_v16 = vpop.f32.mrf.mxu0  ;;  %v3249_v17 = vadd.f32 %v3223_v5, %v1719_v13  ;;  %v3251_v25 = vpop.f32.mrf.mxu3 }
 0x145   : > { %v1865_v21 = vpack.c.bf16 %v3249_v17, %v3249_v17  ;;  %v1756_v7 = vsel %vm1038_vm6, %v3249_v17, 0.0 }
 0x146   : > { %v1505_v24 = vpop.f32.mrf.mxu1 }
 0x147   : > { %1882 = vst.msk [vmem:[%s3233_s17 + $0x8] sm:$0xf] %vm1879_vm10, %v1865_v21  ;;  %v1506_v23 = vadd.f32 %v1505_v24, %v1356_v20 }
 0x148   : > { %v1684_v22 = vpop.f32.mrf.mxu2 }
 0x149   : > { %v1720_v26 = vadd.f32 %v1684_v22, %v1506_v23  ;;  %v1757_v23 = vadd.f32 %v1756_v7, %v1755_v10 }
 0x14b   : > { %v1361_v27 = vpop.f32.mrf.mxu0  ;;  %v3258_v28 = vadd.f32 %v3223_v5, %v1720_v26  ;;  %v3260_v47 = vpop.f32.mrf.mxu3 }
 0x14d   : > { %v1866_v14 = vpack.c.bf16 %v3258_v28, %v3258_v28 }
 0x14e   : > { %v1508_v15 = vpop.f32.mrf.mxu1 }
 0x14f   : > { %1883 = vst.msk [vmem:[%s3233_s17 + $0xc] sm:$0xf] %vm1879_vm10, %v1866_v14  ;;  %v1509_v19 = vadd.f32 %v1508_v15, %v1359_v16  ;;  %v1758_v16 = vsel %vm1038_vm6, %v3258_v28, 0.0 }
 0x150   : > { %v1687_v52 = vpop.f32.mrf.mxu2  ;;  %v1759_v15 = vadd.f32 %v1758_v16, %v1757_v23 }
 0x151   : > { %v1721_v54 = vadd.f32 %v1687_v52, %v1509_v19 }
 0x153   : > { %v3267_v29 = vadd.f32 %v3223_v5, %v1721_v54  ;;  %v3269_v35 = vpop.f32.mrf.mxu3  ;;  %v1364_v38 = vpop.f32.mrf.mxu0 }
 0x155   : > { %v1867_v2 = vpack.c.bf16 %v3267_v29, %v3267_v29 }
 0x156   : > { %v1510_v37 = vpop.f32.mrf.mxu1 }
 0x157   : > { %1884 = vst.msk [vmem:[%s3233_s17 + $0x10] sm:$0xf] %vm1879_vm10, %v1867_v2  ;;  %v1511_v55 = vadd.f32 %v1510_v37, %v1361_v27  ;;  %v1760_v27 = vsel %vm1038_vm6, %v3267_v29, 0.0 }
 0x158   : > { %v1689_v30 = vpop.f32.mrf.mxu2  ;;  %v1761_v2 = vadd.f32 %v1760_v27, %v1759_v15 }
 0x159   : > { %v1722_v46 = vadd.f32 %v1689_v30, %v1511_v55 }
 0x15b   : > { %v3276_v39 = vadd.f32 %v3223_v5, %v1722_v46  ;;  %v1528_v8 = vpop.f32.mrf.mxu3  ;;  %v1366_v50 = vpop.f32.mrf.mxu0 }
 0x15c   : > { %v1529_v13 = vadd.f32 %v1528_v8, %v3242_v4 }
 0x15d   : > { %v1868_v49 = vpack.c.bf16 %v3276_v39, %v3276_v39  ;;  %v1762_v54 = vsel %vm1038_vm6, %v3276_v39, 0.0 }
 0x15e   : > { %v1513_v1 = vpop.f32.mrf.mxu1  ;;  %v1763_v46 = vadd.f32 %v1762_v54, %v1761_v2 }
 0x15f   : > { %1885 = vst.msk [vmem:[%s3233_s17 + $0x14] sm:$0xf] %vm1879_vm10, %v1868_v49  ;;  %v1514_v53 = vadd.f32 %v1513_v1, %v1364_v38 }
 0x160   : > { %v1692_v48 = vpop.f32.mrf.mxu2 }
 0x161   : > { %v1723_v51 = vadd.f32 %v1692_v48, %v1514_v53 }
 0x163   : > { %v3283_v42 = vadd.f32 %v3223_v5, %v1723_v51  ;;  %v1530_v45 = vpop.f32.mrf.mxu3  ;;  %v1369_v40 = vpop.f32.mrf.mxu0 }
 0x164   : > { %v1531_v8 = vadd.f32 %v1530_v45, %v3251_v25 }
 0x165   : > { %v1869_v57 = vpack.c.bf16 %v3283_v42, %v3283_v42  ;;  %v1764_v30 = vsel %vm1038_vm6, %v3283_v42, 0.0 }
 0x166   : > { %v1515_v58 = vpop.f32.mrf.mxu1  ;;  %v1765_v48 = vadd.f32 %v1764_v30, %v1763_v46 }
 0x167   : > { %1886 = vst.msk [vmem:[%s3233_s17 + $0x18] sm:$0xf] %vm1879_vm10, %v1869_v57  ;;  %v1516_v41 = vadd.f32 %v1515_v58, %v1366_v50 }
 0x168   : > { %v1694_v36 = vpop.f32.mrf.mxu2 }
 0x169   : > { %v1724_v12 = vadd.f32 %v1694_v36, %v1516_v41 }
 0x16b   : > { %v3290_v59 = vadd.f32 %v3223_v5, %v1724_v12  ;;  %v1533_v60 = vpop.f32.mrf.mxu3  ;;  %v1371_v31 = vpop.f32.mrf.mxu0 }
 0x16d   : > { %v1870_v61 = vpack.c.bf16 %v3290_v59, %v3290_v59  ;;  %v1766_v49 = vsel %vm1038_vm6, %v3290_v59, 0.0 }
 0x16e   : > { %v1518_v56 = vpop.f32.mrf.mxu1  ;;  %v1767_v25 = vadd.f32 %v1766_v49, %v1765_v48 }
 0x16f   : > { %1887 = vst.msk [vmem:[%s3233_s17 + $0x1c] sm:$0xf] %vm1879_vm10, %v1870_v61  ;;  %v1519_v63 = vadd.f32 %v1518_v56, %v1369_v40 }
 0x170   : > { %v1697_v62 = vpop.f32.mrf.mxu2 }
 0x171   : > { %v1725_v9 = vadd.f32 %v1697_v62, %v1519_v63 }
 0x173   : > { %v3297_v32 = vadd.f32 %v3223_v5, %v1725_v9  ;;  %v3299_v44 = vpop.f32.mrf.mxu3  ;;  %v1374_v21 = vpop.f32.mrf.mxu0 }
 0x174   : > { %v1536_v16 = vadd.f32 %v3299_v44, %v3269_v35 }
 0x175   : > { %v1871_v33 = vpack.c.bf16 %v3297_v32, %v3297_v32  ;;  %v1768_v51 = vsel %vm1038_vm6, %v3297_v32, 0.0 }
 0x176   : > { %v1520_v34 = vpop.f32.mrf.mxu1  ;;  %v1769_v61 = vadd.f32 %v1768_v51, %v1767_v25 }
 0x177   : > { %1888 = vst.msk [vmem:[%s3233_s17 + $0x20] sm:$0xf] %vm1879_vm10, %v1871_v33  ;;  %v1521_v20 = vadd.f32 %v1520_v34, %v1371_v31  ;;  %v1534_v31 = vadd.f32 %v1533_v60, %v3260_v47 }
 0x178   : > { %v1699_v0 = vpop.f32.mrf.mxu2 }
 0x179   : > { %v1726_v18 = vadd.f32 %v1699_v0, %v1521_v20 }
 0x17b   : > { %v3315_v24 = vadd.f32 %v3223_v5, %v1726_v18  ;;  %v1707_v22 = vpop.f32.mrf.mxu3  ;;  %v1376_v57 = vpop.f32.mrf.mxu0 }
 0x17c   : > { %v1729_v26 = vadd.f32 %v1707_v22, %v1529_v13 }
 0x17d   : > { %v1872_v14 = vpack.c.bf16 %v3315_v24, %v3315_v24  ;;  %v1770_v41 = vsel %vm1038_vm6, %v3315_v24, 0.0 }
 0x17e   : > { %v3322_v4 = vadd.f32 %v3223_v5, %v1729_v26  ;;  %v1523_v52 = vpop.f32.mrf.mxu1  ;;  %v1771_v9 = vadd.f32 %v1770_v41, %v1769_v61 }
 0x17f   : > { %1889 = vst.msk [vmem:[%s3233_s17 + $0x24] sm:$0xf] %vm1879_vm10, %v1872_v14  ;;  %v1524_v38 = vadd.f32 %v1523_v52, %v1374_v21 }
 0x180   : > { %v1702_v19 = vpop.f32.mrf.mxu2  ;;  %v1875_v37 = vpack.c.bf16 %v3322_v4, %v3322_v4  ;;  %v1776_v47 = vsel %vm1038_vm6, %v3322_v4, 0.0 }
 0x181   : > { %v1727_v55 = vadd.f32 %v1702_v19, %v1524_v38 }
 0x182   : > { %1892 = vst.msk [vmem:[%s3233_s17 + $0x30] sm:$0xf] %vm1879_vm10, %v1875_v37 }
 0x183   : > { %v3338_v50 = vadd.f32 %v3223_v5, %v1727_v55  ;;  %v1709_v1 = vpop.f32.mrf.mxu3 }
 0x184   : > { %v1730_v53 = vadd.f32 %v1709_v1, %v1531_v8 }
 0x185   : > { %v1873_v58 = vpack.c.bf16 %v3338_v50, %v3338_v50  ;;  %v1772_v62 = vsel %vm1038_vm6, %v3338_v50, 0.0 }
 0x186   : > { %v3345_v45 = vadd.f32 %v3223_v5, %v1730_v53  ;;  %v1525_v36 = vpop.f32.mrf.mxu1  ;;  %v1773_v0 = vadd.f32 %v1772_v62, %v1771_v9 }
 0x187   : > { %1890 = vst.msk [vmem:[%s3233_s17 + $0x28] sm:$0xf] %vm1879_vm10, %v1873_v58  ;;  %v1526_v12 = vadd.f32 %v1525_v36, %v1376_v57 }
 0x188   : > { %v1704_v40 = vpop.f32.mrf.mxu2  ;;  %v1876_v56 = vpack.c.bf16 %v3345_v45, %v3345_v45  ;;  %v1778_v13 = vsel %vm1038_vm6, %v3345_v45, 0.0 }
 0x189   : > { %v1728_v63 = vadd.f32 %v1704_v40, %v1526_v12 }
 0x18a   : > { %1893 = vst.msk [vmem:[%s3233_s17 + $0x34] sm:$0xf] %vm1879_vm10, %v1876_v56 }
 0x18b   : > { %v3359_v33 = vadd.f32 %v3223_v5, %v1728_v63  ;;  %v1712_v34 = vpop.f32.mrf.mxu3 }
 0x18c   : > { %v1731_v11 = vadd.f32 %v1712_v34, %v1534_v31 }
 0x18d   : > { %v1774_v20 = vsel %vm1038_vm6, %v3359_v33, 0.0  ;;  %v1874_v6 = vpack.c.bf16 %v3359_v33, %v3359_v33 }
 0x18e   : > { %v1775_v7 = vadd.f32 %v1774_v20, %v1773_v0  ;;  %v3366_v18 = vadd.f32 %v3223_v5, %v1731_v11 }
 0x18f   : > { %1891 = vst.msk [vmem:[%s3233_s17 + $0x2c] sm:$0xf] %vm1879_vm10, %v1874_v6 }
 0x190   : > { %v1777_v60 = vadd.f32 %v1776_v47, %v1775_v7  ;;  %v1877_v10 = vpack.c.bf16 %v3366_v18, %v3366_v18  ;;  %v1780_v23 = vsel %vm1038_vm6, %v3366_v18, 0.0 }
 0x192   : > { %v1779_v21 = vadd.f32 %v1778_v13, %v1777_v60  ;;  %1894 = vst.msk [vmem:[%s3233_s17 + $0x38] sm:$0xf] %vm1879_vm10, %v1877_v10 }
 0x193   : > { %v1714_v22 = vpop.f32.mrf.mxu3 }
 0x194   : > { %v1732_v26 = vadd.f32 %v1714_v22, %v1536_v16  ;;  %v1781_v27 = vadd.f32 %v1780_v23, %v1779_v21 }
 0x196   : > { %v3383_v14 = vadd.f32 %v3223_v5, %v1732_v26 }
 0x198   : > { %v1782_v15 = vsel %vm1038_vm6, %v3383_v14, 0.0  ;;  %v1878_v52 = vpack.c.bf16 %v3383_v14, %v3383_v14 }
 0x199   : > { %v1783_v35 = vadd.f32 %v1782_v15, %v1781_v27 }
 0x19a   : > { %1895 = vst.msk [vmem:[%s3233_s17 + $0x3c] sm:$0xf] %vm1879_vm10, %v1878_v52 }
 0x19b   : > { %v1784_v44 = vrot.slane %v1783_v35, 4 }
 0x19d   : > { %v1785_v19 = vadd.f32 %v1784_v44, %v1783_v35 }
 0x19f   : > { %v1786_v54 = vrot.slane %v1785_v19, 2 }
 0x1a1   : > { %v1787_v38 = vadd.f32 %v1786_v54, %v1785_v19 }
 0x1a3   : > { %v1788_v2 = vrot.slane %v1787_v38, 1 }
 0x1a5   : > { %v1789_v5 = vadd.f32 %v1788_v2, %v1787_v38 }
 0x1a7   : > { %v1790_v37 = vmul.f32 0.0078125, %v1789_v5  ;;  %1808 = vst.msk [vmem:[%s530_s19] sm:$0x1] %vm1807_vm11, %v1789_v5 }
 0x1a9   : > { %v1791_v30 = vsub.f32 %v3226_v43, %v1790_v37  ;;  %v1792_v55 = vsub.f32 %v3240_v3, %v1790_v37  ;;  %v1793_v46 = vsub.f32 %v3249_v17, %v1790_v37  ;;  %v1794_v8 = vsub.f32 %v3258_v28, %v1790_v37 }
 0x1aa   : > { %v1795_v48 = vsub.f32 %v3267_v29, %v1790_v37  ;;  %v1796_v51 = vsub.f32 %v3276_v39, %v1790_v37  ;;  %v1797_v43 = vsub.f32 %v3283_v42, %v1790_v37  ;;  %v1798_v28 = vsub.f32 %v3290_v59, %v1790_v37 }
 0x1ab   : > { %v1809_v49 = vmul.f32 %v1791_v30, %v1791_v30  ;;  %v1810_v1 = vmul.f32 %v1792_v55, %v1792_v55  ;;  %v1811_v53 = vmul.f32 %v1793_v46, %v1793_v46  ;;  %v1812_v57 = vmul.f32 %v1794_v8, %v1794_v8 }
 0x1ac   : > { %v1813_v3 = vmul.f32 %v1795_v48, %v1795_v48  ;;  %v1814_v41 = vmul.f32 %v1796_v51, %v1796_v51  ;;  %v1799_v39 = vsub.f32 %v3297_v32, %v1790_v37  ;;  %v1815_v61 = vmul.f32 %v1797_v43, %v1797_v43 }
 0x1ad   : > { %v1825_v58 = vsel %vm1038_vm6, %v1809_v49, 0.0  ;;  %v1826_v25 = vsel %vm1038_vm6, %v1810_v1, 0.0  ;;  %v1828_v17 = vsel %vm1038_vm6, %v1811_v53, 0.0  ;;  %v1830_v29 = vsel %vm1038_vm6, %v1812_v57, 0.0 }
 0x1ae   : > { %v1827_v36 = vadd.f32 %v1826_v25, %v1825_v58  ;;  %v1832_v56 = vsel %vm1038_vm6, %v1813_v3, 0.0  ;;  %v1800_v63 = vsub.f32 %v3315_v24, %v1790_v37  ;;  %v1816_v31 = vmul.f32 %v1798_v28, %v1798_v28 }
 0x1af   : > { %v1834_v42 = vsel %vm1038_vm6, %v1814_v41, 0.0  ;;  %v1801_v34 = vsub.f32 %v3338_v50, %v1790_v37  ;;  %v1817_v0 = vmul.f32 %v1799_v39, %v1799_v39  ;;  %v1836_v59 = vsel %vm1038_vm6, %v1815_v61, 0.0 }
 0x1b0   : > { %v1829_v40 = vadd.f32 %v1828_v17, %v1827_v36  ;;  %v1802_v20 = vsub.f32 %v3359_v33, %v1790_v37  ;;  %v1818_v6 = vmul.f32 %v1800_v63, %v1800_v63  ;;  %v1838_v32 = vsel %vm1038_vm6, %v1816_v31, 0.0 }
 0x1b1   : > { %v1803_v47 = vsub.f32 %v3322_v4, %v1790_v37  ;;  %v1819_v60 = vmul.f32 %v1801_v34, %v1801_v34  ;;  %v1840_v24 = vsel %vm1038_vm6, %v1817_v0, 0.0  ;;  %v1804_v13 = vsub.f32 %v3345_v45, %v1790_v37 }
 0x1b2   : > { %v1831_v12 = vadd.f32 %v1830_v29, %v1829_v40  ;;  %v1820_v16 = vmul.f32 %v1802_v20, %v1802_v20  ;;  %v1842_v50 = vsel %vm1038_vm6, %v1818_v6, 0.0  ;;  %v1805_v22 = vsub.f32 %v3366_v18, %v1790_v37 }
 0x1b3   : > { %v1821_v23 = vmul.f32 %v1803_v47, %v1803_v47  ;;  %v1844_v33 = vsel %vm1038_vm6, %v1819_v60, 0.0  ;;  %v1806_v27 = vsub.f32 %v3383_v14, %v1790_v37  ;;  %v1822_v15 = vmul.f32 %v1804_v13, %v1804_v13 }
 0x1b4   : > { %v1833_v62 = vadd.f32 %v1832_v56, %v1831_v12  ;;  %v1846_v4 = vsel %vm1038_vm6, %v1820_v16, 0.0  ;;  %v1823_v35 = vmul.f32 %v1805_v22, %v1805_v22 }
 0x1b5   : > { %v1848_v45 = vsel %vm1038_vm6, %v1821_v23, 0.0  ;;  %v1824_v19 = vmul.f32 %v1806_v27, %v1806_v27  ;;  %v1850_v54 = vsel %vm1038_vm6, %v1822_v15, 0.0 }
 0x1b6   : > { %v1835_v9 = vadd.f32 %v1834_v42, %v1833_v62  ;;  %v1852_v18 = vsel %vm1038_vm6, %v1823_v35, 0.0 }
 0x1b7   : > { %v1854_v5 = vsel %vm1038_vm6, %v1824_v19, 0.0 }
 0x1b8   : > { %v1837_v11 = vadd.f32 %v1836_v59, %v1835_v9 }
 0x1ba   : > { %v1839_v7 = vadd.f32 %v1838_v32, %v1837_v11 }
 0x1bc   : > { %v1841_v10 = vadd.f32 %v1840_v24, %v1839_v7 }
 0x1be   : > { %v1843_v21 = vadd.f32 %v1842_v50, %v1841_v10 }
 0x1c0   : > { %v1845_v26 = vadd.f32 %v1844_v33, %v1843_v21 }
 0x1c2   : > { %v1847_v52 = vadd.f32 %v1846_v4, %v1845_v26 }
 0x1c4   : > { %v1849_v44 = vadd.f32 %v1848_v45, %v1847_v52 }
 0x1c6   : > { %v1851_v38 = vadd.f32 %v1850_v54, %v1849_v44 }
 0x1c8   : > { %v1853_v2 = vadd.f32 %v1852_v18, %v1851_v38 }
 0x1ca   : > { %v1855_v30 = vadd.f32 %v1854_v5, %v1853_v2 }
 0x1cc   : > { %v1856_v14 = vrot.slane %v1855_v30, 4 }
 0x1ce   : > { %v1857_v37 = vadd.f32 %v1856_v14, %v1855_v30 }
 0x1d0   : > { %v1858_v55 = vrot.slane %v1857_v37, 2 }
 0x1d2   : > { %v1859_v46 = vadd.f32 %v1858_v55, %v1857_v37 }
 0x1d4   : > { %v1860_v8 = vrot.slane %v1859_v46, 1 }
 0x1d6   : > { %v1861_v49 = vadd.f32 %v1860_v8, %v1859_v46 }
 0x1d8   : > { %1862 = vst.msk [vmem:[%s537_s24] sm:$0x1] %vm1807_vm11, %v1861_v49 }
 0x1d9 PF: > { %s20_s13 = sadd.s32 1, %s2567_s13   ;;  %s3461_s30 = smov %s2559_s11 }
 0x1da   : > { %p17_p12 = scmp.ge.s32.totalorder %s20_s13, 6   ;;  %s3462_s10 = smov %s2563_s12 }
 0x1db   : > { %s3463_s11 = smov %s3466_s14  ;;  %s3464_s12 = smov %s3470_s15 }
 0x1dc   :  { %19 = sbr.rel (!%p17_p12) target bundleno = 3 (0x3), region = 112 }

// kernel: dncnn_forward.9
= control target key start
LH: loop header
LB: loop body
LE: loop exit
PB: predicated region body
PF: predicated region fallthrough
CT: control target
= control target key end

     0   :  { %s2310_s24 = smov 0   ;;  %s2312_s25 = smov 0   ;;  %s2985_s0 = inlined_call_operand.vmem [shape: f32[1,32], index: 0, kind: input, shape index: {}]   ;;  %s2986_s1 = inlined_call_operand.vmem [shape: f32[1,32], index: 1, kind: input, shape index: {}]   ;;  %s2987_s2 = inlined_call_operand.vmem [shape: bf16[2,16,16,32], index: 2, kind: input, shape index: {}, may-alias: {2,3,4}]   ;;  %s2988_s3 = inlined_call_operand.vmem [shape: bf16[2,16,16,32], index: 3, kind: input, shape index: {}, may-alias: {2,3,4}]   ;;  %s2989_s4 = inlined_call_operand.vmem [shape: bf16[2,16,16,32], index: 4, kind: input, shape index: {}, may-alias: {2,3,4}]   ;;  %s2990_s5 = inlined_call_operand.vmem [shape: bf16[3,96,3], index: 5, kind: input, shape index: {}]   ;;  %s2991_s6 = inlined_call_operand.vmem [shape: f32[1,3], index: 6, kind: input, shape index: {}]   ;;  %s2992_s7 = inlined_call_operand.vmem [shape: f32[2,16,16,3], index: 7, kind: output, shape index: {}]  }
   0x1   :  { %s2314_s26 = smov 0   ;;  %s2316_s27 = smov 0  }
   0x2   :  { %s2318_s28 = smov 0  }
   0x3 LB: > { %s26_s29 = sadd.s32 1, %s2258_s26  ;;  %s29_s30 = sadd.s32 1, %s2262_s27  ;;  %s2266_s28 = sphi %s2318_s28, %s17_s28   ;;  %s2262_s27 = sphi %s2316_s27, %s2999_s27   ;;  %s2258_s26 = sphi %s2314_s26, %s2998_s26   ;;  %s2254_s25 = sphi %s2312_s25, %s2997_s25   ;;  %s2250_s24 = sphi %s2310_s24, %s2996_s24  }
   0x4   : > { %p27_p0 = scmp.ge.s32.totalorder %s26_s29, 2  ;;  %p1830_p1 = scmp.ge.s32.totalorder %s2266_s28, 1 }
   0x5   : > { %p323_p2 = scmp.lt.s32.totalorder %s2266_s28, 5 }
   0x6   : > { %s3001_s29 = smov (%p27_p0, %s26_s29), 0  ;;  %s3003_s30 = smov (!%p27_p0, %s29_s30), %s2262_s27 }
   0x7   : > { %p324_p3 = pnand %p1830_p1, %p323_p2  ;;  %p31_p4 = scmp.ge.s32.totalorder %s3003_s30, 2 }
   0x8   : > { %s2343_s8 = sshll.u32 (!%p324_p3), %s2250_s24, 3  ;;  %p392_p5 = scmp.lt.s32.totalorder (!%p324_p3), %s2254_s25, 1 }
   0x9   : > { %s3005_s30 = smov (%p31_p4, %s3003_s30), 0  ;;  %327 = sbr.rel (%p324_p3) target bundleno = 407 (0x197), region = 48 }
   0xa   : > { %p394_p6 = scmp.lt.s32.totalorder (!%p324_p3), %s2343_s8, 15  ;;  %s1836_s12 = sadd.s32 (!%p324_p3), 4294967295, %s2343_s8 }
   0xb   : > { %p404_p7 = scmp.gt.s32.totalorder (!%p324_p3), %s1836_s12, 0  ;;  %p1837_p8 = scmp.lt.s32.totalorder (!%p324_p3), %s1836_s12, 15 }
   0xc   : > { %p536_p9 = scmp.gt.s32.totalorder (!%p324_p3), %s2250_s24, 0  ;;  %s2268_s16 = smov (!%p324_p3), 32  }
   0xd   : > { %s420_s18 = sadd.s32 (!%p324_p3), 8, %s2343_s8  ;;  %s2269_s19 = smov (!%p324_p3), 64  }
   0xe   : > { %v568_v0 = vlaneseq  ;;  %s3007_s25 = smov (!%p392_p5, %s2254_s25), 1  ;;  %v2364_v2 = vld [vmem:[%s2985_s0] ss:$0 sm:$0xff]  ;;  %p2469_p10 = scmp.lt.s32.totalorder %s420_s18, 15  ;;  %vm947_vm6 = vcmask 261120   ;;  %vm978_vm7 = vcmask 523264  }
   0xf   : > { %s395_s9 = scalar_select %p394_p6, %s2343_s8, 15  ;;  %v2375_v9 = vld [vmem:[%s2986_s1] ss:$0 sm:$0xff]  ;;  %vm1069_vm8 = vcmask 781312   ;;  %vm1224_vm9 = vcmask 785408   ;;  %vm1662_vm10 = vcmask 23552  }
  0x10   : > { %s2347_s10 = sshll.u32 %s3007_s25, 5  ;;  %v2349_v1 = vshrl.u32 %v568_v0, 7  ;;  %s3011_s18 = smov (!%p2469_p10, %s420_s18), 15 }
  0x11   : > { %s1832_s11 = sshll.u32 %s395_s9, 1  ;;  %s3013_s18 = smov (!%p2469_p10, %s3011_s18), 15 }
  0x12   : > { %s2353_s13 = sadd.s32 %s2347_s10, %s1832_s11  ;;  %v2368_v4 = vadd.s32 8, %v2349_v1  ;;  %vm656_vm0 = vcmp.lt.s32.totalorder %v2349_v1, 7  ;;  %s2534_s8 = sshll.u32 %s3013_s18, 1  ;;  %vm593_vm4 = vcmp.lt.s32.totalorder %v2349_v1, 1  ;;  %vm571_vm5 = vcmp.eq.s32.totalorder %v2349_v1, 0 }
  0x13   : > { %s1834_s14 = sshll.u32 %s2353_s13, 2  ;;  %s429_s21 = sadd.s32 %s2534_s8, %s2347_s10 }
  0x14   : > { %s2359_s17 = scalar_lea.vmem %s2987_s2, %s1834_s14  ;;  %vm635_vm1 = vcmp.eq.s32.totalorder %v2368_v4, 15  ;;  %p552_p11 = scmp.lt.s32.totalorder %s2250_s24, 1 }
  0x15   : > { %v2158_v3 = vld [vmem:[%s2359_s17 + $0x8] sm:$0xff]   ;;  %v2163_v5 = vld [vmem:[%s2359_s17 + $0x30] sm:$0xff]   ;;  %s405_s20 = scalar_select %p404_p7, %s1836_s12, 0  ;;  %v2119_v6 = vld [vmem:[%s2359_s17] sm:$0xff]  }
  0x16   : > { %v2124_v7 = vunpack.c.l.bf16 %v2158_v3  ;;  %v2125_v8 = vunpack.c.h.bf16 %v2158_v3  ;;  %v2144_v10 = vunpack.c.l.bf16 %v2163_v5  ;;  %v2145_v11 = vunpack.c.h.bf16 %v2163_v5  ;;  %v2164_v12 = vld [vmem:[%s2359_s17 + $0x38] sm:$0xff]   ;;  %s2383_s23 = scalar_select %p536_p9, 1, 0 }
  0x17   : > { %v2120_v13 = vunpack.c.l.bf16 %v2119_v6  ;;  %v2121_v14 = vunpack.c.h.bf16 %v2119_v6  ;;  %v2148_v15 = vunpack.c.l.bf16 %v2164_v12  ;;  %v2149_v16 = vunpack.c.h.bf16 %v2164_v12  ;;  %s3009_s20 = smov (!%p1837_p8, %s405_s20), 15  ;;  %s1855_s24 = sshll.u32 %s2353_s13, 3 }
  0x18   : > { %v487_v17 = vmul.f32 %v2364_v2, %v2124_v7  ;;  %v488_v18 = vmul.f32 %v2364_v2, %v2125_v8  ;;  %v497_v19 = vmul.f32 %v2364_v2, %v2144_v10  ;;  %v498_v20 = vmul.f32 %v2364_v2, %v2145_v11  ;;  %s1842_s25 = sshll.u32 %s3009_s20, 1  ;;  %s2910_s18 = scalar_lea.vmem %s2992_s7, %s1855_s24 }
  0x19   : > { %v485_v21 = vmul.f32 %v2364_v2, %v2120_v13  ;;  %v486_v22 = vmul.f32 %v2364_v2, %v2121_v14  ;;  %v499_v23 = vmul.f32 %v2364_v2, %v2148_v15  ;;  %v500_v24 = vmul.f32 %v2364_v2, %v2149_v16  ;;  %s412_s9 = sadd.s32 %s1842_s25, %s2347_s10  ;;  %s2575_s10 = sshll.u32 %s429_s21, 2 }
  0x1a   : > { %v506_v25 = vadd.f32 %v2375_v9, %v487_v17  ;;  %v507_v26 = vadd.f32 %v2375_v9, %v488_v18  ;;  %v516_v27 = vadd.f32 %v2375_v9, %v497_v19  ;;  %v517_v28 = vadd.f32 %v2375_v9, %v498_v20  ;;  %s1844_s11 = sshll.u32 %s412_s9, 2  ;;  %s431_s9 = scalar_lea.vmem %s2989_s4, %s2575_s10 }
  0x1b   : > { %v504_v29 = vadd.f32 %v2375_v9, %v485_v21  ;;  %v505_v30 = vadd.f32 %v2375_v9, %v486_v22  ;;  %v548_v35 = vstv %s2383_s23  ;;  %v518_v37 = vadd.f32 %v2375_v9, %v499_v23  ;;  %s414_s15 = scalar_lea.vmem %s2988_s3, %s1844_s11 }
  0x1c   : > { %v2397_v31 = vmax.f32 %v506_v25, 0.0  ;;  %v2399_v32 = vmax.f32 %v507_v26, 0.0  ;;  %v2401_v33 = vmax.f32 %v516_v27, 0.0  ;;  %v2403_v34 = vmax.f32 %v517_v28, 0.0  ;;  %v2151_v54 = vld [vmem:[%s414_s15] sm:$0xff]  }
  0x1d   : > { %v2407_v36 = vmax.f32 %v504_v29, 0.0  ;;  %v2417_v40 = vmax.f32 %v505_v30, 0.0  ;;  %v519_v41 = vadd.f32 %v2375_v9, %v500_v24  ;;  %v2152_v3 = vunpack.c.l.bf16 %v2151_v54  ;;  %s563_s11 = scalar_select %p552_p11, 1, 0 }
  0x1e   : > { %v721_v38 = vpack.c.bf16 %v2397_v31, %v2397_v31  ;;  %v722_v39 = vpack.c.bf16 %v2399_v32, %v2399_v32  ;;  %v638_v42 = vrot.slane %v2397_v31, 1  ;;  %v648_v43 = vrot.slane %v2399_v32, 1 }
  0x1f   : > { %v731_v44 = vpack.c.bf16 %v2401_v33, %v2401_v33  ;;  %v732_v45 = vpack.c.bf16 %v2403_v34, %v2403_v34  ;;  %v643_v48 = vrot.slane %v2401_v33, 1  ;;  %v653_v49 = vrot.slane %v2403_v34, 1 }
  0x20   : > { %v831_v46 = vunpack.c.l.b16 %v721_v38  ;;  %v832_v47 = vunpack.c.l.b16 %v722_v39  ;;  %v659_v50 = vsel %vm656_vm0, %v638_v42, %v648_v43  ;;  %v669_v51 = vsel %vm656_vm0, %v648_v43, %v638_v42  ;;  %v2160_v42 = vld [vmem:[%s2359_s17 + $0x18] sm:$0xff]  }
  0x21   : > { %v841_v52 = vunpack.c.l.b16 %v731_v44  ;;  %v842_v53 = vunpack.c.l.b16 %v732_v45  ;;  %v682_v56 = vsel %vm635_vm1, 0.0, %v669_v51  ;;  %v741_v57 = vpack.c.bf16 %v659_v50, %v659_v50 }
  0x22   : > { %v849_v55 = vpack.c.b16 %v832_v47, %v831_v46  ;;  %v664_v58 = vsel %vm656_vm0, %v643_v48, %v653_v49  ;;  %v742_v59 = vpack.c.bf16 %v682_v56, %v682_v56  ;;  %v674_v61 = vsel %vm656_vm0, %v653_v49, %v643_v48 }
  0x23   : > { %v854_v60 = vpack.c.b16 %v842_v53, %v841_v52  ;;  %v751_v62 = vpack.c.bf16 %v664_v58, %v664_v58  ;;  %v901_v63 = vunpack.c.l.b16 %v741_v57  ;;  %v692_v0 = vsel %vm635_vm1, 0.0, %v674_v61 }
  0x24   : > { %861 = vrot.lane.b32.xlu0 %v849_v55, %s2268_s16  ;;  %v2153_v5 = vunpack.c.h.bf16 %v2151_v54  ;;  %v902_v6 = vunpack.c.l.b16 %v742_v59  ;;  %v752_v7 = vpack.c.bf16 %v692_v0, %v692_v0  ;;  %v637_v10 = vrot.slane %v2407_v36, 1  ;;  %v2162_v55 = vld [vmem:[%s2359_s17 + $0x28] sm:$0xff]  }
  0x25   : > { %v911_v8 = vunpack.c.l.b16 %v751_v62  ;;  %v541_v11 = vmul.f32 %v2364_v2, %v2152_v3  ;;  %v647_v13 = vrot.slane %v2417_v40, 1  ;;  %v2445_v14 = vmax.f32 %v518_v37, 0.0 }
  0x26   : > { %v542_v12 = vmul.f32 %v2364_v2, %v2153_v5  ;;  %v919_v15 = vpack.c.b16 %v902_v6, %v901_v63  ;;  %v912_v16 = vunpack.c.l.b16 %v752_v7  ;;  %v2448_v17 = vmax.f32 %v519_v41, 0.0 }
  0x27   : > { %v719_v18 = vpack.c.bf16 %v2407_v36, %v2407_v36  ;;  %v543_v19 = vadd.f32 %v2375_v9, %v541_v11  ;;  %v658_v21 = vsel %vm656_vm0, %v637_v10, %v647_v13  ;;  %v668_v22 = vsel %vm656_vm0, %v647_v13, %v637_v10 }
  0x28   : > { %v544_v20 = vadd.f32 %v2375_v9, %v542_v12  ;;  %931 = vrot.lane.b32.xlu1 %v919_v15, %s2269_s19  ;;  %vm2459_vm2 = vcmp.eq.s32.totalorder %v548_v35, 1  ;;  %v680_v24 = vsel %vm635_vm1, 0.0, %v668_v22  ;;  %v739_v25 = vpack.c.bf16 %v658_v21, %v658_v21  ;;  %v2159_v35 = vld [vmem:[%s2359_s17 + $0x10] sm:$0xff]  }
  0x29   : > { %v733_v26 = vpack.c.bf16 %v2445_v14, %v2445_v14  ;;  %v545_v27 = vmax.f32 %v543_v19, 0.0  ;;  %v740_v29 = vpack.c.bf16 %v680_v24, %v680_v24  ;;  %v734_v30 = vpack.c.bf16 %v2448_v17, %v2448_v17 }
  0x2a   : > { %v546_v28 = vmax.f32 %v544_v20, 0.0  ;;  %v924_v37 = vpack.c.b16 %v912_v16, %v911_v8  ;;  %v2476_v38 = vunpack.c.l.b16 %v739_v25  ;;  %v720_v39 = vpack.c.bf16 %v2417_v40, %v2417_v40 }
  0x2b   : > { %v829_v41 = vunpack.c.l.b16 %v719_v18  ;;  %v2484_v43 = vsel %vm2459_vm2, %v545_v27, 0.0  ;;  %v900_v45 = vunpack.c.l.b16 %v740_v29  ;;  %v2490_v46 = vunpack.c.l.b16 %v733_v26 }
  0x2c   : > { %871 = vrot.lane.b32.xlu0 %v854_v60, %s2268_s16  ;;  %v2488_v44 = vsel %vm2459_vm2, %v546_v28, 0.0  ;;  %v636_v47 = vrot.slane %v2484_v43, 1  ;;  %v830_v49 = vunpack.c.l.b16 %v720_v39  ;;  %v2128_v50 = vunpack.c.l.bf16 %v2159_v35 }
  0x2d   : > { %v646_v48 = vrot.slane %v2488_v44, 1  ;;  %v918_v51 = vpack.c.b16 %v900_v45, %v2476_v38  ;;  %v2501_v52 = vunpack.c.l.b16 %v734_v30  ;;  %v2129_v53 = vunpack.c.h.bf16 %v2159_v35 }
  0x2e   : > { %v2132_v54 = vunpack.c.l.bf16 %v2160_v42  ;;  %v848_v58 = vpack.c.b16 %v830_v49, %v829_v41  ;;  %v489_v59 = vmul.f32 %v2364_v2, %v2128_v50  ;;  %v2133_v63 = vunpack.c.h.bf16 %v2160_v42 }
  0x2f   : > { %v657_v56 = vsel %vm656_vm0, %v636_v47, %v646_v48  ;;  %v667_v57 = vsel %vm656_vm0, %v646_v48, %v636_v47  ;;  %v490_v62 = vmul.f32 %v2364_v2, %v2129_v53  ;;  %v2140_v6 = vunpack.c.l.bf16 %v2162_v55  ;;  %v2567_v53 = vld [vmem:[%s2990_s5 + $0x88] sm:$0xff] }
  0x30   : > { %v678_v60 = vsel %vm635_vm1, 0.0, %v667_v57  ;;  %v737_v61 = vpack.c.bf16 %v657_v56, %v657_v56  ;;  %941 = vrot.lane.b32.xlu1 %v924_v37, %s2269_s19  ;;  %859 = vrot.lane.b32.xlu2 %v848_v58, %s2268_s16  ;;  %v508_v3 = vadd.f32 %v2375_v9, %v489_v59  ;;  %v491_v5 = vmul.f32 %v2364_v2, %v2132_v54  ;;  %v2161_v59 = vld [vmem:[%s2359_s17 + $0x20] sm:$0xff]  }
  0x31   : > { %v738_v0 = vpack.c.bf16 %v678_v60, %v678_v60  ;;  %v509_v8 = vadd.f32 %v2375_v9, %v490_v62  ;;  %v492_v10 = vmul.f32 %v2364_v2, %v2133_v63  ;;  %v717_v11 = vpack.c.bf16 %v2484_v43, %v2484_v43  ;;  %1579 = vmatpush.bf16.msra.mxu2 %v2567_v53 }
  0x32   : > { %v897_v7 = vunpack.c.l.b16 %v737_v61  ;;  %v2523_v13 = vmax.f32 %v508_v3, 0.0  ;;  %v510_v15 = vadd.f32 %v2375_v9, %v491_v5  ;;  %v718_v16 = vpack.c.bf16 %v2488_v44, %v2488_v44 }
  0x33   : > { %v898_v12 = vunpack.c.l.b16 %v738_v0  ;;  %v2528_v18 = vmax.f32 %v509_v8, 0.0  ;;  %v511_v19 = vadd.f32 %v2375_v9, %v492_v10  ;;  %v827_v20 = vunpack.c.l.b16 %v717_v11 }
  0x34   : > { %v2141_v21 = vunpack.c.h.bf16 %v2162_v55  ;;  %v639_v23 = vrot.slane %v2523_v13, 1  ;;  %v2532_v24 = vmax.f32 %v510_v15, 0.0  ;;  %v828_v25 = vunpack.c.l.b16 %v718_v16 }
  0x35   : > { %v917_v22 = vpack.c.b16 %v898_v12, %v897_v7  ;;  %v649_v26 = vrot.slane %v2528_v18, 1  ;;  %v2537_v27 = vmax.f32 %v511_v19, 0.0  ;;  %v495_v28 = vmul.f32 %v2364_v2, %v2140_v6 }
  0x36   : > { %v496_v29 = vmul.f32 %v2364_v2, %v2141_v21  ;;  %v725_v30 = vpack.c.bf16 %v2532_v24, %v2532_v24  ;;  %v847_v35 = vpack.c.b16 %v828_v25, %v827_v20  ;;  %v723_v37 = vpack.c.bf16 %v2523_v13, %v2523_v13 }
  0x37   : > { %927 = vrot.lane.b32.xlu0 %v917_v22, %s2269_s19  ;;  %v724_v38 = vpack.c.bf16 %v2528_v18, %v2528_v18  ;;  %v660_v39 = vsel %vm656_vm0, %v639_v23, %v649_v26  ;;  %v670_v41 = vsel %vm656_vm0, %v649_v26, %v639_v23  ;;  %v726_v42 = vpack.c.bf16 %v2537_v27, %v2537_v27 }
  0x38   : > { %v514_v45 = vadd.f32 %v2375_v9, %v495_v28  ;;  %929 = vrot.lane.b32.xlu1 %v918_v51, %s2269_s19  ;;  %v855_v47 = vpack.c.b16 %v2501_v52, %v2490_v46  ;;  %v684_v48 = vsel %vm635_vm1, 0.0, %v670_v41  ;;  %v743_v49 = vpack.c.bf16 %v660_v39, %v660_v39  ;;  %857 = vrot.lane.b32.xlu2 %v847_v35, %s2268_s16 }
  0x39   : > { %v515_v50 = vadd.f32 %v2375_v9, %v496_v29  ;;  %v744_v54 = vpack.c.bf16 %v684_v48, %v684_v48  ;;  %v835_v55 = vunpack.c.l.b16 %v725_v30  ;;  %v833_v51 = vunpack.c.l.b16 %v723_v37  ;;  %v2155_v30 = vld [vmem:[%s431_s9] sm:$0xff]  }
  0x3a   : > { %v2569_v56 = vmax.f32 %v514_v45, 0.0  ;;  %v903_v57 = vunpack.c.l.b16 %v743_v49  ;;  %v834_v52 = vunpack.c.l.b16 %v724_v38  ;;  %v644_v58 = vrot.slane %v2445_v14, 1 }
  0x3b   : > { %v2571_v46 = vmax.f32 %v515_v50, 0.0  ;;  %v904_v60 = vunpack.c.l.b16 %v744_v54  ;;  %v836_v61 = vunpack.c.l.b16 %v726_v42  ;;  %v654_v6 = vrot.slane %v2448_v17, 1 }
  0x3c   : > { %v729_v62 = vpack.c.bf16 %v2569_v56, %v2569_v56  ;;  %v642_v63 = vrot.slane %v2569_v56, 1  ;;  %v850_v5 = vpack.c.b16 %v834_v52, %v833_v51  ;;  %v2136_v10 = vunpack.c.l.bf16 %v2161_v59 }
  0x3d   : > { %v730_v0 = vpack.c.bf16 %v2571_v46, %v2571_v46  ;;  %v652_v3 = vrot.slane %v2571_v46, 1  ;;  %v920_v7 = vpack.c.b16 %v904_v60, %v903_v57  ;;  %v2137_v11 = vunpack.c.h.bf16 %v2161_v59 }
  0x3e   : > { %v839_v8 = vunpack.c.l.b16 %v729_v62  ;;  %v665_v19 = vsel %vm656_vm0, %v644_v58, %v654_v6  ;;  %v675_v22 = vsel %vm656_vm0, %v654_v6, %v644_v58  ;;  %v851_v25 = vpack.c.b16 %v836_v61, %v835_v55 }
  0x3f   : > { %873 = vrot.lane.b32.xlu0 %v855_v47, %s2268_s16  ;;  %v840_v12 = vunpack.c.l.b16 %v730_v0  ;;  %v663_v15 = vsel %vm656_vm0, %v642_v63, %v652_v3  ;;  %v673_v16 = vsel %vm656_vm0, %v652_v3, %v642_v63  ;;  %v753_v23 = vpack.c.bf16 %v665_v19, %v665_v19 }
  0x40   : > { %v690_v20 = vsel %vm635_vm1, 0.0, %v673_v16  ;;  %v749_v21 = vpack.c.bf16 %v663_v15, %v663_v15  ;;  %933 = vrot.lane.b32.xlu1 %v920_v7, %s2269_s19  ;;  %863 = vrot.lane.b32.xlu2 %v850_v5, %s2268_s16  ;;  %v694_v28 = vsel %vm635_vm1, 0.0, %v675_v22  ;;  %v493_v29 = vmul.f32 %v2364_v2, %v2136_v10 }
  0x41   : > { %v750_v26 = vpack.c.bf16 %v690_v20, %v690_v20  ;;  %v853_v35 = vpack.c.b16 %v840_v12, %v839_v8  ;;  %v754_v37 = vpack.c.bf16 %v694_v28, %v694_v28  ;;  %v913_v38 = vunpack.c.l.b16 %v753_v23 }
  0x42   : > { %v494_v39 = vmul.f32 %v2364_v2, %v2137_v11  ;;  %v909_v41 = vunpack.c.l.b16 %v749_v21  ;;  %v512_v42 = vadd.f32 %v2375_v9, %v493_v29  ;;  %v640_v45 = vrot.slane %v2532_v24, 1 }
  0x43   : > { %v650_v47 = vrot.slane %v2537_v27, 1  ;;  %v914_v48 = vunpack.c.l.b16 %v754_v37  ;;  %v2156_v50 = vunpack.c.l.bf16 %v2155_v30  ;;  %v2157_v54 = vunpack.c.h.bf16 %v2155_v30 }
  0x44   : > { %v513_v49 = vadd.f32 %v2375_v9, %v494_v39  ;;  %v910_v55 = vunpack.c.l.b16 %v750_v26  ;;  %v2611_v51 = vmax.f32 %v512_v42, 0.0  ;;  %v564_v15 = vstv %s563_s11 }
  0x45   : > { %v661_v57 = vsel %vm656_vm0, %v640_v45, %v650_v47  ;;  %v671_v52 = vsel %vm656_vm0, %v650_v47, %v640_v45  ;;  %v925_v58 = vpack.c.b16 %v914_v48, %v913_v38  ;;  %v557_v3 = vmul.f32 %v2364_v2, %v2156_v50 }
  0x46   : > { %v2619_v59 = vmax.f32 %v513_v49, 0.0  ;;  %v686_v60 = vsel %vm635_vm1, 0.0, %v671_v52  ;;  %v745_v61 = vpack.c.bf16 %v661_v57, %v661_v57  ;;  %v727_v62 = vpack.c.bf16 %v2611_v51, %v2611_v51 }
  0x47   : > { %865 = vrot.lane.b32.xlu0 %v851_v25, %s2268_s16  ;;  %v746_v63 = vpack.c.bf16 %v686_v60, %v686_v60  ;;  %v641_v0 = vrot.slane %v2611_v51, 1  ;;  %v558_v8 = vmul.f32 %v2364_v2, %v2157_v54  ;;  %v559_v12 = vadd.f32 %v2375_v9, %v557_v3 }
  0x48   : > { %v728_v5 = vpack.c.bf16 %v2619_v59, %v2619_v59  ;;  %v905_v6 = vunpack.c.l.b16 %v745_v61  ;;  %v651_v7 = vrot.slane %v2619_v59, 1  ;;  %869 = vrot.lane.b32.xlu1 %v853_v35, %s2268_s16  ;;  %943 = vrot.lane.b32.xlu2 %v925_v58, %s2269_s19  ;;  %v837_v10 = vunpack.c.l.b16 %v727_v62 }
  0x49   : > { %v906_v11 = vunpack.c.l.b16 %v746_v63  ;;  %v560_v21 = vadd.f32 %v2375_v9, %v558_v8  ;;  %v923_v22 = vpack.c.b16 %v910_v55, %v909_v41  ;;  %v561_v23 = vmax.f32 %v559_v12, 0.0  ;;  %v2692_v12 = vld [vmem:[%s2990_s5 + $0x78] sm:$0xff] }
  0x4a   : > { %v838_v16 = vunpack.c.l.b16 %v728_v5  ;;  %v662_v19 = vsel %vm656_vm0, %v641_v0, %v651_v7  ;;  %v672_v20 = vsel %vm656_vm0, %v651_v7, %v641_v0  ;;  %vm565_vm3 = vcmp.eq.s32.totalorder %v564_v15, 1  ;;  %v2102_v15 = vld [vmem:[%s2990_s5 + $0x50] sm:$0xff] }
  0x4b   : > { %v688_v2 = vsel %vm635_vm1, 0.0, %v672_v20  ;;  %v747_v25 = vpack.c.bf16 %v662_v19, %v662_v19  ;;  %v562_v28 = vmax.f32 %v560_v21, 0.0  ;;  %v921_v30 = vpack.c.b16 %v906_v11, %v905_v6  ;;  %v2103_v11 = vld [vmem:[%s2990_s5 + $0x58] sm:$0xff]  ;;  %v2704_v19 = vld [vmem:[%s2990_s5 + $0x70] sm:$0xff]  ;;  %v2101_v20 = vld [vmem:[%s2990_s5 + $0x48] sm:$0xff] }
  0x4c   : > { %v748_v26 = vpack.c.bf16 %v688_v2, %v688_v2  ;;  %v852_v29 = vpack.c.b16 %v838_v16, %v837_v10  ;;  %v2642_v35 = vsel %vm565_vm3, %v561_v23, 0.0  ;;  %v585_v63 = vrot.slane %v2399_v32, 7  ;;  %v2677_v32 = vld [vmem:[%s2990_s5 + $0x80] sm:$0xff]  ;;  %2165 = vmatpush.bf16.msra.mxu3 %v2103_v11  ;;  %1251 = vmatpush.bf16.msra.mxu0 %v2103_v11  ;;  %v2089_v16 = vld [vmem:[%s2990_s5 + $0x28] sm:$0xff]  ;;  %v2087_v23 = vld [vmem:[%s2990_s5 + $0x18] sm:$0xff] }
  0x4d   : > { %v2644_v37 = vsel %vm565_vm3, %v562_v28, 0.0  ;;  %v645_v38 = vrot.slane %v2642_v35, 1  ;;  %v735_v39 = vpack.c.bf16 %v2642_v35, %v2642_v35  ;;  %v907_v42 = vunpack.c.l.b16 %v747_v25  ;;  %1580 = vmatpush.bf16.msra.mxu2 %v2677_v32  ;;  %1400 = vmatpush.bf16.msra.mxu1 %v2089_v16  ;;  %v2088_v21 = vld [vmem:[%s2990_s5 + $0x20] sm:$0xff] }
  0x4e   : > { %v655_v9 = vrot.slane %v2644_v37, 1  ;;  %v736_v41 = vpack.c.bf16 %v2644_v37, %v2644_v37  ;;  %v908_v45 = vunpack.c.l.b16 %v748_v26  ;;  %v575_v0 = vrot.slane %v2397_v31, 7  ;;  %v2100_v2 = vld [vmem:[%s2990_s5 + $0x40] sm:$0xff] }
  0x4f   : > { %939 = vrot.lane.b32.xlu0 %v923_v22, %s2269_s19  ;;  %v845_v47 = vunpack.c.l.b16 %v735_v39  ;;  %v2716_v22 = vld [vmem:[%s2990_s5 + $0x68] sm:$0xff]  ;;  %v2728_v25 = vld [vmem:[%s2990_s5 + $0x60] sm:$0xff]  ;;  %v580_v26 = vrot.slane %v2401_v33, 7  ;;  %v590_v28 = vrot.slane %v2403_v34, 7  ;;  %v2098_v33 = vld [vmem:[%s2990_s5 + $0x30] sm:$0xff]  ;;  %v583_v39 = vrot.slane %v2488_v44, 7 }
  0x50   : > { %867 = vrot.lane.b32.xlu1 %v852_v29, %s2268_s16  ;;  %935 = vrot.lane.b32.xlu2 %v921_v30, %s2269_s19  ;;  %v846_v48 = vunpack.c.l.b16 %v736_v41  ;;  %v666_v49 = vsel %vm656_vm0, %v645_v38, %v655_v9  ;;  %v676_v50 = vsel %vm656_vm0, %v655_v9, %v645_v38  ;;  %v922_v60 = vpack.c.b16 %v908_v45, %v907_v42  ;;  %v2099_v29 = vld [vmem:[%s2990_s5 + $0x38] sm:$0xff]  ;;  %v2086_v30 = vld [vmem:[%s2990_s5 + $0x10] sm:$0xff] }
  0x51   : > { %v696_v54 = vsel %vm635_vm1, 0.0, %v676_v50  ;;  %v755_v55 = vpack.c.bf16 %v666_v49, %v666_v49  ;;  %v606_v4 = vsel %vm593_vm4, %v585_v63, %v575_v0  ;;  %v596_v3 = vsel %vm593_vm4, %v575_v0, %v585_v63  ;;  %1581 = vmatpush.bf16.msra.mxu2 %v2692_v12  ;;  %2166 = vmatpush.bf16.msra.mxu3 %v2102_v15  ;;  %v2747_v34 = vld [vmem:[%s2990_s5 + $0x8] sm:$0xff] }
  0x52   : > { %v856_v57 = vpack.c.b16 %v846_v48, %v845_v47  ;;  %v756_v52 = vpack.c.bf16 %v696_v54, %v696_v54  ;;  %v618_v5 = vsel %vm571_vm5, 0.0, %v606_v4  ;;  %v702_v7 = vpack.c.bf16 %v596_v3, %v596_v3  ;;  %1252 = vmatpush.bf16.msra.mxu0 %v2102_v15  ;;  %1401 = vmatpush.bf16.msra.mxu1 %v2088_v21 }
  0x53   : > { %v915_v58 = vunpack.c.l.b16 %v755_v55  ;;  %v701_v6 = vpack.c.bf16 %v618_v5, %v618_v5  ;;  %v611_v38 = vsel %vm593_vm4, %v590_v28, %v580_v26  ;;  %v573_v9 = vrot.slane %v2484_v43, 7  ;;  %v2763_v43 = vld [vmem:[%s2990_s5] sm:$0xff] }
  0x54   : > { %v916_v61 = vunpack.c.l.b16 %v756_v52  ;;  %v2681_v8 = vunpack.c.l.b16 %v702_v7  ;;  %v601_v42 = vsel %vm593_vm4, %v580_v26, %v590_v28  ;;  %v628_v45 = vsel %vm571_vm5, 0.0, %v611_v38 }
  0x55   : > { %v2679_v31 = vunpack.c.l.b16 %v701_v6  ;;  %1582 = vmatpush.bf16.msra.mxu2 %v2704_v19  ;;  %2167 = vmatpush.bf16.msra.mxu3 %v2101_v20  ;;  %v584_v47 = vrot.slane %v2417_v40, 7  ;;  %v574_v48 = vrot.slane %v2407_v36, 7  ;;  %v711_v44 = vpack.c.bf16 %v628_v45, %v628_v45 }
  0x56   : > { %v926_v62 = vpack.c.b16 %v916_v61, %v915_v58  ;;  %1253 = vmatpush.bf16.msra.mxu0 %v2101_v20  ;;  %1402 = vmatpush.bf16.msra.mxu1 %v2087_v23  ;;  %v712_v49 = vpack.c.bf16 %v601_v42, %v601_v42  ;;  %v604_v50 = vsel %vm593_vm4, %v583_v39, %v573_v9  ;;  %v591_v61 = vrot.slane %v2448_v17, 7 }
  0x57   : > { %875 = vrot.lane.b32.xlu0 %v856_v57, %s2268_s16  ;;  %v799_v10 = vpack.c.b16 %v2681_v8, %v2679_v31  ;;  %v605_v40 = vsel %vm593_vm4, %v584_v47, %v574_v48  ;;  %v594_v36 = vsel %vm593_vm4, %v573_v9, %v583_v39  ;;  %v614_v55 = vsel %vm571_vm5, 0.0, %v604_v50 }
  0x58   : > { %937 = vrot.lane.b32.xlu2 %v922_v60, %s2269_s19  ;;  %945 = vrot.lane.b32.xlu1 %v926_v62, %s2269_s19  ;;  %v791_v52 = vunpack.c.l.b16 %v711_v44  ;;  %v792_v58 = vunpack.c.l.b16 %v712_v49  ;;  %v581_v60 = vrot.slane %v2445_v14, 7  ;;  %v595_v63 = vsel %vm593_vm4, %v574_v48, %v584_v47 }
  0x59   : > { %1583 = vmatpush.bf16.msra.mxu2 %v2716_v22  ;;  %2168 = vmatpush.bf16.msra.mxu3 %v2100_v2  ;;  %v616_v0 = vsel %vm571_vm5, 0.0, %v605_v40  ;;  %v697_v4 = vpack.c.bf16 %v614_v55, %v614_v55  ;;  %v698_v3 = vpack.c.bf16 %v594_v36, %v594_v36  ;;  %v576_v7 = vrot.slane %v2523_v13, 7 }
  0x5a   : > { %1254 = vmatpush.bf16.msra.mxu0 %v2100_v2  ;;  %1403 = vmatpush.bf16.msra.mxu1 %v2086_v30  ;;  %v586_v31 = vrot.slane %v2528_v18, 7  ;;  %v804_v17 = vpack.c.b16 %v792_v58, %v791_v52  ;;  %v700_v11 = vpack.c.bf16 %v595_v63, %v595_v63  ;;  %v612_v15 = vsel %vm593_vm4, %v591_v61, %v581_v60 }
  0x5b   : > { %v777_v2 = vunpack.c.l.b16 %v697_v4  ;;  %v602_v18 = vsel %vm593_vm4, %v581_v60, %v591_v61  ;;  %v630_v28 = vsel %vm571_vm5, 0.0, %v612_v15  ;;  %v577_v48 = vrot.slane %v2532_v24, 7 }
  0x5c   : > { %v607_v13 = vsel %vm593_vm4, %v586_v31, %v576_v7  ;;  %v780_v38 = vunpack.c.l.b16 %v700_v11  ;;  %v714_v42 = vpack.c.bf16 %v602_v18, %v602_v18  ;;  %v713_v47 = vpack.c.bf16 %v630_v28, %v630_v28 }
  0x5d   : > { %1584 = vmatpush.bf16.msra.mxu2 %v2728_v25  ;;  %2169 = vmatpush.bf16.msra.mxu3 %v2099_v29  ;;  %v620_v39 = vsel %vm571_vm5, 0.0, %v607_v13  ;;  %v587_v44 = vrot.slane %v2537_v27, 7  ;;  %v579_v27 = vrot.slane %v2569_v56, 7  ;;  %v589_v61 = vrot.slane %v2571_v46, 7 }
  0x5e   : > { %1255 = vmatpush.bf16.msra.mxu0 %v2099_v29  ;;  %1404 = vmatpush.bf16.msra.mxu1 %v2747_v34  ;;  %v703_v40 = vpack.c.bf16 %v620_v39, %v620_v39  ;;  %v794_v60 = vunpack.c.l.b16 %v714_v42 }
  0x5f   : > { %v608_v24 = vsel %vm593_vm4, %v587_v44, %v577_v48  ;;  %v598_v46 = vsel %vm593_vm4, %v577_v48, %v587_v44 }
  0x61   : > { %2170 = vmatpush.bf16.msra.mxu3 %v2098_v33 }
  0x62   : > { %1256 = vmatpush.bf16.msra.mxu0 %v2098_v33  ;;  %1405 = vmatpush.bf16.msra.mxu1 %v2763_v43 }
  0x65   : > { %2171 = vmatpush.bf16.msrb.mxu3 %v2089_v16 }
  0x69   : > { %2172 = vmatpush.bf16.msrb.mxu3 %v2088_v21 }
  0x6d   : > { %2173 = vmatpush.bf16.msrb.mxu3 %v2087_v23  ;;  %v778_v23 = vunpack.c.l.b16 %v698_v3 }
  0x6f   : > { %v797_v9 = vpack.c.b16 %v778_v23, %v777_v2 }
  0x71   : > { %2174 = vmatpush.bf16.msrb.mxu3 %v2086_v30  ;;  %v597_v30 = vsel %vm593_vm4, %v576_v7, %v586_v31  ;;  %v622_v7 = vsel %vm571_vm5, 0.0, %v608_v24 }
  0x72   : > { %v704_v36 = vpack.c.bf16 %v597_v30, %v597_v30  ;;  %v705_v15 = vpack.c.bf16 %v622_v7, %v622_v7 }
  0x74   : > { %v784_v3 = vunpack.c.l.b16 %v704_v36 }
  0x75   : > { %2175 = vmatpush.bf16.msrb.mxu3 %v2747_v34  ;;  %v793_v34 = vunpack.c.l.b16 %v713_v47 }
  0x79   : > { %2176 = vmatpush.bf16.msrb.mxu3 %v2763_v43  ;;  %v783_v43 = vunpack.c.l.b16 %v703_v40 }
  0x7b   : > { %v800_v2 = vpack.c.b16 %v784_v3, %v783_v43 }
  0x8a   : > { %v2751_v41 = vpop.permute.xlu2 %859 }
  0x92   : > { %v858_v6 = vpop.permute.xlu2 %857 }
  0x93   : > { %v950_v58 = vsel %vm947_vm6, %v797_v9, %v858_v6 }
  0x96   : > { %v862_v54 = vpop.permute.xlu0 %861 }
  0x97   : > { %v956_v57 = vsel %vm947_vm6, %v799_v10, %v862_v54  ;;  %v699_v10 = vpack.c.bf16 %v616_v0, %v616_v0 }
  0x99   : > { %v779_v29 = vunpack.c.l.b16 %v699_v10 }
  0x9a   : > { %v932_v62 = vpop.permute.xlu1 %931  ;;  %v864_v55 = vpop.permute.xlu2 %863 }
  0x9b   : > { %v984_v5 = vsel %vm978_vm7, %v956_v57, %v932_v62  ;;  %v798_v54 = vpack.c.b16 %v780_v38, %v779_v29  ;;  %v785_v38 = vunpack.c.l.b16 %v705_v15  ;;  %v959_v30 = vsel %vm947_vm6, %v800_v2, %v864_v55 }
  0x9c   : > { %v1013_v14 = vunpack.c.l.b16 %v984_v5  ;;  %v1014_v8 = vunpack.c.h.b16 %v984_v5 }
  0x9d   : > { %v953_v0 = vsel %vm947_vm6, %v798_v54, %v2751_v41  ;;  %v805_v41 = vpack.c.b16 %v794_v60, %v793_v34 }
  0x9e   : > { %v1033_v16 = vpack.c.b16 %v1013_v14, %v1013_v14  ;;  %v1034_v20 = vpack.c.b16 %v1014_v8, %v1014_v8  ;;  %v872_v21 = vpop.permute.xlu0 %871  ;;  %v610_v14 = vsel %vm593_vm4, %v589_v61, %v579_v27 }
  0x9f   : > { %v971_v26 = vsel %vm947_vm6, %v804_v17, %v872_v21  ;;  %v588_v21 = vrot.slane %v2619_v59, 7  ;;  %v626_v28 = vsel %vm571_vm5, 0.0, %v610_v14 }
  0xa0   : > { %1074 = vst.msk [vmem:[#allocation2 + $0x10] sm:$0xf] %vm1069_vm8, %v1033_v16  ;;  %v706_v16 = vpack.c.bf16 %v598_v46, %v598_v46 }
  0xa1   : > { %1075 = vst.msk [vmem:[#allocation2 + $0x14] sm:$0xf] %vm1069_vm8, %v1034_v20  ;;  %v578_v20 = vrot.slane %v2611_v51, 7 }
  0xa2   : > { %v942_v33 = vpop.permute.xlu1 %941  ;;  %v944_v18 = vpop.permute.xlu2 %943 }
  0xa3   : > { %v994_v45 = vsel %vm978_vm7, %v971_v26, %v942_v33  ;;  %v600_v26 = vsel %vm593_vm4, %v579_v27, %v589_v61  ;;  %v786_v33 = vunpack.c.l.b16 %v706_v16  ;;  %v609_v9 = vsel %vm593_vm4, %v588_v21, %v578_v20 }
  0xa4   : > { %v1023_v49 = vunpack.c.l.b16 %v994_v45  ;;  %v1024_v50 = vunpack.c.h.b16 %v994_v45  ;;  %v709_v45 = vpack.c.bf16 %v626_v28, %v626_v28  ;;  %v710_v47 = vpack.c.bf16 %v600_v26, %v600_v26 }
  0xa5   : > { %v599_v40 = vsel %vm593_vm4, %v578_v20, %v588_v21  ;;  %v624_v36 = vsel %vm571_vm5, 0.0, %v609_v9  ;;  %v582_v26 = vrot.slane %v2642_v35, 7  ;;  %v592_v28 = vrot.slane %v2644_v37, 7 }
  0xa6   : > { %v1043_v57 = vpack.c.b16 %v1023_v49, %v1023_v49  ;;  %v1044_v52 = vpack.c.b16 %v1024_v50, %v1024_v50  ;;  %v789_v24 = vunpack.c.l.b16 %v709_v45  ;;  %v790_v27 = vunpack.c.l.b16 %v710_v47 }
  0xa7   : > { %v603_v35 = vsel %vm593_vm4, %v582_v26, %v592_v28  ;;  %v613_v37 = vsel %vm593_vm4, %v592_v28, %v582_v26 }
  0xa8   : > { %1084 = vst.msk [vmem:[#allocation2 + $0x38] sm:$0xf] %vm1069_vm8, %v1043_v57  ;;  %v2104_v63 = vld [vmem:[#allocation2 + $0x10] sm:$0xff]  ;;  %v803_v3 = vpack.c.b16 %v790_v27, %v789_v24 }
  0xa9   : > { %v928_v62 = vpop.permute.xlu0 %927  ;;  %1085 = vst.msk [vmem:[#allocation2 + $0x3c] sm:$0xf] %vm1069_vm8, %v1044_v52  ;;  %2064 = vmatmul.msk.bf16.vlgmr.msra.gmra.mxu2 %vm1224_vm9, %v2104_v63  ;;  %v801_v52 = vpack.c.b16 %v786_v33, %v785_v38  ;;  %v632_v38 = vsel %vm571_vm5, 0.0, %v613_v37  ;;  %v716_v33 = vpack.c.bf16 %v603_v35, %v603_v35 }
  0xaa   : > { %v980_v4 = vsel %vm978_vm7, %v950_v58, %v928_v62  ;;  %v930_v56 = vpop.permute.xlu1 %929  ;;  %v936_v61 = vpop.permute.xlu2 %935  ;;  %v708_v62 = vpack.c.bf16 %v599_v40, %v599_v40 }
  0xab   : > { %v1009_v5 = vunpack.c.l.b16 %v980_v4  ;;  %v1010_v6 = vunpack.c.h.b16 %v980_v4  ;;  %v982_v31 = vsel %vm978_vm7, %v953_v0, %v930_v56  ;;  %v796_v9 = vunpack.c.l.b16 %v716_v33 }
  0xac   : > { %v1011_v10 = vunpack.c.l.b16 %v982_v31  ;;  %v1012_v11 = vunpack.c.h.b16 %v982_v31  ;;  %v788_v46 = vunpack.c.l.b16 %v708_v62 }
  0xad   : > { %v1029_v8 = vpack.c.b16 %v1009_v5, %v1009_v5  ;;  %v1030_v17 = vpack.c.b16 %v1010_v6, %v1010_v6 }
  0xae   : > { %v1031_v23 = vpack.c.b16 %v1011_v10, %v1011_v10  ;;  %v1032_v13 = vpack.c.b16 %v1012_v11, %v1012_v11 }
  0xaf   : > { %1070 = vst.msk [vmem:[#allocation2] sm:$0xf] %vm1069_vm8, %v1029_v8 }
  0xb0   : > { %1071 = vst.msk [vmem:[#allocation2 + $0x4] sm:$0xf] %vm1069_vm8, %v1030_v17  ;;  %v2096_v51 = vld [vmem:[#allocation2 + $0x38] sm:$0xff] }
  0xb1   : > { %1072 = vst.msk [vmem:[#allocation2 + $0x8] sm:$0xf] %vm1069_vm8, %v1031_v23  ;;  %v874_v29 = vpop.permute.xlu0 %873  ;;  %1930 = vmatmul.msk.bf16.vlgmr.msra.gmra.mxu3 %vm1224_vm9, %v2096_v51  ;;  %v2109_v62 = vld [vmem:[#allocation2 + $0x38] sm:$0xff] }
  0xb2   : > { %1073 = vst.msk [vmem:[#allocation2 + $0xc] sm:$0xf] %vm1069_vm8, %v1032_v13  ;;  %v974_v59 = vsel %vm947_vm6, %v805_v41, %v874_v29  ;;  %v934_v42 = vpop.permute.xlu1 %933  ;;  %2177 = vmatpush.bf16.msra.mxu3 %v2567_v53  ;;  %v707_v53 = vpack.c.bf16 %v624_v36, %v624_v36  ;;  %v938_v15 = vpop.permute.xlu2 %937 }
  0xb3   : > { %v996_v39 = vsel %vm978_vm7, %v974_v59, %v944_v18  ;;  %v986_v49 = vsel %vm978_vm7, %v959_v30, %v934_v42 }
  0xb4   : > { %v1025_v48 = vunpack.c.l.b16 %v996_v39  ;;  %v1026_v44 = vunpack.c.h.b16 %v996_v39  ;;  %v1015_v50 = vunpack.c.l.b16 %v986_v49  ;;  %v1016_v54 = vunpack.c.h.b16 %v986_v49 }
  0xb5   : > { %v787_v56 = vunpack.c.l.b16 %v707_v53 }
  0xb6   : > { %v1045_v55 = vpack.c.b16 %v1025_v48, %v1025_v48  ;;  %v1046_v57 = vpack.c.b16 %v1026_v44, %v1026_v44  ;;  %v1035_v58 = vpack.c.b16 %v1015_v50, %v1015_v50  ;;  %v1036_v60 = vpack.c.b16 %v1016_v54, %v1016_v54  ;;  %2178 = vmatpush.bf16.msra.mxu3 %v2677_v32  ;;  %v2078_v54 = vld [vmem:[#allocation2 + $0x10] sm:$0xff] }
  0xb7   : > { %v2076_v34 = vld [vmem:[#allocation2] sm:$0xff]  ;;  %v802_v8 = vpack.c.b16 %v788_v46, %v787_v56 }
  0xb8   : > { %1086 = vst.msk [vmem:[#allocation2 + $0x40] sm:$0xf] %vm1069_vm8, %v1045_v55  ;;  %1988 = vmatmul.msk.bf16.vlgmr.msra.gmra.mxu1 %vm1224_vm9, %v2076_v34 }
  0xb9   : > { %1087 = vst.msk [vmem:[#allocation2 + $0x44] sm:$0xf] %vm1069_vm8, %v1046_v57  ;;  %v866_v63 = vpop.permute.xlu0 %865  ;;  %v2090_v0 = vld [vmem:[#allocation2 + $0x8] sm:$0xff] }
  0xba   : > { %1076 = vst.msk [vmem:[#allocation2 + $0x18] sm:$0xf] %vm1069_vm8, %v1035_v58  ;;  %v962_v4 = vsel %vm947_vm6, %v801_v52, %v866_v63  ;;  %1924 = vmatmul.msk.bf16.vlgmr.msra.gmra.mxu0 %vm1224_vm9, %v2090_v0  ;;  %v870_v5 = vpop.permute.xlu1 %869  ;;  %2179 = vmatpush.bf16.msra.mxu3 %v2692_v12  ;;  %v2077_v29 = vld [vmem:[#allocation2 + $0x8] sm:$0xff]  ;;  %v2083_v52 = vld [vmem:[#allocation2 + $0x38] sm:$0xff] }
  0xbb   : > { %1077 = vst.msk [vmem:[#allocation2 + $0x1c] sm:$0xf] %vm1069_vm8, %v1036_v60  ;;  %v988_v43 = vsel %vm978_vm7, %v962_v4, %v936_v61  ;;  %v968_v41 = vsel %vm947_vm6, %v803_v3, %v870_v5 }
  0xbc   : > { %v1017_v6 = vunpack.c.l.b16 %v988_v43  ;;  %v1018_v32 = vunpack.c.h.b16 %v988_v43 }
  0xbe   : > { %v1037_v7 = vpack.c.b16 %v1017_v6, %v1017_v6  ;;  %v1038_v31 = vpack.c.b16 %v1018_v32, %v1018_v32  ;;  %2180 = vmatpush.bf16.msra.mxu3 %v2704_v19  ;;  %v2905_v32 = vld [vmem:[%s2991_s6] ss:$0 sm:$0xff] }
  0xc0   : > { %1078 = vst.msk [vmem:[#allocation2 + $0x20] sm:$0xf] %vm1069_vm8, %v1037_v7  ;;  %v2097_v14 = vld [vmem:[#allocation2 + $0x40] sm:$0xff] }
  0xc1   : > { %1079 = vst.msk [vmem:[#allocation2 + $0x24] sm:$0xf] %vm1069_vm8, %v1038_v31  ;;  %v940_v17 = vpop.permute.xlu0 %939  ;;  %1931 = vmatmul.msk.bf16.gmra.mxu3 %vm1224_vm9, %v2097_v14  ;;  %v2110_v34 = vld [vmem:[#allocation2 + $0x40] sm:$0xff] }
  0xc2   : > { %v992_v10 = vsel %vm978_vm7, %v968_v41, %v940_v17  ;;  %v2105_v11 = vld [vmem:[#allocation2 + $0x18] sm:$0xff]  ;;  %v868_v12 = vpop.permute.xlu1 %867  ;;  %2181 = vmatpush.bf16.msra.mxu3 %v2716_v22  ;;  %v2091_v22 = vld [vmem:[#allocation2 + $0x10] sm:$0xff] }
  0xc3   : > { %v1021_v16 = vunpack.c.l.b16 %v992_v10  ;;  %v1022_v20 = vunpack.c.h.b16 %v992_v10  ;;  %2065 = vmatmul.msk.bf16.gmra.mxu2 %vm1224_vm9, %v2105_v11  ;;  %v965_v21 = vsel %vm947_vm6, %v802_v8, %v868_v12  ;;  %v2092_v55 = vld [vmem:[#allocation2 + $0x18] sm:$0xff] }
  0xc4   : > { %v990_v23 = vsel %vm978_vm7, %v965_v21, %v938_v15  ;;  %v2079_v58 = vld [vmem:[#allocation2 + $0x18] sm:$0xff] }
  0xc5   : > { %v1041_v2 = vpack.c.b16 %v1021_v16, %v1021_v16  ;;  %v1042_v19 = vpack.c.b16 %v1022_v20, %v1022_v20  ;;  %v1019_v13 = vunpack.c.l.b16 %v990_v23  ;;  %v1020_v18 = vunpack.c.h.b16 %v990_v23 }
  0xc6   : > { %2182 = vmatpush.bf16.msra.mxu3 %v2728_v25  ;;  %v715_v25 = vpack.c.bf16 %v632_v38, %v632_v38 }
  0xc7   : > { %1082 = vst.msk [vmem:[#allocation2 + $0x30] sm:$0xf] %vm1069_vm8, %v1041_v2  ;;  %v1039_v51 = vpack.c.b16 %v1019_v13, %v1019_v13  ;;  %v1040_v59 = vpack.c.b16 %v1020_v18, %v1020_v18 }
  0xc8   : > { %1083 = vst.msk [vmem:[#allocation2 + $0x34] sm:$0xf] %vm1069_vm8, %v1042_v19  ;;  %1989 = vmatmul.msk.bf16.gmra.mxu1 %vm1224_vm9, %v2077_v29  ;;  %v795_v39 = vunpack.c.l.b16 %v715_v25  ;;  %v2106_v47 = vld [vmem:[#allocation2 + $0x20] sm:$0xff] }
  0xc9   : > { %1080 = vst.msk [vmem:[#allocation2 + $0x28] sm:$0xf] %vm1069_vm8, %v1039_v51  ;;  %v876_v42 = vpop.permute.xlu0 %875  ;;  %v2093_v60 = vld [vmem:[#allocation2 + $0x20] sm:$0xff] }
  0xca   : > { %1925 = vmatmul.msk.bf16.gmra.mxu0 %vm1224_vm9, %v2091_v22  ;;  %1081 = vst.msk [vmem:[#allocation2 + $0x2c] sm:$0xf] %vm1069_vm8, %v1040_v59  ;;  %v806_v45 = vpack.c.b16 %v796_v9, %v795_v39  ;;  %v946_v44 = vpop.permute.xlu1 %945  ;;  %v2080_v27 = vld [vmem:[#allocation2 + $0x20] sm:$0xff] }
  0xcc   : > { %v977_v48 = vsel %vm947_vm6, %v806_v45, %v876_v42 }
  0xcd   : > { %v998_v49 = vsel %vm978_vm7, %v977_v48, %v946_v44 }
  0xce   : > { %v1027_v50 = vunpack.c.l.b16 %v998_v49  ;;  %v1028_v1 = vunpack.c.h.b16 %v998_v49 }
  0xcf   : > { %v2082_v30 = vld [vmem:[#allocation2 + $0x30] sm:$0xff] }
  0xd0   : > { %v1047_v40 = vpack.c.b16 %v1027_v50, %v1027_v50  ;;  %v1048_v36 = vpack.c.b16 %v1028_v1, %v1028_v1  ;;  %v2108_v24 = vld [vmem:[#allocation2 + $0x30] sm:$0xff] }
  0xd1   : > { %1994 = vmatmul.msk.bf16.vlgmr.msrb.gmra.mxu3 %vm1224_vm9, %v2082_v30  ;;  %v2107_v57 = vld [vmem:[#allocation2 + $0x28] sm:$0xff]  ;;  %v2095_v0 = vld [vmem:[#allocation2 + $0x30] sm:$0xff] }
  0xd2   : > { %1088 = vst.msk [vmem:[#allocation2 + $0x48] sm:$0xf] %vm1069_vm8, %v1047_v40  ;;  %v2094_v61 = vld [vmem:[#allocation2 + $0x28] sm:$0xff] }
  0xd3   : > { %2066 = vmatmul.msk.bf16.gmra.mxu2 %vm1224_vm9, %v2106_v47  ;;  %1089 = vst.msk [vmem:[#allocation2 + $0x4c] sm:$0xf] %vm1069_vm8, %v1048_v36  ;;  %v2081_v63 = vld [vmem:[#allocation2 + $0x28] sm:$0xff] }
  0xd8   : > { %1990 = vmatmul.msk.bf16.gmra.mxu1 %vm1224_vm9, %v2078_v54 }
  0xda   : > { %1926 = vmatmul.msk.bf16.gmra.mxu0 %vm1224_vm9, %v2092_v55  ;;  %v2111_v53 = vld [vmem:[#allocation2 + $0x48] sm:$0xff] }
  0xe1   : > { %1995 = vmatmul.msk.bf16.gmra.mxu3 %vm1224_vm9, %v2083_v52 }
  0xe3   : > { %2067 = vmatmul.msk.bf16.gmra.mxu2 %vm1224_vm9, %v2107_v57 }
  0xe8   : > { %1991 = vmatmul.msk.bf16.gmra.mxu1 %vm1224_vm9, %v2079_v58 }
  0xea   : > { %1927 = vmatmul.msk.bf16.gmra.mxu0 %vm1224_vm9, %v2093_v60 }
  0xf1   : > { %2070 = vmatmul.msk.bf16.vlgmr.msra.gmra.mxu3 %vm1224_vm9, %v2110_v34 }
  0xf3   : > { %2068 = vmatmul.msk.bf16.gmra.mxu2 %vm1224_vm9, %v2108_v24 }
  0xf8   : > { %1992 = vmatmul.msk.bf16.gmra.mxu1 %vm1224_vm9, %v2080_v27 }
  0xfa   : > { %1928 = vmatmul.msk.bf16.gmra.mxu0 %vm1224_vm9, %v2094_v61 }
 0x101   : > { %2071 = vmatmul.msk.bf16.gmra.mxu3 %vm1224_vm9, %v2111_v53 }
 0x103   : > { %2069 = vmatmul.msk.bf16.gmra.mxu2 %vm1224_vm9, %v2109_v62 }
 0x108   : > { %1993 = vmatmul.msk.bf16.gmra.mxu1 %vm1224_vm9, %v2081_v63 }
 0x10a   : > { %1929 = vmatmul.msk.bf16.gmra.mxu0 %vm1224_vm9, %v2095_v0 }
 0x12c   : > { %v1586_v4 = vpop.f32.mrf.mxu2 }
 0x134   : > { %v2899_v3 = vpop.f32.mrf.mxu3  ;;  %v1588_v41 = vpop.f32.mrf.mxu2 }
 0x135   : > { %v1407_v43 = vpop.f32.mrf.mxu1 }
 0x137   : > { %v1258_v5 = vpop.f32.mrf.mxu0 }
 0x138   : > { %v1408_v6 = vadd.f32 %v1407_v43, %v1258_v5 }
 0x13a   : > { %v1626_v56 = vadd.f32 %v1586_v4, %v1408_v6 }
 0x13c   : > { %v1646_v46 = vadd.f32 %v2905_v32, %v1626_v56  ;;  %v2913_v31 = vpop.f32.mrf.mxu3 }
 0x13d   : > { %v1409_v7 = vpop.f32.mrf.mxu1 }
 0x13e   : > { %1663 = vst.msk [vmem:[%s2910_s18] sm:$0xff] %vm1662_vm10, %v1646_v46 }
 0x13f   : > { %v1260_v14 = vpop.f32.mrf.mxu0 }
 0x140   : > { %v1410_v8 = vadd.f32 %v1409_v7, %v1260_v14 }
 0x142   : > { %v1627_v17 = vadd.f32 %v1588_v41, %v1410_v8 }
 0x144   : > { %v1647_v10 = vadd.f32 %v2905_v32, %v1627_v17  ;;  %v2918_v15 = vpop.f32.mrf.mxu3 }
 0x145   : > { %v1412_v11 = vpop.f32.mrf.mxu1 }
 0x146   : > { %1664 = vst.msk [vmem:[%s2910_s18 + $0x8] sm:$0xff] %vm1662_vm10, %v1647_v10  ;;  %v1591_v16 = vpop.f32.mrf.mxu2 }
 0x147   : > { %v1263_v20 = vpop.f32.mrf.mxu0 }
 0x148   : > { %v1413_v12 = vadd.f32 %v1412_v11, %v1263_v20 }
 0x14a   : > { %v1628_v21 = vadd.f32 %v1591_v16, %v1413_v12 }
 0x14c   : > { %v1648_v2 = vadd.f32 %v2905_v32, %v1628_v21  ;;  %v2923_v23 = vpop.f32.mrf.mxu3 }
 0x14d   : > { %v1414_v19 = vpop.f32.mrf.mxu1 }
 0x14e   : > { %1665 = vst.msk [vmem:[%s2910_s18 + $0x10] sm:$0xff] %vm1662_vm10, %v1648_v2  ;;  %v1593_v13 = vpop.f32.mrf.mxu2 }
 0x14f   : > { %v1265_v18 = vpop.f32.mrf.mxu0 }
 0x150   : > { %v1415_v26 = vadd.f32 %v1414_v19, %v1265_v18 }
 0x152   : > { %v1629_v28 = vadd.f32 %v1593_v13, %v1415_v26 }
 0x154   : > { %v1649_v29 = vadd.f32 %v2905_v32, %v1629_v28  ;;  %v1437_v59 = vpop.f32.mrf.mxu3 }
 0x155   : > { %v1417_v51 = vpop.f32.mrf.mxu1  ;;  %v1438_v34 = vadd.f32 %v1437_v59, %v2899_v3 }
 0x156   : > { %1666 = vst.msk [vmem:[%s2910_s18 + $0x18] sm:$0xff] %vm1662_vm10, %v1649_v29  ;;  %v1596_v22 = vpop.f32.mrf.mxu2 }
 0x157   : > { %v1268_v35 = vpop.f32.mrf.mxu0 }
 0x158   : > { %v1418_v37 = vadd.f32 %v1417_v51, %v1268_v35 }
 0x15a   : > { %v1630_v38 = vadd.f32 %v1596_v22, %v1418_v37 }
 0x15c   : > { %v1650_v33 = vadd.f32 %v2905_v32, %v1630_v38  ;;  %v1439_v9 = vpop.f32.mrf.mxu3 }
 0x15d   : > { %v1419_v25 = vpop.f32.mrf.mxu1  ;;  %v1440_v5 = vadd.f32 %v1439_v9, %v2913_v31 }
 0x15e   : > { %1667 = vst.msk [vmem:[%s2910_s18 + $0x20] sm:$0xff] %vm1662_vm10, %v1650_v33  ;;  %v1598_v30 = vpop.f32.mrf.mxu2 }
 0x15f   : > { %v1270_v39 = vpop.f32.mrf.mxu0 }
 0x160   : > { %v1420_v42 = vadd.f32 %v1419_v25, %v1270_v39 }
 0x162   : > { %v1631_v45 = vadd.f32 %v1598_v30, %v1420_v42 }
 0x164   : > { %v1651_v47 = vadd.f32 %v2905_v32, %v1631_v45  ;;  %v1442_v44 = vpop.f32.mrf.mxu3 }
 0x165   : > { %v1422_v48 = vpop.f32.mrf.mxu1  ;;  %v1443_v31 = vadd.f32 %v1442_v44, %v2918_v15 }
 0x166   : > { %1668 = vst.msk [vmem:[%s2910_s18 + $0x28] sm:$0xff] %vm1662_vm10, %v1651_v47  ;;  %v1601_v49 = vpop.f32.mrf.mxu2 }
 0x167   : > { %v1273_v50 = vpop.f32.mrf.mxu0 }
 0x168   : > { %v1423_v1 = vadd.f32 %v1422_v48, %v1273_v50 }
 0x16a   : > { %v1632_v54 = vadd.f32 %v1601_v49, %v1423_v1 }
 0x16c   : > { %v1652_v40 = vadd.f32 %v2905_v32, %v1632_v54  ;;  %v1444_v55 = vpop.f32.mrf.mxu3 }
 0x16d   : > { %v1424_v36 = vpop.f32.mrf.mxu1  ;;  %v1445_v18 = vadd.f32 %v1444_v55, %v2923_v23 }
 0x16e   : > { %1669 = vst.msk [vmem:[%s2910_s18 + $0x30] sm:$0xff] %vm1662_vm10, %v1652_v40  ;;  %v1603_v57 = vpop.f32.mrf.mxu2 }
 0x16f   : > { %v1275_v52 = vpop.f32.mrf.mxu0 }
 0x170   : > { %v1425_v58 = vadd.f32 %v1424_v36, %v1275_v52 }
 0x172   : > { %v1633_v60 = vadd.f32 %v1603_v57, %v1425_v58 }
 0x174   : > { %v1653_v24 = vadd.f32 %v2905_v32, %v1633_v60  ;;  %v1616_v61 = vpop.f32.mrf.mxu3 }
 0x175   : > { %v1427_v27 = vpop.f32.mrf.mxu1  ;;  %v1638_v62 = vadd.f32 %v1616_v61, %v1438_v34 }
 0x176   : > { %1670 = vst.msk [vmem:[%s2910_s18 + $0x38] sm:$0xff] %vm1662_vm10, %v1653_v24  ;;  %v1606_v53 = vpop.f32.mrf.mxu2 }
 0x177   : > { %v1278_v63 = vpop.f32.mrf.mxu0  ;;  %v1658_v0 = vadd.f32 %v2905_v32, %v1638_v62 }
 0x178   : > { %v1428_v4 = vadd.f32 %v1427_v27, %v1278_v63 }
 0x179   : > { %1675 = vst.msk [vmem:[%s2910_s18 + $0x60] sm:$0xff] %vm1662_vm10, %v1658_v0 }
 0x17a   : > { %v1634_v43 = vadd.f32 %v1606_v53, %v1428_v4 }
 0x17c   : > { %v1654_v3 = vadd.f32 %v2905_v32, %v1634_v43  ;;  %v1618_v56 = vpop.f32.mrf.mxu3 }
 0x17d   : > { %v1429_v6 = vpop.f32.mrf.mxu1  ;;  %v1639_v7 = vadd.f32 %v1618_v56, %v1440_v5 }
 0x17e   : > { %1671 = vst.msk [vmem:[%s2910_s18 + $0x40] sm:$0xff] %vm1662_vm10, %v1654_v3  ;;  %v1608_v46 = vpop.f32.mrf.mxu2 }
 0x17f   : > { %v1280_v41 = vpop.f32.mrf.mxu0  ;;  %v1659_v14 = vadd.f32 %v2905_v32, %v1639_v7 }
 0x180   : > { %v1430_v8 = vadd.f32 %v1429_v6, %v1280_v41 }
 0x181   : > { %1676 = vst.msk [vmem:[%s2910_s18 + $0x68] sm:$0xff] %vm1662_vm10, %v1659_v14 }
 0x182   : > { %v1635_v17 = vadd.f32 %v1608_v46, %v1430_v8 }
 0x184   : > { %v1655_v10 = vadd.f32 %v2905_v32, %v1635_v17  ;;  %v1621_v16 = vpop.f32.mrf.mxu3 }
 0x185   : > { %v1432_v11 = vpop.f32.mrf.mxu1  ;;  %v1640_v20 = vadd.f32 %v1621_v16, %v1443_v31 }
 0x186   : > { %1672 = vst.msk [vmem:[%s2910_s18 + $0x48] sm:$0xff] %vm1662_vm10, %v1655_v10  ;;  %v1611_v12 = vpop.f32.mrf.mxu2 }
 0x187   : > { %v1283_v21 = vpop.f32.mrf.mxu0  ;;  %v1660_v2 = vadd.f32 %v2905_v32, %v1640_v20 }
 0x188   : > { %v1433_v19 = vadd.f32 %v1432_v11, %v1283_v21 }
 0x189   : > { %1677 = vst.msk [vmem:[%s2910_s18 + $0x70] sm:$0xff] %vm1662_vm10, %v1660_v2 }
 0x18a   : > { %v1636_v13 = vadd.f32 %v1611_v12, %v1433_v19 }
 0x18c   : > { %v1656_v15 = vadd.f32 %v2905_v32, %v1636_v13  ;;  %v1623_v26 = vpop.f32.mrf.mxu3 }
 0x18d   : > { %v1641_v28 = vadd.f32 %v1623_v26, %v1445_v18  ;;  %v1434_v29 = vpop.f32.mrf.mxu1 }
 0x18e   : > { %1673 = vst.msk [vmem:[%s2910_s18 + $0x50] sm:$0xff] %vm1662_vm10, %v1656_v15  ;;  %v1613_v35 = vpop.f32.mrf.mxu2 }
 0x18f   : > { %v1285_v51 = vpop.f32.mrf.mxu0  ;;  %v1661_v59 = vadd.f32 %v2905_v32, %v1641_v28 }
 0x190   : > { %v1435_v22 = vadd.f32 %v1434_v29, %v1285_v51 }
 0x191   : > { %1678 = vst.msk [vmem:[%s2910_s18 + $0x78] sm:$0xff] %vm1662_vm10, %v1661_v59 }
 0x192   : > { %v1637_v37 = vadd.f32 %v1613_v35, %v1435_v22 }
 0x194   : > { %v1657_v38 = vadd.f32 %v2905_v32, %v1637_v37 }
 0x196   : > { %1674 = vst.msk [vmem:[%s2910_s18 + $0x58] sm:$0xff] %vm1662_vm10, %v1657_v38 }
 0x197 PF: > { %s17_s28 = sadd.s32 1, %s2266_s28   ;;  %s2996_s24 = smov %s2258_s26 }
 0x198   : > { %p14_p12 = scmp.ge.s32.totalorder %s17_s28, 6   ;;  %s2997_s25 = smov %s2262_s27 }
 0x199   : > { %s2998_s26 = smov %s3001_s29  ;;  %s2999_s27 = smov %s3005_s30 }
 0x19a   :  { %16 = sbr.rel (!%p14_p12) target bundleno = 3 (0x3), region = 88 }

</bundles_post_ra>
